<compile_context>
chip_gen: v7x
topology: tpu7x:2x2x1
jax: 0.10.0
libtpu: 0.0.40
codegen_flags: <defaults>
</compile_context>

<pallas_src>
import numpy as np
import jax
import jax.numpy as jnp
from jax.experimental import pallas as pl
from jax.experimental.pallas import tpu as pltpu


def _build_pool_matrix(H, W, Hp, Wp):
    """(Hp*Wp, (H+2)*(W+2)) matrix: averages each 3x3 window of the conv
    output (addressed in padded coordinates) and zeroes the padded border /
    any AvgPool remainder rows/cols."""
    S2 = (H + 2) * (W + 2)
    q = np.zeros((Hp * Wp, S2), np.float32)
    for hp in range(Hp):
        for wp in range(Wp):
            for dh in range(3):
                for dw in range(3):
                    h = 3 * hp + dh
                    w = 3 * wp + dw
                    q[hp * Wp + wp, (h + 1) * (W + 2) + (w + 1)] = 1.0 / 9.0
    return q


def my_conv_net_forward(x, params):
    N, C, H, W = x.shape
    OC = params["conv_w"].shape[0]          # 32
    NCLS = params["fc_w"].shape[0]          # 5
    Hp, Wp = H // 3, W // 3
    P = Hp * Wp
    S2 = (H + 2) * (W + 2)                  # conv output rows per image (padded coords)
    PAD = W + 3                             # max |row shift| among the 9 conv taps
    SLAB = ((S2 + 2 * PAD + 7) // 8) * 8    # per-image input rows, sublane aligned

    # ---- wrapper glue (small, fused by XLA; no 9x im2col expansion) --------
    x_cl = jnp.transpose(x, (0, 2, 3, 1)).astype(jnp.float32)   # (N,H,W,C)
    x_cl = jnp.pad(x_cl, ((0, 0), (1, 1), (1, 1), (0, 0)))      # conv padding=1
    x_cl = x_cl.reshape(N, S2, C)
    x_cl = jnp.pad(x_cl, ((0, 0), (PAD, SLAB - S2 - PAD), (0, 0)))
    x2d = x_cl.reshape(N * SLAB, C)                             # disjoint per-image slabs

    # conv weight rows ordered (kh, kw, c) to match the in-kernel tap order
    w2d = jnp.transpose(params["conv_w"], (2, 3, 1, 0)).reshape(9 * C, OC)
    bc_row = params["conv_b"].reshape(1, OC).astype(jnp.float32)
    # fc weight reordered so rows are (p=hp*Wp+wp, oc); PyTorch flatten is oc*P + p
    g_mat = jnp.transpose(params["fc_w"].reshape(NCLS, OC, P), (2, 1, 0))
    g_mat = g_mat.reshape(P * OC, NCLS).astype(jnp.float32)
    bf_row = params["fc_b"].reshape(1, NCLS).astype(jnp.float32)
    q_mat = jnp.asarray(_build_pool_matrix(H, W, Hp, Wp))       # (P, S2) constant

    def kernel(x_ref, w_ref, bc_ref, q_ref, g_ref, bf_ref, o_ref):
        # --- conv: in-kernel im2col as 9 shifted-slice matmuls (f32 acc) ----
        acc = jnp.zeros((S2, OC), jnp.float32)
        for kh in range(3):
            for kw in range(3):
                k = kh * 3 + kw
                d = (kh - 1) * (W + 2) + (kw - 1)
                lhs = x_ref[PAD + d:PAD + d + S2, :]            # (S2, C) static slice
                acc = acc + jnp.dot(lhs, w_ref[k * C:(k + 1) * C, :],
                                    preferred_element_type=jnp.float32)
        # --- bias + ReLU (Dropout2d is identity at eval) --------------------
        a = jnp.maximum(acc + bc_ref[...], 0.0)                 # (S2, OC)
        # --- AvgPool2d(3,3) + border drop as one small matmul (stays in VMEM)
        pooled = jnp.dot(q_ref[...], a,
                         preferred_element_type=jnp.float32)    # (P, OC)
        # --- Linear(OC*P -> NCLS) against the ORIGINAL fc weight (K = OC*P) -
        out = bf_ref[...]                                       # (1, NCLS)
        for p in range(P):
            out = out + jnp.dot(pooled[p:p + 1, :],
                                g_ref[p * OC:(p + 1) * OC, :],
                                preferred_element_type=jnp.float32)
        o_ref[0] = out

    out3 = pl.pallas_call(
        kernel,
        out_shape=jax.ShapeDtypeStruct((N, 1, NCLS), jnp.float32),
        grid=(N,),
        in_specs=[
            pl.BlockSpec((SLAB, C), lambda n: (n, 0)),          # per-image input slab
            pl.BlockSpec((9 * C, OC), lambda n: (0, 0)),        # conv weight (resident)
            pl.BlockSpec((1, OC), lambda n: (0, 0)),            # conv bias
            pl.BlockSpec((P, S2), lambda n: (0, 0)),            # pooling matrix
            pl.BlockSpec((P * OC, NCLS), lambda n: (0, 0)),     # fc weight
            pl.BlockSpec((1, NCLS), lambda n: (0, 0)),          # fc bias
        ],
        out_specs=pl.BlockSpec((1, 1, NCLS), lambda n: (n, 0, 0)),
        compiler_params=pltpu.CompilerParams(
            dimension_semantics=("parallel",)),                 # batch across TCs (v7x)
    )(x2d, w2d, bc_row, q_mat, g_mat, bf_row)
    return out3.reshape(N, NCLS)


# ---------------------------------------------------------------------------
# Pure-JAX reference of the PyTorch forward (inference mode, full f32)
# ---------------------------------------------------------------------------

def reference_forward(x, params):
    y = jax.lax.conv_general_dilated(
        x, params["conv_w"], window_strides=(1, 1), padding=((1, 1), (1, 1)),
        dimension_numbers=("NCHW", "OIHW", "NCHW"),
        precision=jax.lax.Precision.HIGHEST)
    y = y + params["conv_b"][None, :, None, None]
    y = jnp.maximum(y, 0.0)                                  # Dropout2d -> identity (eval)
    N, Co, H, W = y.shape
    Hp, Wp = H // 3, W // 3
    yt = y[:, :, :3 * Hp, :3 * Wp]                           # AvgPool remainder truncation
    pooled = yt.reshape(N, Co, Hp, 3, Wp, 3).mean(axis=(3, 5))
    flat = pooled.reshape(N, -1)
    return jnp.dot(flat, params["fc_w"].T,
                   precision=jax.lax.Precision.HIGHEST) + params["fc_b"]


if __name__ == "__main__":
    # Shapes consistent with the module: in_chanels=4, inputsize=(12, 12)
    #   -> width = height = 4, classifier = Linear(32*4*4=512, 5)
    N, C, H, W = 2, 4, 12, 12
    Hp, Wp = H // 3, W // 3

    key = jax.random.PRNGKey(0)
    k1, k2, k3, k4, k5 = jax.random.split(key, 5)
    params = {
        "conv_w": 0.10 * jax.random.normal(k1, (32, C, 3, 3), jnp.float32),
        "conv_b": 0.10 * jax.random.normal(k2, (32,), jnp.float32),
        "fc_w":   0.05 * jax.random.normal(k3, (5, 32 * Hp * Wp), jnp.float32),
        "fc_b":   0.05 * jax.random.normal(k4, (5,), jnp.float32),
    }
    x = jax.random.normal(k5, (N, C, H, W), jnp.float32)

    fwd = jax.jit(my_conv_net_forward)
    out = jax.block_until_ready(fwd(x, params))
    ref = jax.block_until_ready(reference_forward(x, params))

    assert out.shape == (N, 5) and out.dtype == jnp.float32
    # Kernel uses default (single-pass bf16) MXU precision per perf guidance,
    # reference is full-f32 HIGHEST -> compare with a bf16-class tolerance.
    if not jnp.allclose(out, ref, rtol=2e-2, atol=2e-2):
        raise AssertionError(
            f"Pallas/ref mismatch, max abs err = {float(jnp.max(jnp.abs(out - ref)))}")
    print("KERNEL_OK")
</pallas_src>

<mosaic_0001>
module attributes {stable_mosaic.version = 11 : i64} {
  func.func @kernel(%arg0: i32, %arg1: memref<232x4xf32, #tpu.memory_space<vmem>>, %arg2: memref<36x32xf32, #tpu.memory_space<vmem>>, %arg3: memref<1x32xf32, #tpu.memory_space<vmem>>, %arg4: memref<16x196xf32, #tpu.memory_space<vmem>>, %arg5: memref<512x5xf32, #tpu.memory_space<vmem>>, %arg6: memref<1x5xf32, #tpu.memory_space<vmem>>, %arg7: memref<1x1x5xf32, #tpu.memory_space<vmem>>) attributes {dimension_semantics = [#tpu.dimension_semantics<parallel>], iteration_bounds = array<i64: 2>, scalar_prefetch = 0 : i64, scratch_operands = 0 : i64, tpu.core_type = #tpu.core_type<tc>, window_params = [{transform_indices = @transform_0, window_bounds = array<i64: 232, 4>}, {pipeline_mode = #tpu.pipeline_mode<synchronous>, transform_indices = @transform_1, window_bounds = array<i64: 36, 32>}, {pipeline_mode = #tpu.pipeline_mode<synchronous>, transform_indices = @transform_2, window_bounds = array<i64: 1, 32>}, {pipeline_mode = #tpu.pipeline_mode<synchronous>, transform_indices = @transform_3, window_bounds = array<i64: 16, 196>}, {pipeline_mode = #tpu.pipeline_mode<synchronous>, transform_indices = @transform_4, window_bounds = array<i64: 512, 5>}, {pipeline_mode = #tpu.pipeline_mode<synchronous>, transform_indices = @transform_5, window_bounds = array<i64: 1, 5>}, {transform_indices = @transform_6, window_bounds = array<i64: 1, 1, 5>}]} {
    %cst = arith.constant 0.000000e+00 : f32
    %0 = vector.broadcast %cst : f32 to vector<196x32xf32>
    %c0 = arith.constant 0 : index
    %c0_0 = arith.constant 0 : index
    %1 = vector.load %arg1[%c0, %c0_0] : memref<232x4xf32, #tpu.memory_space<vmem>>, vector<196x4xf32>
    %c0_1 = arith.constant 0 : index
    %c0_2 = arith.constant 0 : index
    %2 = vector.load %arg2[%c0_1, %c0_2] : memref<36x32xf32, #tpu.memory_space<vmem>>, vector<4x32xf32>
    %cst_3 = arith.constant dense<0.000000e+00> : vector<196x32xf32>
    %3 = tpu.matmul %1, %2, %cst_3 {dimension_numbers = #tpu.dot_dimension_numbers<[1], [0], [0], [1], [0, 0, 1, 1], [], []>} : vector<196x4xf32>, vector<4x32xf32>, vector<196x32xf32> -> vector<196x32xf32>
    %4 = arith.addf %0, %3 : vector<196x32xf32>
    %c1 = arith.constant 1 : index
    %c0_4 = arith.constant 0 : index
    %5 = vector.load %arg1[%c1, %c0_4] : memref<232x4xf32, #tpu.memory_space<vmem>>, vector<196x4xf32>
    %c4 = arith.constant 4 : index
    %c0_5 = arith.constant 0 : index
    %6 = vector.load %arg2[%c4, %c0_5] : memref<36x32xf32, #tpu.memory_space<vmem>>, vector<4x32xf32>
    %cst_6 = arith.constant dense<0.000000e+00> : vector<196x32xf32>
    %7 = tpu.matmul %5, %6, %cst_6 {dimension_numbers = #tpu.dot_dimension_numbers<[1], [0], [0], [1], [0, 0, 1, 1], [], []>} : vector<196x4xf32>, vector<4x32xf32>, vector<196x32xf32> -> vector<196x32xf32>
    %8 = arith.addf %4, %7 : vector<196x32xf32>
    %c2 = arith.constant 2 : index
    %c0_7 = arith.constant 0 : index
    %9 = vector.load %arg1[%c2, %c0_7] : memref<232x4xf32, #tpu.memory_space<vmem>>, vector<196x4xf32>
    %c8 = arith.constant 8 : index
    %c0_8 = arith.constant 0 : index
    %10 = vector.load %arg2[%c8, %c0_8] : memref<36x32xf32, #tpu.memory_space<vmem>>, vector<4x32xf32>
    %cst_9 = arith.constant dense<0.000000e+00> : vector<196x32xf32>
    %11 = tpu.matmul %9, %10, %cst_9 {dimension_numbers = #tpu.dot_dimension_numbers<[1], [0], [0], [1], [0, 0, 1, 1], [], []>} : vector<196x4xf32>, vector<4x32xf32>, vector<196x32xf32> -> vector<196x32xf32>
    %12 = arith.addf %8, %11 : vector<196x32xf32>
    %c14 = arith.constant 14 : index
    %c0_10 = arith.constant 0 : index
    %13 = vector.load %arg1[%c14, %c0_10] : memref<232x4xf32, #tpu.memory_space<vmem>>, vector<196x4xf32>
    %c12 = arith.constant 12 : index
    %c0_11 = arith.constant 0 : index
    %14 = vector.load %arg2[%c12, %c0_11] : memref<36x32xf32, #tpu.memory_space<vmem>>, vector<4x32xf32>
    %cst_12 = arith.constant dense<0.000000e+00> : vector<196x32xf32>
    %15 = tpu.matmul %13, %14, %cst_12 {dimension_numbers = #tpu.dot_dimension_numbers<[1], [0], [0], [1], [0, 0, 1, 1], [], []>} : vector<196x4xf32>, vector<4x32xf32>, vector<196x32xf32> -> vector<196x32xf32>
    %16 = arith.addf %12, %15 : vector<196x32xf32>
    %c15 = arith.constant 15 : index
    %c0_13 = arith.constant 0 : index
    %17 = vector.load %arg1[%c15, %c0_13] : memref<232x4xf32, #tpu.memory_space<vmem>>, vector<196x4xf32>
    %c16 = arith.constant 16 : index
    %c0_14 = arith.constant 0 : index
    %18 = vector.load %arg2[%c16, %c0_14] : memref<36x32xf32, #tpu.memory_space<vmem>>, vector<4x32xf32>
    %cst_15 = arith.constant dense<0.000000e+00> : vector<196x32xf32>
    %19 = tpu.matmul %17, %18, %cst_15 {dimension_numbers = #tpu.dot_dimension_numbers<[1], [0], [0], [1], [0, 0, 1, 1], [], []>} : vector<196x4xf32>, vector<4x32xf32>, vector<196x32xf32> -> vector<196x32xf32>
    %20 = arith.addf %16, %19 : vector<196x32xf32>
    %c16_16 = arith.constant 16 : index
    %c0_17 = arith.constant 0 : index
    %21 = vector.load %arg1[%c16_16, %c0_17] : memref<232x4xf32, #tpu.memory_space<vmem>>, vector<196x4xf32>
    %c20 = arith.constant 20 : index
    %c0_18 = arith.constant 0 : index
    %22 = vector.load %arg2[%c20, %c0_18] : memref<36x32xf32, #tpu.memory_space<vmem>>, vector<4x32xf32>
    %cst_19 = arith.constant dense<0.000000e+00> : vector<196x32xf32>
    %23 = tpu.matmul %21, %22, %cst_19 {dimension_numbers = #tpu.dot_dimension_numbers<[1], [0], [0], [1], [0, 0, 1, 1], [], []>} : vector<196x4xf32>, vector<4x32xf32>, vector<196x32xf32> -> vector<196x32xf32>
    %24 = arith.addf %20, %23 : vector<196x32xf32>
    %c28 = arith.constant 28 : index
    %c0_20 = arith.constant 0 : index
    %25 = vector.load %arg1[%c28, %c0_20] : memref<232x4xf32, #tpu.memory_space<vmem>>, vector<196x4xf32>
    %c24 = arith.constant 24 : index
    %c0_21 = arith.constant 0 : index
    %26 = vector.load %arg2[%c24, %c0_21] : memref<36x32xf32, #tpu.memory_space<vmem>>, vector<4x32xf32>
    %cst_22 = arith.constant dense<0.000000e+00> : vector<196x32xf32>
    %27 = tpu.matmul %25, %26, %cst_22 {dimension_numbers = #tpu.dot_dimension_numbers<[1], [0], [0], [1], [0, 0, 1, 1], [], []>} : vector<196x4xf32>, vector<4x32xf32>, vector<196x32xf32> -> vector<196x32xf32>
    %28 = arith.addf %24, %27 : vector<196x32xf32>
    %c29 = arith.constant 29 : index
    %c0_23 = arith.constant 0 : index
    %29 = vector.load %arg1[%c29, %c0_23] : memref<232x4xf32, #tpu.memory_space<vmem>>, vector<196x4xf32>
    %c28_24 = arith.constant 28 : index
    %c0_25 = arith.constant 0 : index
    %30 = vector.load %arg2[%c28_24, %c0_25] : memref<36x32xf32, #tpu.memory_space<vmem>>, vector<4x32xf32>
    %cst_26 = arith.constant dense<0.000000e+00> : vector<196x32xf32>
    %31 = tpu.matmul %29, %30, %cst_26 {dimension_numbers = #tpu.dot_dimension_numbers<[1], [0], [0], [1], [0, 0, 1, 1], [], []>} : vector<196x4xf32>, vector<4x32xf32>, vector<196x32xf32> -> vector<196x32xf32>
    %32 = arith.addf %28, %31 : vector<196x32xf32>
    %c30 = arith.constant 30 : index
    %c0_27 = arith.constant 0 : index
    %33 = vector.load %arg1[%c30, %c0_27] : memref<232x4xf32, #tpu.memory_space<vmem>>, vector<196x4xf32>
    %c32 = arith.constant 32 : index
    %c0_28 = arith.constant 0 : index
    %34 = vector.load %arg2[%c32, %c0_28] : memref<36x32xf32, #tpu.memory_space<vmem>>, vector<4x32xf32>
    %cst_29 = arith.constant dense<0.000000e+00> : vector<196x32xf32>
    %35 = tpu.matmul %33, %34, %cst_29 {dimension_numbers = #tpu.dot_dimension_numbers<[1], [0], [0], [1], [0, 0, 1, 1], [], []>} : vector<196x4xf32>, vector<4x32xf32>, vector<196x32xf32> -> vector<196x32xf32>
    %36 = arith.addf %32, %35 : vector<196x32xf32>
    %c0_30 = arith.constant 0 : index
    %c0_31 = arith.constant 0 : index
    %37 = vector.load %arg3[%c0_30, %c0_31] : memref<1x32xf32, #tpu.memory_space<vmem>>, vector<1x32xf32>
    %38 = vector.broadcast %37 : vector<1x32xf32> to vector<196x32xf32>
    %39 = arith.addf %36, %38 : vector<196x32xf32>
    %cst_32 = arith.constant 0.000000e+00 : f32
    %40 = vector.broadcast %cst_32 : f32 to vector<196x32xf32>
    %41 = arith.maximumf %39, %40 : vector<196x32xf32>
    %c0_33 = arith.constant 0 : index
    %c0_34 = arith.constant 0 : index
    %42 = vector.load %arg4[%c0_33, %c0_34] : memref<16x196xf32, #tpu.memory_space<vmem>>, vector<16x196xf32>
    %cst_35 = arith.constant dense<0.000000e+00> : vector<16x32xf32>
    %43 = tpu.matmul %42, %41, %cst_35 {dimension_numbers = #tpu.dot_dimension_numbers<[1], [0], [0], [1], [0, 0, 1, 1], [], []>} : vector<16x196xf32>, vector<196x32xf32>, vector<16x32xf32> -> vector<16x32xf32>
    %c0_36 = arith.constant 0 : index
    %c0_37 = arith.constant 0 : index
    %44 = vector.load %arg6[%c0_36, %c0_37] : memref<1x5xf32, #tpu.memory_space<vmem>>, vector<1x5xf32>
    %45 = vector.extract_strided_slice %43 {offsets = [0, 0], sizes = [1, 32], strides = [1, 1]} : vector<16x32xf32> to vector<1x32xf32>
    %c0_38 = arith.constant 0 : index
    %c0_39 = arith.constant 0 : index
    %46 = vector.load %arg5[%c0_38, %c0_39] : memref<512x5xf32, #tpu.memory_space<vmem>>, vector<32x5xf32>
    %cst_40 = arith.constant dense<0.000000e+00> : vector<1x5xf32>
    %47 = tpu.matmul %45, %46, %cst_40 {dimension_numbers = #tpu.dot_dimension_numbers<[1], [0], [0], [1], [0, 0, 1, 1], [], []>} : vector<1x32xf32>, vector<32x5xf32>, vector<1x5xf32> -> vector<1x5xf32>
    %48 = arith.addf %44, %47 : vector<1x5xf32>
    %49 = vector.extract_strided_slice %43 {offsets = [1, 0], sizes = [1, 32], strides = [1, 1]} : vector<16x32xf32> to vector<1x32xf32>
    %c32_41 = arith.constant 32 : index
    %c0_42 = arith.constant 0 : index
    %50 = vector.load %arg5[%c32_41, %c0_42] : memref<512x5xf32, #tpu.memory_space<vmem>>, vector<32x5xf32>
    %cst_43 = arith.constant dense<0.000000e+00> : vector<1x5xf32>
    %51 = tpu.matmul %49, %50, %cst_43 {dimension_numbers = #tpu.dot_dimension_numbers<[1], [0], [0], [1], [0, 0, 1, 1], [], []>} : vector<1x32xf32>, vector<32x5xf32>, vector<1x5xf32> -> vector<1x5xf32>
    %52 = arith.addf %48, %51 : vector<1x5xf32>
    %53 = vector.extract_strided_slice %43 {offsets = [2, 0], sizes = [1, 32], strides = [1, 1]} : vector<16x32xf32> to vector<1x32xf32>
    %c64 = arith.constant 64 : index
    %c0_44 = arith.constant 0 : index
    %54 = vector.load %arg5[%c64, %c0_44] : memref<512x5xf32, #tpu.memory_space<vmem>>, vector<32x5xf32>
    %cst_45 = arith.constant dense<0.000000e+00> : vector<1x5xf32>
    %55 = tpu.matmul %53, %54, %cst_45 {dimension_numbers = #tpu.dot_dimension_numbers<[1], [0], [0], [1], [0, 0, 1, 1], [], []>} : vector<1x32xf32>, vector<32x5xf32>, vector<1x5xf32> -> vector<1x5xf32>
    %56 = arith.addf %52, %55 : vector<1x5xf32>
    %57 = vector.extract_strided_slice %43 {offsets = [3, 0], sizes = [1, 32], strides = [1, 1]} : vector<16x32xf32> to vector<1x32xf32>
    %c96 = arith.constant 96 : index
    %c0_46 = arith.constant 0 : index
    %58 = vector.load %arg5[%c96, %c0_46] : memref<512x5xf32, #tpu.memory_space<vmem>>, vector<32x5xf32>
    %cst_47 = arith.constant dense<0.000000e+00> : vector<1x5xf32>
    %59 = tpu.matmul %57, %58, %cst_47 {dimension_numbers = #tpu.dot_dimension_numbers<[1], [0], [0], [1], [0, 0, 1, 1], [], []>} : vector<1x32xf32>, vector<32x5xf32>, vector<1x5xf32> -> vector<1x5xf32>
    %60 = arith.addf %56, %59 : vector<1x5xf32>
    %61 = vector.extract_strided_slice %43 {offsets = [4, 0], sizes = [1, 32], strides = [1, 1]} : vector<16x32xf32> to vector<1x32xf32>
    %c128 = arith.constant 128 : index
    %c0_48 = arith.constant 0 : index
    %62 = vector.load %arg5[%c128, %c0_48] : memref<512x5xf32, #tpu.memory_space<vmem>>, vector<32x5xf32>
    %cst_49 = arith.constant dense<0.000000e+00> : vector<1x5xf32>
    %63 = tpu.matmul %61, %62, %cst_49 {dimension_numbers = #tpu.dot_dimension_numbers<[1], [0], [0], [1], [0, 0, 1, 1], [], []>} : vector<1x32xf32>, vector<32x5xf32>, vector<1x5xf32> -> vector<1x5xf32>
    %64 = arith.addf %60, %63 : vector<1x5xf32>
    %65 = vector.extract_strided_slice %43 {offsets = [5, 0], sizes = [1, 32], strides = [1, 1]} : vector<16x32xf32> to vector<1x32xf32>
    %c160 = arith.constant 160 : index
    %c0_50 = arith.constant 0 : index
    %66 = vector.load %arg5[%c160, %c0_50] : memref<512x5xf32, #tpu.memory_space<vmem>>, vector<32x5xf32>
    %cst_51 = arith.constant dense<0.000000e+00> : vector<1x5xf32>
    %67 = tpu.matmul %65, %66, %cst_51 {dimension_numbers = #tpu.dot_dimension_numbers<[1], [0], [0], [1], [0, 0, 1, 1], [], []>} : vector<1x32xf32>, vector<32x5xf32>, vector<1x5xf32> -> vector<1x5xf32>
    %68 = arith.addf %64, %67 : vector<1x5xf32>
    %69 = vector.extract_strided_slice %43 {offsets = [6, 0], sizes = [1, 32], strides = [1, 1]} : vector<16x32xf32> to vector<1x32xf32>
    %c192 = arith.constant 192 : index
    %c0_52 = arith.constant 0 : index
    %70 = vector.load %arg5[%c192, %c0_52] : memref<512x5xf32, #tpu.memory_space<vmem>>, vector<32x5xf32>
    %cst_53 = arith.constant dense<0.000000e+00> : vector<1x5xf32>
    %71 = tpu.matmul %69, %70, %cst_53 {dimension_numbers = #tpu.dot_dimension_numbers<[1], [0], [0], [1], [0, 0, 1, 1], [], []>} : vector<1x32xf32>, vector<32x5xf32>, vector<1x5xf32> -> vector<1x5xf32>
    %72 = arith.addf %68, %71 : vector<1x5xf32>
    %73 = vector.extract_strided_slice %43 {offsets = [7, 0], sizes = [1, 32], strides = [1, 1]} : vector<16x32xf32> to vector<1x32xf32>
    %c224 = arith.constant 224 : index
    %c0_54 = arith.constant 0 : index
    %74 = vector.load %arg5[%c224, %c0_54] : memref<512x5xf32, #tpu.memory_space<vmem>>, vector<32x5xf32>
    %cst_55 = arith.constant dense<0.000000e+00> : vector<1x5xf32>
    %75 = tpu.matmul %73, %74, %cst_55 {dimension_numbers = #tpu.dot_dimension_numbers<[1], [0], [0], [1], [0, 0, 1, 1], [], []>} : vector<1x32xf32>, vector<32x5xf32>, vector<1x5xf32> -> vector<1x5xf32>
    %76 = arith.addf %72, %75 : vector<1x5xf32>
    %77 = vector.extract_strided_slice %43 {offsets = [8, 0], sizes = [1, 32], strides = [1, 1]} : vector<16x32xf32> to vector<1x32xf32>
    %c256 = arith.constant 256 : index
    %c0_56 = arith.constant 0 : index
    %78 = vector.load %arg5[%c256, %c0_56] : memref<512x5xf32, #tpu.memory_space<vmem>>, vector<32x5xf32>
    %cst_57 = arith.constant dense<0.000000e+00> : vector<1x5xf32>
    %79 = tpu.matmul %77, %78, %cst_57 {dimension_numbers = #tpu.dot_dimension_numbers<[1], [0], [0], [1], [0, 0, 1, 1], [], []>} : vector<1x32xf32>, vector<32x5xf32>, vector<1x5xf32> -> vector<1x5xf32>
    %80 = arith.addf %76, %79 : vector<1x5xf32>
    %81 = vector.extract_strided_slice %43 {offsets = [9, 0], sizes = [1, 32], strides = [1, 1]} : vector<16x32xf32> to vector<1x32xf32>
    %c288 = arith.constant 288 : index
    %c0_58 = arith.constant 0 : index
    %82 = vector.load %arg5[%c288, %c0_58] : memref<512x5xf32, #tpu.memory_space<vmem>>, vector<32x5xf32>
    %cst_59 = arith.constant dense<0.000000e+00> : vector<1x5xf32>
    %83 = tpu.matmul %81, %82, %cst_59 {dimension_numbers = #tpu.dot_dimension_numbers<[1], [0], [0], [1], [0, 0, 1, 1], [], []>} : vector<1x32xf32>, vector<32x5xf32>, vector<1x5xf32> -> vector<1x5xf32>
    %84 = arith.addf %80, %83 : vector<1x5xf32>
    %85 = vector.extract_strided_slice %43 {offsets = [10, 0], sizes = [1, 32], strides = [1, 1]} : vector<16x32xf32> to vector<1x32xf32>
    %c320 = arith.constant 320 : index
    %c0_60 = arith.constant 0 : index
    %86 = vector.load %arg5[%c320, %c0_60] : memref<512x5xf32, #tpu.memory_space<vmem>>, vector<32x5xf32>
    %cst_61 = arith.constant dense<0.000000e+00> : vector<1x5xf32>
    %87 = tpu.matmul %85, %86, %cst_61 {dimension_numbers = #tpu.dot_dimension_numbers<[1], [0], [0], [1], [0, 0, 1, 1], [], []>} : vector<1x32xf32>, vector<32x5xf32>, vector<1x5xf32> -> vector<1x5xf32>
    %88 = arith.addf %84, %87 : vector<1x5xf32>
    %89 = vector.extract_strided_slice %43 {offsets = [11, 0], sizes = [1, 32], strides = [1, 1]} : vector<16x32xf32> to vector<1x32xf32>
    %c352 = arith.constant 352 : index
    %c0_62 = arith.constant 0 : index
    %90 = vector.load %arg5[%c352, %c0_62] : memref<512x5xf32, #tpu.memory_space<vmem>>, vector<32x5xf32>
    %cst_63 = arith.constant dense<0.000000e+00> : vector<1x5xf32>
    %91 = tpu.matmul %89, %90, %cst_63 {dimension_numbers = #tpu.dot_dimension_numbers<[1], [0], [0], [1], [0, 0, 1, 1], [], []>} : vector<1x32xf32>, vector<32x5xf32>, vector<1x5xf32> -> vector<1x5xf32>
    %92 = arith.addf %88, %91 : vector<1x5xf32>
    %93 = vector.extract_strided_slice %43 {offsets = [12, 0], sizes = [1, 32], strides = [1, 1]} : vector<16x32xf32> to vector<1x32xf32>
    %c384 = arith.constant 384 : index
    %c0_64 = arith.constant 0 : index
    %94 = vector.load %arg5[%c384, %c0_64] : memref<512x5xf32, #tpu.memory_space<vmem>>, vector<32x5xf32>
    %cst_65 = arith.constant dense<0.000000e+00> : vector<1x5xf32>
    %95 = tpu.matmul %93, %94, %cst_65 {dimension_numbers = #tpu.dot_dimension_numbers<[1], [0], [0], [1], [0, 0, 1, 1], [], []>} : vector<1x32xf32>, vector<32x5xf32>, vector<1x5xf32> -> vector<1x5xf32>
    %96 = arith.addf %92, %95 : vector<1x5xf32>
    %97 = vector.extract_strided_slice %43 {offsets = [13, 0], sizes = [1, 32], strides = [1, 1]} : vector<16x32xf32> to vector<1x32xf32>
    %c416 = arith.constant 416 : index
    %c0_66 = arith.constant 0 : index
    %98 = vector.load %arg5[%c416, %c0_66] : memref<512x5xf32, #tpu.memory_space<vmem>>, vector<32x5xf32>
    %cst_67 = arith.constant dense<0.000000e+00> : vector<1x5xf32>
    %99 = tpu.matmul %97, %98, %cst_67 {dimension_numbers = #tpu.dot_dimension_numbers<[1], [0], [0], [1], [0, 0, 1, 1], [], []>} : vector<1x32xf32>, vector<32x5xf32>, vector<1x5xf32> -> vector<1x5xf32>
    %100 = arith.addf %96, %99 : vector<1x5xf32>
    %101 = vector.extract_strided_slice %43 {offsets = [14, 0], sizes = [1, 32], strides = [1, 1]} : vector<16x32xf32> to vector<1x32xf32>
    %c448 = arith.constant 448 : index
    %c0_68 = arith.constant 0 : index
    %102 = vector.load %arg5[%c448, %c0_68] : memref<512x5xf32, #tpu.memory_space<vmem>>, vector<32x5xf32>
    %cst_69 = arith.constant dense<0.000000e+00> : vector<1x5xf32>
    %103 = tpu.matmul %101, %102, %cst_69 {dimension_numbers = #tpu.dot_dimension_numbers<[1], [0], [0], [1], [0, 0, 1, 1], [], []>} : vector<1x32xf32>, vector<32x5xf32>, vector<1x5xf32> -> vector<1x5xf32>
    %104 = arith.addf %100, %103 : vector<1x5xf32>
    %105 = vector.extract_strided_slice %43 {offsets = [15, 0], sizes = [1, 32], strides = [1, 1]} : vector<16x32xf32> to vector<1x32xf32>
    %c480 = arith.constant 480 : index
    %c0_70 = arith.constant 0 : index
    %106 = vector.load %arg5[%c480, %c0_70] : memref<512x5xf32, #tpu.memory_space<vmem>>, vector<32x5xf32>
    %cst_71 = arith.constant dense<0.000000e+00> : vector<1x5xf32>
    %107 = tpu.matmul %105, %106, %cst_71 {dimension_numbers = #tpu.dot_dimension_numbers<[1], [0], [0], [1], [0, 0, 1, 1], [], []>} : vector<1x32xf32>, vector<32x5xf32>, vector<1x5xf32> -> vector<1x5xf32>
    %108 = arith.addf %104, %107 : vector<1x5xf32>
    %c0_72 = arith.constant 0 : index
    %c0_73 = arith.constant 0 : index
    %c0_74 = arith.constant 0 : index
    %109 = vector.load %arg7[%c0_72, %c0_73, %c0_74] : memref<1x1x5xf32, #tpu.memory_space<vmem>>, vector<1x1x5xf32>
    %110 = vector.shape_cast %109 : vector<1x1x5xf32> to vector<1x5xf32>
    %111 = vector.shape_cast %108 : vector<1x5xf32> to vector<1x1x5xf32>
    tpu.vector_store %arg7[%c0_72, %c0_73, %c0_74], %111 {strides = array<i32>} : memref<1x1x5xf32, #tpu.memory_space<vmem>>, vector<1x1x5xf32>,
    return
  }
  func.func @transform_0(%arg0: i32) -> (i32, i32) {
    %c0_i32 = arith.constant 0 : i32
    %c0_i32_0 = arith.constant 0 : i32
    return %arg0, %c0_i32 : i32, i32
  }
  func.func @transform_1(%arg0: i32) -> (i32, i32) {
    %c0_i32 = arith.constant 0 : i32
    %c0_i32_0 = arith.constant 0 : i32
    %c0_i32_1 = arith.constant 0 : i32
    return %c0_i32, %c0_i32_0 : i32, i32
  }
  func.func @transform_2(%arg0: i32) -> (i32, i32) {
    %c0_i32 = arith.constant 0 : i32
    %c0_i32_0 = arith.constant 0 : i32
    %c0_i32_1 = arith.constant 0 : i32
    return %c0_i32, %c0_i32_0 : i32, i32
  }
  func.func @transform_3(%arg0: i32) -> (i32, i32) {
    %c0_i32 = arith.constant 0 : i32
    %c0_i32_0 = arith.constant 0 : i32
    %c0_i32_1 = arith.constant 0 : i32
    return %c0_i32, %c0_i32_0 : i32, i32
  }
  func.func @transform_4(%arg0: i32) -> (i32, i32) {
    %c0_i32 = arith.constant 0 : i32
    %c0_i32_0 = arith.constant 0 : i32
    %c0_i32_1 = arith.constant 0 : i32
    return %c0_i32, %c0_i32_0 : i32, i32
  }
  func.func @transform_5(%arg0: i32) -> (i32, i32) {
    %c0_i32 = arith.constant 0 : i32
    %c0_i32_0 = arith.constant 0 : i32
    %c0_i32_1 = arith.constant 0 : i32
    return %c0_i32, %c0_i32_0 : i32, i32
  }
  func.func @transform_6(%arg0: i32) -> (i32, i32, i32) {
    %c0_i32 = arith.constant 0 : i32
    %c0_i32_0 = arith.constant 0 : i32
    %c0_i32_1 = arith.constant 0 : i32
    return %arg0, %c0_i32, %c0_i32_0 : i32, i32, i32
  }
}

</mosaic_0001>

<bundles_post_ra>
// kernel: my_conv_net_forward.1
= control target key start
LH: loop header
LB: loop body
LE: loop exit
PB: predicated region body
PF: predicated region fallthrough
CT: control target
= control target key end

     0   :  { %11 = vsyncpa [#allocation3], 0  ;;  %s8212_s0 = inlined_call_operand.vmem [shape: f32[464,4], index: 0, kind: input, shape index: {}]   ;;  %s8213_s1 = inlined_call_operand.vmem [shape: f32[36,32], index: 1, kind: input, shape index: {}]   ;;  %s8214_s2 = inlined_call_operand.vmem [shape: f32[1,32], index: 2, kind: input, shape index: {}]   ;;  %s8215_s3 = inlined_call_operand.vmem [shape: f32[16,196], index: 3, kind: input, shape index: {}]   ;;  %s8216_s4 = inlined_call_operand.vmem [shape: f32[512,5], index: 4, kind: input, shape index: {}]   ;;  %s8217_s5 = inlined_call_operand.vmem [shape: f32[1,5], index: 5, kind: input, shape index: {}]   ;;  %s8218_s6 = inlined_call_operand.hbm [shape: f32[2,1,5], index: 6, kind: output, shape index: {}]  }
   0x1   :  { %13 = vsyncpa [#allocation3 + $0x1], 0  ;;  %s6295_s21 = smov 0   ;;  %s6297_s22 = smov 0  }
   0x2   :  { %s6299_s23 = smov 0   ;;  %s6301_s24 = smov 0  }
   0x3 LB: > { %s6316_s25 = sadd.s32 4294967295, %s6254_s24   ;;  %s4540_s26 = sadd.s32 4294967294, %s6254_s24   ;;  %s6254_s24 = sphi %s6301_s24, %s8224_s24   ;;  %s6250_s23 = sphi %s6299_s23, %s8223_s23   ;;  %s6246_s22 = sphi %s6297_s22, %s8222_s22   ;;  %s6242_s21 = sphi %s6295_s21, %s8221_s21  }
   0x4   : > { %s6320_s27 = sadd.s32 1, %s6254_s24   ;;  %s157_s28 = sadd.s32 1, %s6250_s23 }
   0x5   : > { %s154_s29 = ssub.s32 %s6254_s24, %s6320_s27  ;;  %p167_p0 = scmp.ne.s32.totalorder %s6250_s23, %s6246_s22 }
   0x6   : > { %p155_p1 = scmp.eq.s32.totalorder %s154_s29, 0  ;;  %p168_p2 = scmp.eq.s32.totalorder %s6316_s25, 1 }
   0x7   : > { %p173_p3 = scmp.ne.s32.totalorder %s6246_s22, %s6242_s21  ;;  %p174_p4 = scmp.eq.s32.totalorder %s4540_s26, 1 }
   0x8   : > { %s6331_s30 = scalar_select %p155_p1, %s6250_s23, %s157_s28  }
   0x9   : > { %p6333_p5 = por %p168_p2, %p167_p0  ;;  %p6337_p6 = por %p174_p4, %p173_p3 }
   0xa   : > { %p4543_p7 = scmp.ge.s32.totalorder %s6254_s24, 1  ;;  %p216_p8 = scmp.lt.s32.totalorder %s6254_s24, 3 }
   0xc   : > { %p217_p9 = pnand %p4543_p7, %p216_p8 }
   0xd   : > { %v302_v0 = vld [vmem:[%s8213_s1 + $0x4] sm:$0xf] (!%p217_p9)  ;;  %vm379_vm0 = vcmask (!%p217_p9), 1043456   ;;  %s245_s11 = smul.u32 (!%p217_p9), 29, %s6316_s25  ;;  %v6256_v1 = vmov (!%p217_p9), 0.0   ;;  %vm6257_vm1 = vmmov (!%p217_p9), 0  }
   0xe   : > { %220 = sbr.rel (%p217_p9) target bundleno = 1318 (0x526), region = 44  ;;  %5116 = vmatprep.subr.mxu0 (!%p217_p9), %v6256_v1  ;;  %5118 = vmatprep.mubr.msk.f32.mxu0 (!%p217_p9), %vm6257_vm1, %v6256_v1  ;;  %v276_v2 = vld [vmem:[%s8213_s1] sm:$0xf] (!%p217_p9)  ;;  %vm303_vm2 = vcmask (!%p217_p9), 31744   ;;  %v1185_v5 = vld [vmem:[%s8213_s1 + $0xc] sm:$0xf] (!%p217_p9) }
   0xf   : > { %5117 = vmatpush3.msk.msra.mxu0 (!%p217_p9), %vm379_vm0, %v302_v0  ;;  %p246_p10 = scmp.lt.s32.totalorder (!%p217_p9), %s245_s11, 57  ;;  %6117 = vmatprep.subr.mxu1 (!%p217_p9), %v6256_v1  ;;  %v1823_v50 = vld [vmem:[%s8213_s1 + $0x14] sm:$0xf] (!%p217_p9)  ;;  %v866_v56 = vld [vmem:[%s8213_s1 + $0x8] sm:$0xf] (!%p217_p9)  ;;  %vm3135_vm3 = vcmask (!%p217_p9), 556032  }
  0x10   : > { %5193 = vmatprep.subr.mxu0 (!%p217_p9), %v6256_v1  ;;  %6118 = vmatpush3.msk.msra.mxu1 (!%p217_p9), %vm379_vm0, %v276_v2  ;;  %vm3225_vm4 = vcmask (!%p217_p9), 261120   ;;  %s243_s20 = sand.u32 (!%p217_p9), 1, %s6246_s22   ;;  %s4799_s29 = sshll.u32 (!%p217_p9), %s6316_s25, 4  ;;  %vm4470_vm5 = vcmask (!%p217_p9), 32768  }
  0x11   : > { %5207 = vmatprep.mubr.msk.f32.mxu1 (!%p217_p9), %vm6257_vm1, %v6256_v1  ;;  %5347 = vmatprep.subr.mxu1 (!%p217_p9), %v6256_v1  ;;  %s244_s9 = scalar_lea.vmem (!%p217_p9), [#allocation2], %s243_s20  ;;  %s8170_s13 = scalar_lea.hbm (!%p217_p9), %s8218_s6, %s4799_s29 }
  0x12   : > { %s4485_s10 = sshll.u32 (!%p217_p9), %s244_s9, 4  ;;  %s6259_s25 = smov (!%p217_p9), [#allocation2]   ;;  %s8172_s10 = int_to_ptr.vmem [resolvable:$true] %s4485_s10 }
  0x13   : > { %s6192_s15 = scalar_lea.vmem (!%p217_p9), %s8172_s10, 16  ;;  %s6196_s16 = sshll.u32 (!%p217_p9), %s6259_s25, 4  ;;  %s6197_s16 = int_to_ptr.vmem [resolvable:$false] %s6196_s16 }
  0x14   : > { %p6193_p11 = scmp.ne.s32.totalorder (!%p217_p9), %s8172_s10, %s6192_s15  ;;  %p6199_p0 = scmp.lt.s32.totalorder (!%p217_p9), %s8172_s10, %s6197_s16 }
  0x15   : > { %s8226_s11 = smov (!%p246_p10, %s245_s11), 57 }
  0x16   : > { %s4544_s14 = sshll.u32 %s8226_s11, 3  ;;  %p6194_p12 = pnand %p6193_p11, %p6333_p5 }
  0x17   : > { %s6363_s17 = scalar_lea.vmem %s8212_s0, %s4544_s14  ;;  %s4473_s14 = scalar_lea.sflag [#allocation3], %s243_s20 }
  0x18   : > { %v277_v3 = vld [vmem:[%s6363_s17 + $0x1] sm:$0xff]  ;;  %v278_v6 = vld [vmem:[%s6363_s17 + $0x9] sm:$0xff]  ;;  %v279_v8 = vld [vmem:[%s6363_s17 + $0x11] sm:$0xff]  ;;  %p6195_p13 = pneg %p6194_p12 }
  0x19   : > { %5119 = vmatmul.mubr.msk.f32.vlgmr.msra.gmra.mrb[0].mxu0 %vm303_vm2, %v277_v3  ;;  %v6368_v4 = vld [vmem:[%s6363_s17 + $0x20] sm:$0xff]  ;;  %v6383_v7 = vld [vmem:[%s6363_s17 + $0x28] sm:$0xff]  ;;  %v6396_v9 = vld [vmem:[%s6363_s17 + $0x30] sm:$0xff] }
  0x1a   : > { %5121 = vmatprep.mubr.msk.f32.mxu0 %vm6257_vm1, %v6256_v1  ;;  %5194 = vmatpush3.msk.msra.mxu0 %vm379_vm0, %v276_v2  ;;  %v280_v10 = vld [vmem:[%s6363_s17 + $0x19] sm:$0xff]  ;;  %v281_v12 = vld [vmem:[%s6363_s17 + $0x21] sm:$0xff]  ;;  %v282_v14 = vld [vmem:[%s6363_s17 + $0x29] sm:$0xff] }
  0x1b   : > { %5208 = vmatmul.mubr.msk.f32.vlgmr.msra.gmra.mrb[0].mxu1 %vm303_vm2, %v6368_v4  ;;  %5270 = vmatprep.subr.mxu0 %v6256_v1  ;;  %v6407_v11 = vld [vmem:[%s6363_s17 + $0x38] sm:$0xff]  ;;  %v6418_v13 = vld [vmem:[%s6363_s17 + $0x40] sm:$0xff]  ;;  %v6429_v15 = vld [vmem:[%s6363_s17 + $0x48] sm:$0xff] }
  0x1c   : > { %5210 = vmatprep.mubr.msk.f32.mxu1 %vm6257_vm1, %v6256_v1  ;;  %5348 = vmatpush3.msk.msra.mxu1 %vm379_vm0, %v1185_v5  ;;  %v283_v16 = vld [vmem:[%s6363_s17 + $0x31] sm:$0xff]  ;;  %v284_v18 = vld [vmem:[%s6363_s17 + $0x39] sm:$0xff]  ;;  %v285_v20 = vld [vmem:[%s6363_s17 + $0x41] sm:$0xff] }
  0x1d   : > { %5122 = vmatmul.mubr.msk.f32.gmra.mrb[2].mxu0 %vm303_vm2, %v278_v6  ;;  %5501 = vmatprep.subr.mxu1 %v6256_v1  ;;  %v6440_v17 = vld [vmem:[%s6363_s17 + $0x50] sm:$0xff]  ;;  %v6451_v19 = vld [vmem:[%s6363_s17 + $0x58] sm:$0xff]  ;;  %v6462_v21 = vld [vmem:[%s6363_s17 + $0x60] sm:$0xff] }
  0x1e   : > { %5124 = vmatprep.mubr.msk.f32.mxu0 %vm6257_vm1, %v6256_v1  ;;  %v286_v22 = vld [vmem:[%s6363_s17 + $0x49] sm:$0xff]  ;;  %v287_v24 = vld [vmem:[%s6363_s17 + $0x51] sm:$0xff]  ;;  %v288_v26 = vld [vmem:[%s6363_s17 + $0x59] sm:$0xff] }
  0x1f   : > { %5211 = vmatmul.mubr.msk.f32.gmra.mrb[2].mxu1 %vm303_vm2, %v6383_v7  ;;  %v6473_v23 = vld [vmem:[%s6363_s17 + $0x68] sm:$0xff]  ;;  %v6484_v25 = vld [vmem:[%s6363_s17 + $0x70] sm:$0xff]  ;;  %v6495_v27 = vld [vmem:[%s6363_s17 + $0x78] sm:$0xff] }
  0x20   : > { %5213 = vmatprep.mubr.msk.f32.mxu1 %vm6257_vm1, %v6256_v1  ;;  %v289_v28 = vld [vmem:[%s6363_s17 + $0x61] sm:$0xff]  ;;  %v290_v30 = vld [vmem:[%s6363_s17 + $0x69] sm:$0xff]  ;;  %v291_v32 = vld [vmem:[%s6363_s17 + $0x71] sm:$0xff] }
  0x21   : > { %5125 = vmatmul.mubr.msk.f32.gmra.mrb[4].mxu0 %vm303_vm2, %v279_v8  ;;  %v6506_v29 = vld [vmem:[%s6363_s17 + $0x80] sm:$0xff]  ;;  %v6517_v31 = vld [vmem:[%s6363_s17 + $0x88] sm:$0xff]  ;;  %v6528_v33 = vld [vmem:[%s6363_s17 + $0x90] sm:$0xff] }
  0x22   : > { %5127 = vmatprep.mubr.msk.f32.mxu0 %vm6257_vm1, %v6256_v1  ;;  %v292_v34 = vld [vmem:[%s6363_s17 + $0x79] sm:$0xff]  ;;  %v293_v36 = vld [vmem:[%s6363_s17 + $0x81] sm:$0xff]  ;;  %v294_v38 = vld [vmem:[%s6363_s17 + $0x89] sm:$0xff] }
  0x23   : > { %5214 = vmatmul.mubr.msk.f32.gmra.mrb[4].mxu1 %vm303_vm2, %v6396_v9  ;;  %v6539_v35 = vld [vmem:[%s6363_s17 + $0x98] sm:$0xff]  ;;  %v6550_v37 = vld [vmem:[%s6363_s17 + $0xa0] sm:$0xff]  ;;  %v6561_v39 = vld [vmem:[%s6363_s17 + $0xa8] sm:$0xff] }
  0x24   : > { %5216 = vmatprep.mubr.msk.f32.mxu1 %vm6257_vm1, %v6256_v1  ;;  %v295_v40 = vld [vmem:[%s6363_s17 + $0x91] sm:$0xff]  ;;  %v296_v42 = vld [vmem:[%s6363_s17 + $0x99] sm:$0xff]  ;;  %v297_v44 = vld [vmem:[%s6363_s17 + $0xa1] sm:$0xff] }
  0x25   : > { %5128 = vmatmul.mubr.msk.f32.gmra.mrb[6].mxu0 %vm303_vm2, %v280_v10  ;;  %v6572_v41 = vld [vmem:[%s6363_s17 + $0xb0] sm:$0xff]  ;;  %v6583_v43 = vld [vmem:[%s6363_s17 + $0xb8] sm:$0xff]  ;;  %v275_v45 = vld [vmem:[%s6363_s17 + $0xc0] sm:$0xf] }
  0x26   : > { %5130 = vmatprep.mubr.msk.f32.mxu0 %vm6257_vm1, %v6256_v1  ;;  %v298_v46 = vld [vmem:[%s6363_s17 + $0xa9] sm:$0xff]  ;;  %v299_v48 = vld [vmem:[%s6363_s17 + $0xb1] sm:$0xff]  ;;  %v300_v51 = vld [vmem:[%s6363_s17 + $0xb9] sm:$0xff] }
  0x27   : > { %5217 = vmatmul.mubr.msk.f32.gmra.mrb[6].mxu1 %vm303_vm2, %v6407_v11  ;;  %v1160_v47 = vld [vmem:[%s6363_s17 + $0xe] sm:$0xff]  ;;  %v1161_v49 = vld [vmem:[%s6363_s17 + $0x16] sm:$0xff]  ;;  %v1162_v52 = vld [vmem:[%s6363_s17 + $0x1e] sm:$0xff] }
  0x28   : > { %5219 = vmatprep.mubr.msk.f32.mxu1 %vm6257_vm1, %v6256_v1  ;;  %v301_v53 = vld [vmem:[%s6363_s17 + $0xc1] sm:$0xf]  ;;  %v1163_v54 = vld [vmem:[%s6363_s17 + $0x26] sm:$0xff]  ;;  %v1164_v57 = vld [vmem:[%s6363_s17 + $0x2e] sm:$0xff] }
  0x29   : > { %5131 = vmatmul.mubr.msk.f32.gmra.mrb[8].mxu0 %vm303_vm2, %v281_v12  ;;  %v251_v55 = vld [vmem:[%s6363_s17] sm:$0xff]  ;;  %v252_v58 = vld [vmem:[%s6363_s17 + $0x8] sm:$0xff]  ;;  %v1165_v59 = vld [vmem:[%s6363_s17 + $0x36] sm:$0xff] }
  0x2a   : > { %5133 = vmatprep.mubr.msk.f32.mxu0 %vm6257_vm1, %v6256_v1  ;;  %v6656_v60 = vld [vmem:[%s6363_s17 + $0x10] sm:$0xff]  ;;  %v1166_v61 = vld [vmem:[%s6363_s17 + $0x3e] sm:$0xff]  ;;  %v1167_v63 = vld [vmem:[%s6363_s17 + $0x46] sm:$0xff] }
  0x2b   : > { %5220 = vmatmul.mubr.msk.f32.gmra.mrb[8].mxu1 %vm303_vm2, %v6418_v13  ;;  %v6667_v62 = vld [vmem:[%s6363_s17 + $0x18] sm:$0xff]  ;;  %v841_v0 = vld [vmem:[%s6363_s17 + $0x2] sm:$0xff]  ;;  %v1504_v2 = vld [vmem:[%s8213_s1 + $0x10] sm:$0xf] }
  0x2c   : > { %5222 = vmatprep.mubr.msk.f32.mxu1 %vm6257_vm1, %v6256_v1  ;;  %v1168_v3 = vld [vmem:[%s6363_s17 + $0x4e] sm:$0xff]  ;;  %v1169_v6 = vld [vmem:[%s6363_s17 + $0x56] sm:$0xff]  ;;  %v1170_v10 = vld [vmem:[%s6363_s17 + $0x5e] sm:$0xff] }
  0x2d   : > { %5134 = vmatmul.mubr.msk.f32.gmra.mrb[10].mxu0 %vm303_vm2, %v282_v14  ;;  %v842_v5 = vld [vmem:[%s6363_s17 + $0xa] sm:$0xff]  ;;  %v843_v8 = vld [vmem:[%s6363_s17 + $0x12] sm:$0xff]  ;;  %v844_v12 = vld [vmem:[%s6363_s17 + $0x1a] sm:$0xff] }
  0x2e   : > { %5136 = vmatprep.mubr.msk.f32.mxu0 %vm6257_vm1, %v6256_v1  ;;  %v1171_v14 = vld [vmem:[%s6363_s17 + $0x66] sm:$0xff] }
  0x2f   : > { %5223 = vmatmul.mubr.msk.f32.gmra.mrb[10].mxu1 %vm303_vm2, %v6429_v15 }
  0x30   : > { %5225 = vmatprep.mubr.msk.f32.mxu1 %vm6257_vm1, %v6256_v1 }
  0x31   : > { %5137 = vmatmul.mubr.msk.f32.gmra.mrb[12].mxu0 %vm303_vm2, %v283_v16  ;;  %v845_v16 = vld [vmem:[%s6363_s17 + $0x22] sm:$0xff] }
  0x32   : > { %5139 = vmatprep.mubr.msk.f32.mxu0 %vm6257_vm1, %v6256_v1 }
  0x33   : > { %5226 = vmatmul.mubr.msk.f32.gmra.mrb[12].mxu1 %vm303_vm2, %v6440_v17 }
  0x34   : > { %5228 = vmatprep.mubr.msk.f32.mxu1 %vm6257_vm1, %v6256_v1 }
  0x35   : > { %5140 = vmatmul.mubr.msk.f32.gmra.mrb[14].mxu0 %vm303_vm2, %v284_v18  ;;  %v1172_v18 = vld [vmem:[%s6363_s17 + $0x6e] sm:$0xff] }
  0x36   : > { %5142 = vmatprep.mubr.msk.f32.mxu0 %vm6257_vm1, %v6256_v1 }
  0x37   : > { %5229 = vmatmul.mubr.msk.f32.gmra.mrb[14].mxu1 %vm303_vm2, %v6451_v19 }
  0x38   : > { %5231 = vmatprep.mubr.msk.f32.mxu1 %vm6257_vm1, %v6256_v1 }
  0x39   : > { %5143 = vmatmul.mubr.msk.f32.gmra.mrb[16].mxu0 %vm303_vm2, %v285_v20  ;;  %v846_v20 = vld [vmem:[%s6363_s17 + $0x2a] sm:$0xff] }
  0x3a   : > { %5145 = vmatprep.mubr.msk.f32.mxu0 %vm6257_vm1, %v6256_v1 }
  0x3b   : > { %5232 = vmatmul.mubr.msk.f32.gmra.mrb[16].mxu1 %vm303_vm2, %v6462_v21 }
  0x3c   : > { %5234 = vmatprep.mubr.msk.f32.mxu1 %vm6257_vm1, %v6256_v1 }
  0x3d   : > { %5146 = vmatmul.mubr.msk.f32.gmra.mrb[18].mxu0 %vm303_vm2, %v286_v22  ;;  %v1173_v22 = vld [vmem:[%s6363_s17 + $0x76] sm:$0xff] }
  0x3e   : > { %5148 = vmatprep.mubr.msk.f32.mxu0 %vm6257_vm1, %v6256_v1 }
  0x3f   : > { %5235 = vmatmul.mubr.msk.f32.gmra.mrb[18].mxu1 %vm303_vm2, %v6473_v23 }
  0x40   : > { %5237 = vmatprep.mubr.msk.f32.mxu1 %vm6257_vm1, %v6256_v1 }
  0x41   : > { %5149 = vmatmul.mubr.msk.f32.gmra.mrb[20].mxu0 %vm303_vm2, %v287_v24  ;;  %v847_v24 = vld [vmem:[%s6363_s17 + $0x32] sm:$0xff] }
  0x42   : > { %5151 = vmatprep.mubr.msk.f32.mxu0 %vm6257_vm1, %v6256_v1 }
  0x43   : > { %5238 = vmatmul.mubr.msk.f32.gmra.mrb[20].mxu1 %vm303_vm2, %v6484_v25 }
  0x44   : > { %5240 = vmatprep.mubr.msk.f32.mxu1 %vm6257_vm1, %v6256_v1 }
  0x45   : > { %5152 = vmatmul.mubr.msk.f32.gmra.mrb[22].mxu0 %vm303_vm2, %v288_v26  ;;  %v1174_v26 = vld [vmem:[%s6363_s17 + $0x7e] sm:$0xff] }
  0x46   : > { %5154 = vmatprep.mubr.msk.f32.mxu0 %vm6257_vm1, %v6256_v1 }
  0x47   : > { %5241 = vmatmul.mubr.msk.f32.gmra.mrb[22].mxu1 %vm303_vm2, %v6495_v27 }
  0x48   : > { %5243 = vmatprep.mubr.msk.f32.mxu1 %vm6257_vm1, %v6256_v1 }
  0x49   : > { %5155 = vmatmul.mubr.msk.f32.gmra.mrb[24].mxu0 %vm303_vm2, %v289_v28  ;;  %v848_v28 = vld [vmem:[%s6363_s17 + $0x3a] sm:$0xff] }
  0x4a   : > { %5157 = vmatprep.mubr.msk.f32.mxu0 %vm6257_vm1, %v6256_v1 }
  0x4b   : > { %5244 = vmatmul.mubr.msk.f32.gmra.mrb[24].mxu1 %vm303_vm2, %v6506_v29 }
  0x4c   : > { %5246 = vmatprep.mubr.msk.f32.mxu1 %vm6257_vm1, %v6256_v1 }
  0x4d   : > { %5158 = vmatmul.mubr.msk.f32.gmra.mrb[26].mxu0 %vm303_vm2, %v290_v30  ;;  %v1175_v30 = vld [vmem:[%s6363_s17 + $0x86] sm:$0xff] }
  0x4e   : > { %5160 = vmatprep.mubr.msk.f32.mxu0 %vm6257_vm1, %v6256_v1 }
  0x4f   : > { %5247 = vmatmul.mubr.msk.f32.gmra.mrb[26].mxu1 %vm303_vm2, %v6517_v31 }
  0x50   : > { %5249 = vmatprep.mubr.msk.f32.mxu1 %vm6257_vm1, %v6256_v1 }
  0x51   : > { %5161 = vmatmul.mubr.msk.f32.gmra.mrb[28].mxu0 %vm303_vm2, %v291_v32  ;;  %v849_v32 = vld [vmem:[%s6363_s17 + $0x42] sm:$0xff] }
  0x52   : > { %5163 = vmatprep.mubr.msk.f32.mxu0 %vm6257_vm1, %v6256_v1 }
  0x53   : > { %5250 = vmatmul.mubr.msk.f32.gmra.mrb[28].mxu1 %vm303_vm2, %v6528_v33 }
  0x54   : > { %5252 = vmatprep.mubr.msk.f32.mxu1 %vm6257_vm1, %v6256_v1 }
  0x55   : > { %5164 = vmatmul.mubr.msk.f32.gmra.mrb[30].mxu0 %vm303_vm2, %v292_v34  ;;  %v1176_v34 = vld [vmem:[%s6363_s17 + $0x8e] sm:$0xff] }
  0x56   : > { %5166 = vmatprep.mubr.msk.f32.mxu0 %vm6257_vm1, %v6256_v1 }
  0x57   : > { %5253 = vmatmul.mubr.msk.f32.gmra.mrb[30].mxu1 %vm303_vm2, %v6539_v35 }
  0x58   : > { %5255 = vmatprep.mubr.msk.f32.mxu1 %vm6257_vm1, %v6256_v1 }
  0x59   : > { %5167 = vmatmul.mubr.msk.f32.gmra.mrb[32].mxu0 %vm303_vm2, %v293_v36  ;;  %v850_v36 = vld [vmem:[%s6363_s17 + $0x4a] sm:$0xff] }
  0x5a   : > { %5169 = vmatprep.mubr.msk.f32.mxu0 %vm6257_vm1, %v6256_v1 }
  0x5b   : > { %5256 = vmatmul.mubr.msk.f32.gmra.mrb[32].mxu1 %vm303_vm2, %v6550_v37 }
  0x5c   : > { %5258 = vmatprep.mubr.msk.f32.mxu1 %vm6257_vm1, %v6256_v1 }
  0x5d   : > { %5170 = vmatmul.mubr.msk.f32.gmra.mrb[34].mxu0 %vm303_vm2, %v294_v38  ;;  %v1177_v38 = vld [vmem:[%s6363_s17 + $0x96] sm:$0xff] }
  0x5e   : > { %5172 = vmatprep.mubr.msk.f32.mxu0 %vm6257_vm1, %v6256_v1 }
  0x5f   : > { %5259 = vmatmul.mubr.msk.f32.gmra.mrb[34].mxu1 %vm303_vm2, %v6561_v39 }
  0x60   : > { %5261 = vmatprep.mubr.msk.f32.mxu1 %vm6257_vm1, %v6256_v1 }
  0x61   : > { %5173 = vmatmul.mubr.msk.f32.gmra.mrb[36].mxu0 %vm303_vm2, %v295_v40  ;;  %v851_v40 = vld [vmem:[%s6363_s17 + $0x52] sm:$0xff] }
  0x62   : > { %5175 = vmatprep.mubr.msk.f32.mxu0 %vm6257_vm1, %v6256_v1 }
  0x63   : > { %5262 = vmatmul.mubr.msk.f32.gmra.mrb[36].mxu1 %vm303_vm2, %v6572_v41 }
  0x64   : > { %5264 = vmatprep.mubr.msk.f32.mxu1 %vm6257_vm1, %v6256_v1 }
  0x65   : > { %5176 = vmatmul.mubr.msk.f32.gmra.mrb[38].mxu0 %vm303_vm2, %v296_v42  ;;  %v1178_v42 = vld [vmem:[%s6363_s17 + $0x9e] sm:$0xff] }
  0x66   : > { %5178 = vmatprep.mubr.msk.f32.mxu0 %vm6257_vm1, %v6256_v1 }
  0x67   : > { %5265 = vmatmul.mubr.msk.f32.gmra.mrb[38].mxu1 %vm303_vm2, %v6583_v43 }
  0x68   : > { %5267 = vmatprep.mubr.msk.f32.mxu1 %vm6257_vm1, %v6256_v1 }
  0x69   : > { %5179 = vmatmul.mubr.msk.f32.gmra.mrb[40].mxu0 %vm303_vm2, %v297_v44  ;;  %v852_v44 = vld [vmem:[%s6363_s17 + $0x5a] sm:$0xff] }
  0x6a   : > { %5181 = vmatprep.mubr.msk.f32.mxu0 %vm6257_vm1, %v6256_v1 }
  0x6b   : > { %5268 = vmatmul.mubr.msk.f32.gmra.mrb[40].mxu1 %vm303_vm2, %v275_v45  ;;  %v1179_v45 = vld [vmem:[%s6363_s17 + $0xa6] sm:$0xff] }
  0x6c   : > { %5349 = vmatprep.mubr.msk.f32.mxu1 %vm6257_vm1, %v6256_v1 }
  0x6d   : > { %5182 = vmatmul.mubr.msk.f32.gmra.mrb[42].mxu0 %vm303_vm2, %v298_v46  ;;  %v853_v46 = vld [vmem:[%s6363_s17 + $0x62] sm:$0xff] }
  0x6e   : > { %5184 = vmatprep.mubr.msk.f32.mxu0 %vm6257_vm1, %v6256_v1 }
  0x6f   : > { %5350 = vmatmul.mubr.msk.f32.vlgmr.msra.gmra.mrb[42].mxu1 %vm303_vm2, %v1160_v47  ;;  %v1180_v47 = vld [vmem:[%s6363_s17 + $0xae] sm:$0xff] }
  0x70   : > { %5352 = vmatprep.mubr.msk.f32.mxu1 %vm6257_vm1, %v6256_v1  ;;  %5502 = vmatpush3.msk.msra.mxu1 %vm379_vm0, %v1823_v50  ;;  %v855_v50 = vld [vmem:[%s6363_s17 + $0x72] sm:$0xff] }
  0x71   : > { %5185 = vmatmul.mubr.msk.f32.gmra.mrb[44].mxu0 %vm303_vm2, %v299_v48  ;;  %5655 = vmatprep.subr.mxu1 %v6256_v1  ;;  %v854_v48 = vld [vmem:[%s6363_s17 + $0x6a] sm:$0xff] }
  0x72   : > { %5187 = vmatprep.mubr.msk.f32.mxu0 %vm6257_vm1, %v6256_v1 }
  0x73   : > { %5353 = vmatmul.mubr.msk.f32.gmra.mrb[44].mxu1 %vm303_vm2, %v1161_v49  ;;  %v1181_v49 = vld [vmem:[%s6363_s17 + $0xb6] sm:$0xff] }
  0x74   : > { %5355 = vmatprep.mubr.msk.f32.mxu1 %vm6257_vm1, %v6256_v1 }
  0x75   : > { %5188 = vmatmul.mubr.msk.f32.gmra.mrb[46].mxu0 %vm303_vm2, %v300_v51  ;;  %v1182_v51 = vld [vmem:[%s6363_s17 + $0xbe] sm:$0xff] }
  0x76   : > { %5190 = vmatprep.mubr.msk.f32.mxu0 %vm6257_vm1, %v6256_v1 }
  0x77   : > { %5356 = vmatmul.mubr.msk.f32.gmra.mrb[46].mxu1 %vm303_vm2, %v1162_v52  ;;  %v856_v52 = vld [vmem:[%s6363_s17 + $0x7a] sm:$0xff] }
  0x78   : > { %5358 = vmatprep.mubr.msk.f32.mxu1 %vm6257_vm1, %v6256_v1 }
  0x79   : > { %5191 = vmatmul.mubr.msk.f32.gmra.mrb[48].mxu0 %vm303_vm2, %v301_v53  ;;  %v1183_v53 = vld [vmem:[%s6363_s17 + $0xc6] sm:$0xff] }
  0x7a   : > { %5195 = vmatprep.mubr.msk.f32.mxu0 %vm6257_vm1, %v6256_v1 }
  0x7b   : > { %5359 = vmatmul.mubr.msk.f32.gmra.mrb[48].mxu1 %vm303_vm2, %v1163_v54  ;;  %v857_v54 = vld [vmem:[%s6363_s17 + $0x82] sm:$0xff] }
  0x7c   : > { %5361 = vmatprep.mubr.msk.f32.mxu1 %vm6257_vm1, %v6256_v1 }
  0x7d   : > { %5196 = vmatmul.mubr.msk.f32.vlgmr.msra.gmra.mrb[50].mxu0 %vm303_vm2, %v251_v55  ;;  %v1184_v55 = vld [vmem:[%s6363_s17 + $0xce] sm:$0xf] }
  0x7e   : > { %5198 = vmatprep.mubr.msk.f32.mxu0 %vm6257_vm1, %v6256_v1  ;;  %5271 = vmatpush3.msk.msra.mxu0 %vm379_vm0, %v866_v56  ;;  %v858_v56 = vld [vmem:[%s6363_s17 + $0x8a] sm:$0xff] }
  0x7f   : > { %5424 = vmatprep.subr.mxu0 %v6256_v1  ;;  %5362 = vmatmul.mubr.msk.f32.gmra.mrb[50].mxu1 %vm303_vm2, %v1164_v57  ;;  %v859_v57 = vld [vmem:[%s6363_s17 + $0x92] sm:$0xff] }
  0x80   : > { %5364 = vmatprep.mubr.msk.f32.mxu1 %vm6257_vm1, %v6256_v1 }
  0x81   : > { %5199 = vmatmul.mubr.msk.f32.gmra.mrb[52].mxu0 %vm303_vm2, %v252_v58  ;;  %v2461_v58 = vld [vmem:[%s8213_s1 + $0x1c] sm:$0xf] }
  0x82   : > { %5201 = vmatprep.mubr.msk.f32.mxu0 %vm6257_vm1, %v6256_v1 }
  0x83   : > { %5365 = vmatmul.mubr.msk.f32.gmra.mrb[52].mxu1 %vm303_vm2, %v1165_v59  ;;  %v860_v59 = vld [vmem:[%s6363_s17 + $0x9a] sm:$0xff] }
  0x84   : > { %5367 = vmatprep.mubr.msk.f32.mxu1 %vm6257_vm1, %v6256_v1 }
  0x85   : > { %5202 = vmatmul.mubr.msk.f32.gmra.mrb[54].mxu0 %vm303_vm2, %v6656_v60 }
  0x86   : > { %5204 = vmatprep.mubr.msk.f32.mxu0 %vm6257_vm1, %v6256_v1 }
  0x87   : > { %5368 = vmatmul.mubr.msk.f32.gmra.mrb[54].mxu1 %vm303_vm2, %v1166_v61  ;;  %v862_v61 = vld [vmem:[%s6363_s17 + $0xaa] sm:$0xff] }
  0x88   : > { %5370 = vmatprep.mubr.msk.f32.mxu1 %vm6257_vm1, %v6256_v1 }
  0x89   : > { %5205 = vmatmul.mubr.msk.f32.gmra.mrb[56].mxu0 %vm303_vm2, %v6667_v62 }
  0x8a   : > { %5272 = vmatprep.mubr.msk.f32.mxu0 %vm6257_vm1, %v6256_v1 }
  0x8b   : > { %5371 = vmatmul.mubr.msk.f32.gmra.mrb[56].mxu1 %vm303_vm2, %v1167_v63 }
  0x8c   : > { %5373 = vmatprep.mubr.msk.f32.mxu1 %vm6257_vm1, %v6256_v1 }
  0x8d   : > { %5273 = vmatmul.mubr.msk.f32.vlgmr.msra.gmra.mrb[58].mxu0 %vm303_vm2, %v841_v0 }
  0x8e   : > { %5275 = vmatprep.mubr.msk.f32.mxu0 %vm6257_vm1, %v6256_v1  ;;  %5425 = vmatpush3.msk.msra.mxu0 %vm379_vm0, %v1504_v2  ;;  %v2142_v2 = vld [vmem:[%s8213_s1 + $0x18] sm:$0xf] }
  0x8f   : > { %5374 = vmatmul.mubr.msk.f32.gmra.mrb[58].mxu1 %vm303_vm2, %v1168_v3  ;;  %5578 = vmatprep.subr.mxu0 %v6256_v1 }
  0x90   : > { %5376 = vmatprep.mubr.msk.f32.mxu1 %vm6257_vm1, %v6256_v1 }
  0x91   : > { %5276 = vmatmul.mubr.msk.f32.gmra.mrb[60].mxu0 %vm303_vm2, %v842_v5 }
  0x92   : > { %5278 = vmatprep.mubr.msk.f32.mxu0 %vm6257_vm1, %v6256_v1 }
  0x93   : > { %5377 = vmatmul.mubr.msk.f32.gmra.mrb[60].mxu1 %vm303_vm2, %v1169_v6  ;;  %v1480_v6 = vld [vmem:[%s6363_s17 + $0x17] sm:$0xff] }
  0x94   : > { %5379 = vmatprep.mubr.msk.f32.mxu1 %vm6257_vm1, %v6256_v1 }
  0x95   : > { %5279 = vmatmul.mubr.msk.f32.gmra.mrb[62].mxu0 %vm303_vm2, %v843_v8 }
  0x96   : > { %5281 = vmatprep.mubr.msk.f32.mxu0 %vm6257_vm1, %v6256_v1 }
  0x97   : > { %5380 = vmatmul.mubr.msk.f32.gmra.mrb[62].mxu1 %vm303_vm2, %v1170_v10 }
  0x98   : > { %5382 = vmatprep.mubr.msk.f32.mxu1 %vm6257_vm1, %v6256_v1 }
  0x99   : > { %5282 = vmatmul.mubr.msk.f32.gmra.mrb[64].mxu0 %vm303_vm2, %v844_v12 }
  0x9a   : > { %5284 = vmatprep.mubr.msk.f32.mxu0 %vm6257_vm1, %v6256_v1 }
  0x9b   : > { %5383 = vmatmul.mubr.msk.f32.gmra.mrb[64].mxu1 %vm303_vm2, %v1171_v14  ;;  %v1481_v14 = vld [vmem:[%s6363_s17 + $0x1f] sm:$0xff] }
  0x9c   : > { %5385 = vmatprep.mubr.msk.f32.mxu1 %vm6257_vm1, %v6256_v1 }
  0x9d   : > { %5285 = vmatmul.mubr.msk.f32.gmra.mrb[66].mxu0 %vm303_vm2, %v845_v16 }
  0x9e   : > { %5287 = vmatprep.mubr.msk.f32.mxu0 %vm6257_vm1, %v6256_v1 }
  0x9f   : > { %5386 = vmatmul.mubr.msk.f32.gmra.mrb[66].mxu1 %vm303_vm2, %v1172_v18 }
  0xa0   : > { %5388 = vmatprep.mubr.msk.f32.mxu1 %vm6257_vm1, %v6256_v1 }
  0xa1   : > { %5288 = vmatmul.mubr.msk.f32.gmra.mrb[68].mxu0 %vm303_vm2, %v846_v20 }
  0xa2   : > { %5290 = vmatprep.mubr.msk.f32.mxu0 %vm6257_vm1, %v6256_v1 }
  0xa3   : > { %5389 = vmatmul.mubr.msk.f32.gmra.mrb[68].mxu1 %vm303_vm2, %v1173_v22  ;;  %v1482_v22 = vld [vmem:[%s6363_s17 + $0x27] sm:$0xff] }
  0xa4   : > { %5391 = vmatprep.mubr.msk.f32.mxu1 %vm6257_vm1, %v6256_v1 }
  0xa5   : > { %5291 = vmatmul.mubr.msk.f32.gmra.mrb[70].mxu0 %vm303_vm2, %v847_v24 }
  0xa6   : > { %5293 = vmatprep.mubr.msk.f32.mxu0 %vm6257_vm1, %v6256_v1 }
  0xa7   : > { %5392 = vmatmul.mubr.msk.f32.gmra.mrb[70].mxu1 %vm303_vm2, %v1174_v26 }
  0xa8   : > { %5394 = vmatprep.mubr.msk.f32.mxu1 %vm6257_vm1, %v6256_v1 }
  0xa9   : > { %5294 = vmatmul.mubr.msk.f32.gmra.mrb[72].mxu0 %vm303_vm2, %v848_v28 }
  0xaa   : > { %5296 = vmatprep.mubr.msk.f32.mxu0 %vm6257_vm1, %v6256_v1 }
  0xab   : > { %5395 = vmatmul.mubr.msk.f32.gmra.mrb[72].mxu1 %vm303_vm2, %v1175_v30 }
  0xac   : > { %5397 = vmatprep.mubr.msk.f32.mxu1 %vm6257_vm1, %v6256_v1 }
  0xad   : > { %5297 = vmatmul.mubr.msk.f32.gmra.mrb[74].mxu0 %vm303_vm2, %v849_v32  ;;  %v1483_v32 = vld [vmem:[%s6363_s17 + $0x2f] sm:$0xff] }
  0xae   : > { %5299 = vmatprep.mubr.msk.f32.mxu0 %vm6257_vm1, %v6256_v1 }
  0xaf   : > { %5398 = vmatmul.mubr.msk.f32.gmra.mrb[74].mxu1 %vm303_vm2, %v1176_v34 }
  0xb0   : > { %5400 = vmatprep.mubr.msk.f32.mxu1 %vm6257_vm1, %v6256_v1 }
  0xb1   : > { %5300 = vmatmul.mubr.msk.f32.gmra.mrb[76].mxu0 %vm303_vm2, %v850_v36 }
  0xb2   : > { %5302 = vmatprep.mubr.msk.f32.mxu0 %vm6257_vm1, %v6256_v1 }
  0xb3   : > { %5401 = vmatmul.mubr.msk.f32.gmra.mrb[76].mxu1 %vm303_vm2, %v1177_v38 }
  0xb4   : > { %5403 = vmatprep.mubr.msk.f32.mxu1 %vm6257_vm1, %v6256_v1 }
  0xb5   : > { %5303 = vmatmul.mubr.msk.f32.gmra.mrb[78].mxu0 %vm303_vm2, %v851_v40 }
  0xb6   : > { %5305 = vmatprep.mubr.msk.f32.mxu0 %vm6257_vm1, %v6256_v1 }
  0xb7   : > { %5404 = vmatmul.mubr.msk.f32.gmra.mrb[78].mxu1 %vm303_vm2, %v1178_v42  ;;  %v1484_v42 = vld [vmem:[%s6363_s17 + $0x37] sm:$0xff] }
  0xb8   : > { %5406 = vmatprep.mubr.msk.f32.mxu1 %vm6257_vm1, %v6256_v1 }
  0xb9   : > { %5306 = vmatmul.mubr.msk.f32.gmra.mrb[80].mxu0 %vm303_vm2, %v852_v44 }
  0xba   : > { %5308 = vmatprep.mubr.msk.f32.mxu0 %vm6257_vm1, %v6256_v1 }
  0xbb   : > { %5407 = vmatmul.mubr.msk.f32.gmra.mrb[80].mxu1 %vm303_vm2, %v1179_v45 }
  0xbc   : > { %5409 = vmatprep.mubr.msk.f32.mxu1 %vm6257_vm1, %v6256_v1 }
  0xbd   : > { %5309 = vmatmul.mubr.msk.f32.gmra.mrb[82].mxu0 %vm303_vm2, %v853_v46 }
  0xbe   : > { %5311 = vmatprep.mubr.msk.f32.mxu0 %vm6257_vm1, %v6256_v1 }
  0xbf   : > { %5410 = vmatmul.mubr.msk.f32.gmra.mrb[82].mxu1 %vm303_vm2, %v1180_v47 }
  0xc0   : > { %5412 = vmatprep.mubr.msk.f32.mxu1 %vm6257_vm1, %v6256_v1 }
  0xc1   : > { %5312 = vmatmul.mubr.msk.f32.gmra.mrb[84].mxu0 %vm303_vm2, %v854_v48  ;;  %v1485_v48 = vld [vmem:[%s6363_s17 + $0x3f] sm:$0xff] }
  0xc2   : > { %5314 = vmatprep.mubr.msk.f32.mxu0 %vm6257_vm1, %v6256_v1 }
  0xc3   : > { %5413 = vmatmul.mubr.msk.f32.gmra.mrb[84].mxu1 %vm303_vm2, %v1181_v49 }
  0xc4   : > { %5415 = vmatprep.mubr.msk.f32.mxu1 %vm6257_vm1, %v6256_v1 }
  0xc5   : > { %5315 = vmatmul.mubr.msk.f32.gmra.mrb[86].mxu0 %vm303_vm2, %v855_v50 }
  0xc6   : > { %5317 = vmatprep.mubr.msk.f32.mxu0 %vm6257_vm1, %v6256_v1 }
  0xc7   : > { %5416 = vmatmul.mubr.msk.f32.gmra.mrb[86].mxu1 %vm303_vm2, %v1182_v51 }
  0xc8   : > { %5418 = vmatprep.mubr.msk.f32.mxu1 %vm6257_vm1, %v6256_v1 }
  0xc9   : > { %5318 = vmatmul.mubr.msk.f32.gmra.mrb[88].mxu0 %vm303_vm2, %v856_v52 }
  0xca   : > { %5320 = vmatprep.mubr.msk.f32.mxu0 %vm6257_vm1, %v6256_v1 }
  0xcb   : > { %5419 = vmatmul.mubr.msk.f32.gmra.mrb[88].mxu1 %vm303_vm2, %v1183_v53  ;;  %v1486_v53 = vld [vmem:[%s6363_s17 + $0x47] sm:$0xff] }
  0xcc   : > { %5421 = vmatprep.mubr.msk.f32.mxu1 %vm6257_vm1, %v6256_v1 }
  0xcd   : > { %5321 = vmatmul.mubr.msk.f32.gmra.mrb[90].mxu0 %vm303_vm2, %v857_v54 }
  0xce   : > { %5323 = vmatprep.mubr.msk.f32.mxu0 %vm6257_vm1, %v6256_v1 }
  0xcf   : > { %5422 = vmatmul.mubr.msk.f32.gmra.mrb[90].mxu1 %vm303_vm2, %v1184_v55 }
  0xd0   : > { %5503 = vmatprep.mubr.msk.f32.mxu1 %vm6257_vm1, %v6256_v1 }
  0xd1   : > { %5324 = vmatmul.mubr.msk.f32.gmra.mrb[92].mxu0 %vm303_vm2, %v858_v56 }
  0xd2   : > { %5326 = vmatprep.mubr.msk.f32.mxu0 %vm6257_vm1, %v6256_v1 }
  0xd3   : > { %5504 = vmatmul.mubr.msk.f32.vlgmr.msra.gmra.mrb[92].mxu1 %vm303_vm2, %v6656_v60  ;;  %v861_v60 = vld [vmem:[%s6363_s17 + $0xa2] sm:$0xff] }
  0xd4   : > { %5506 = vmatprep.mubr.msk.f32.mxu1 %vm6257_vm1, %v6256_v1  ;;  %5656 = vmatpush3.msk.msra.mxu1 %vm379_vm0, %v2461_v58  ;;  %v1487_v58 = vld [vmem:[%s6363_s17 + $0x4f] sm:$0xff] }
  0xd5   : > { %5327 = vmatmul.mubr.msk.f32.gmra.mrb[94].mxu0 %vm303_vm2, %v859_v57 }
  0xd6   : > { %5329 = vmatprep.mubr.msk.f32.mxu0 %vm6257_vm1, %v6256_v1 }
  0xd7   : > { %5507 = vmatmul.mubr.msk.f32.gmra.mrb[94].mxu1 %vm303_vm2, %v6667_v62 }
  0xd8   : > { %5509 = vmatprep.mubr.msk.f32.mxu1 %vm6257_vm1, %v6256_v1 }
  0xd9   : > { %5330 = vmatmul.mubr.msk.f32.gmra.mrb[96].mxu0 %vm303_vm2, %v860_v59 }
  0xda   : > { %5332 = vmatprep.mubr.msk.f32.mxu0 %vm6257_vm1, %v6256_v1 }
  0xdb   : > { %5510 = vmatmul.mubr.msk.f32.gmra.mrb[96].mxu1 %vm303_vm2, %v6368_v4  ;;  %v863_v4 = vld [vmem:[%s6363_s17 + $0xb2] sm:$0xff] }
  0xdc   : > { %5512 = vmatprep.mubr.msk.f32.mxu1 %vm6257_vm1, %v6256_v1 }
  0xdd   : > { %5333 = vmatmul.mubr.msk.f32.gmra.mrb[98].mxu0 %vm303_vm2, %v861_v60 }
  0xde   : > { %5335 = vmatprep.mubr.msk.f32.mxu0 %vm6257_vm1, %v6256_v1 }
  0xdf   : > { %5513 = vmatmul.mubr.msk.f32.gmra.mrb[98].mxu1 %vm303_vm2, %v6383_v7  ;;  %v864_v7 = vld [vmem:[%s6363_s17 + $0xba] sm:$0xff] }
  0xe0   : > { %5515 = vmatprep.mubr.msk.f32.mxu1 %vm6257_vm1, %v6256_v1 }
  0xe1   : > { %5336 = vmatmul.mubr.msk.f32.gmra.mrb[100].mxu0 %vm303_vm2, %v862_v61 }
  0xe2   : > { %5338 = vmatprep.mubr.msk.f32.mxu0 %vm6257_vm1, %v6256_v1 }
  0xe3   : > { %5516 = vmatmul.mubr.msk.f32.gmra.mrb[100].mxu1 %vm303_vm2, %v6396_v9  ;;  %v865_v9 = vld [vmem:[%s6363_s17 + $0xc2] sm:$0xf] }
  0xe4   : > { %5518 = vmatprep.mubr.msk.f32.mxu1 %vm6257_vm1, %v6256_v1 }
  0xe5   : > { %5339 = vmatmul.mubr.msk.f32.gmra.mrb[102].mxu0 %vm303_vm2, %v863_v4 }
  0xe6   : > { %5341 = vmatprep.mubr.msk.f32.mxu0 %vm6257_vm1, %v6256_v1 }
  0xe7   : > { %5519 = vmatmul.mubr.msk.f32.gmra.mrb[102].mxu1 %vm303_vm2, %v6407_v11  ;;  %v1479_v11 = vld [vmem:[%s6363_s17 + $0xf] sm:$0xff] }
  0xe8   : > { %5521 = vmatprep.mubr.msk.f32.mxu1 %vm6257_vm1, %v6256_v1 }
  0xe9   : > { %5342 = vmatmul.mubr.msk.f32.gmra.mrb[104].mxu0 %vm303_vm2, %v864_v7  ;;  %v1488_v7 = vld [vmem:[%s6363_s17 + $0x57] sm:$0xff] }
  0xea   : > { %5344 = vmatprep.mubr.msk.f32.mxu0 %vm6257_vm1, %v6256_v1 }
  0xeb   : > { %5522 = vmatmul.mubr.msk.f32.gmra.mrb[104].mxu1 %vm303_vm2, %v6418_v13 }
  0xec   : > { %v6880_v62 = vpop.f32.mrb[0].mxu0  ;;  %5524 = vmatprep.mubr.msk.f32.mxu1 %vm6257_vm1, %v6256_v1 }
  0xed   : > { %v5120_v63 = vpop.f32.mrb[1].mxu0  ;;  %5345 = vmatmul.mubr.msk.f32.gmra.mrb[106].mxu0 %vm303_vm2, %v865_v9 }
  0xee   : > { %5426 = vmatprep.mubr.msk.f32.mxu0 %vm6257_vm1, %v6256_v1  ;;  %v737_v0 = vpop.f32.mrb[0].mxu1 }
  0xef   : > { %v5209_v3 = vpop.f32.mrb[1].mxu1  ;;  %5525 = vmatmul.mubr.msk.f32.gmra.mrb[106].mxu1 %vm303_vm2, %v6429_v15 }
  0xf0   : > { %v6893_v13 = vpop.f32.mrb[2].mxu0  ;;  %5527 = vmatprep.mubr.msk.f32.mxu1 %vm6257_vm1, %v6256_v1 }
  0xf1   : > { %v5123_v5 = vpop.f32.mrb[3].mxu0  ;;  %5427 = vmatmul.mubr.msk.f32.vlgmr.msra.gmra.mrb[108].mxu0 %vm303_vm2, %v1479_v11 }
  0xf2   : > { %5429 = vmatprep.mubr.msk.f32.mxu0 %vm6257_vm1, %v6256_v1  ;;  %5579 = vmatpush3.msk.msra.mxu0 %vm379_vm0, %v2142_v2  ;;  %v742_v8 = vpop.f32.mrb[2].mxu1  ;;  %v1489_v2 = vld [vmem:[%s6363_s17 + $0x5f] sm:$0xff] }
  0xf3   : > { %v5212_v10 = vpop.f32.mrb[3].mxu1  ;;  %5528 = vmatmul.mubr.msk.f32.gmra.mrb[108].mxu1 %vm303_vm2, %v6440_v17  ;;  %5732 = vmatprep.subr.mxu0 %v6256_v1 }
  0xf4   : > { %v6905_v15 = vpop.f32.mrb[4].mxu0  ;;  %5530 = vmatprep.mubr.msk.f32.mxu1 %vm6257_vm1, %v6256_v1  ;;  %v1490_v10 = vld [vmem:[%s6363_s17 + $0x67] sm:$0xff] }
  0xf5   : > { %v5126_v12 = vpop.f32.mrb[5].mxu0  ;;  %5430 = vmatmul.mubr.msk.f32.gmra.mrb[110].mxu0 %vm303_vm2, %v1480_v6 }
  0xf6   : > { %5432 = vmatprep.mubr.msk.f32.mxu0 %vm6257_vm1, %v6256_v1  ;;  %v747_v16 = vpop.f32.mrb[4].mxu1 }
  0xf7   : > { %v5215_v18 = vpop.f32.mrb[5].mxu1  ;;  %5531 = vmatmul.mubr.msk.f32.gmra.mrb[110].mxu1 %vm303_vm2, %v6451_v19 }
  0xf8   : > { %v6915_v17 = vpop.f32.mrb[6].mxu0  ;;  %5533 = vmatprep.mubr.msk.f32.mxu1 %vm6257_vm1, %v6256_v1 }
  0xf9   : > { %v5129_v20 = vpop.f32.mrb[7].mxu0  ;;  %5433 = vmatmul.mubr.msk.f32.gmra.mrb[112].mxu0 %vm303_vm2, %v1481_v14 }
  0xfa   : > { %5435 = vmatprep.mubr.msk.f32.mxu0 %vm6257_vm1, %v6256_v1  ;;  %v752_v24 = vpop.f32.mrb[6].mxu1  ;;  %v1491_v20 = vld [vmem:[%s6363_s17 + $0x6f] sm:$0xff] }
  0xfb   : > { %v5218_v26 = vpop.f32.mrb[7].mxu1  ;;  %5534 = vmatmul.mubr.msk.f32.gmra.mrb[112].mxu1 %vm303_vm2, %v6462_v21 }
  0xfc   : > { %v469_v28 = vpop.f32.mrb[8].mxu0  ;;  %5536 = vmatprep.mubr.msk.f32.mxu1 %vm6257_vm1, %v6256_v1 }
  0xfd   : > { %v6927_v19 = vadd.f32 %v737_v0, %v469_v28  ;;  %v5132_v30 = vpop.f32.mrb[9].mxu0  ;;  %5436 = vmatmul.mubr.msk.f32.gmra.mrb[114].mxu0 %vm303_vm2, %v1482_v22 }
  0xfe   : > { %5438 = vmatprep.mubr.msk.f32.mxu0 %vm6257_vm1, %v6256_v1  ;;  %v757_v34 = vpop.f32.mrb[8].mxu1  ;;  %v1492_v30 = vld [vmem:[%s6363_s17 + $0x77] sm:$0xff] }
  0xff   : > { %v5221_v36 = vpop.f32.mrb[9].mxu1  ;;  %5537 = vmatmul.mubr.msk.f32.gmra.mrb[114].mxu1 %vm303_vm2, %v6473_v23 }
 0x100   : > { %v474_v21 = vpop.f32.mrb[10].mxu0  ;;  %5539 = vmatprep.mubr.msk.f32.mxu1 %vm6257_vm1, %v6256_v1 }
 0x101   : > { %v6937_v38 = vadd.f32 %v742_v8, %v474_v21  ;;  %v5135_v40 = vpop.f32.mrb[11].mxu0  ;;  %5439 = vmatmul.mubr.msk.f32.gmra.mrb[116].mxu0 %vm303_vm2, %v1483_v32 }
 0x102   : > { %5441 = vmatprep.mubr.msk.f32.mxu0 %vm6257_vm1, %v6256_v1  ;;  %v762_v44 = vpop.f32.mrb[10].mxu1  ;;  %v1493_v40 = vld [vmem:[%s6363_s17 + $0x7f] sm:$0xff] }
 0x103   : > { %v5224_v45 = vpop.f32.mrb[11].mxu1  ;;  %5540 = vmatmul.mubr.msk.f32.gmra.mrb[116].mxu1 %vm303_vm2, %v6484_v25 }
 0x104   : > { %v479_v23 = vpop.f32.mrb[12].mxu0  ;;  %5542 = vmatprep.mubr.msk.f32.mxu1 %vm6257_vm1, %v6256_v1  ;;  %v1820_v45 = vld [vmem:[%s6363_s17 + $0xc0] sm:$0xff] }
 0x105   : > { %v6947_v46 = vadd.f32 %v747_v16, %v479_v23  ;;  %v5138_v47 = vpop.f32.mrb[13].mxu0  ;;  %5442 = vmatmul.mubr.msk.f32.gmra.mrb[118].mxu0 %vm303_vm2, %v1484_v42 }
 0x106   : > { %5444 = vmatprep.mubr.msk.f32.mxu0 %vm6257_vm1, %v6256_v1  ;;  %v767_v49 = vpop.f32.mrb[12].mxu1 }
 0x107   : > { %v5227_v50 = vpop.f32.mrb[13].mxu1  ;;  %5543 = vmatmul.mubr.msk.f32.gmra.mrb[118].mxu1 %vm303_vm2, %v6495_v27 }
 0x108   : > { %v484_v25 = vpop.f32.mrb[14].mxu0  ;;  %5545 = vmatprep.mubr.msk.f32.mxu1 %vm6257_vm1, %v6256_v1 }
 0x109   : > { %v6957_v51 = vadd.f32 %v752_v24, %v484_v25  ;;  %v5141_v52 = vpop.f32.mrb[15].mxu0  ;;  %5445 = vmatmul.mubr.msk.f32.gmra.mrb[120].mxu0 %vm303_vm2, %v1485_v48  ;;  %v1494_v48 = vld [vmem:[%s6363_s17 + $0x87] sm:$0xff] }
 0x10a   : > { %5447 = vmatprep.mubr.msk.f32.mxu0 %vm6257_vm1, %v6256_v1  ;;  %v772_v54 = vpop.f32.mrb[14].mxu1  ;;  %v1821_v25 = vld [vmem:[%s6363_s17 + $0xc8] sm:$0xff] }
 0x10b   : > { %v5230_v55 = vpop.f32.mrb[15].mxu1  ;;  %5546 = vmatmul.mubr.msk.f32.gmra.mrb[120].mxu1 %vm303_vm2, %v6506_v29 }
 0x10c   : > { %v489_v27 = vpop.f32.mrb[16].mxu0  ;;  %5548 = vmatprep.mubr.msk.f32.mxu1 %vm6257_vm1, %v6256_v1 }
 0x10d   : > { %v6967_v56 = vadd.f32 %v757_v34, %v489_v27  ;;  %v5144_v57 = vpop.f32.mrb[17].mxu0  ;;  %5448 = vmatmul.mubr.msk.f32.gmra.mrb[122].mxu0 %vm303_vm2, %v1486_v53 }
 0x10e   : > { %5450 = vmatprep.mubr.msk.f32.mxu0 %vm6257_vm1, %v6256_v1  ;;  %v777_v59 = vpop.f32.mrb[16].mxu1 }
 0x10f   : > { %v5233_v60 = vpop.f32.mrb[17].mxu1  ;;  %5549 = vmatmul.mubr.msk.f32.gmra.mrb[122].mxu1 %vm303_vm2, %v6517_v31 }
 0x110   : > { %v494_v29 = vpop.f32.mrb[18].mxu0  ;;  %5551 = vmatprep.mubr.msk.f32.mxu1 %vm6257_vm1, %v6256_v1 }
 0x111   : > { %v6977_v61 = vadd.f32 %v762_v44, %v494_v29  ;;  %v5147_v4 = vpop.f32.mrb[19].mxu0  ;;  %5451 = vmatmul.mubr.msk.f32.gmra.mrb[124].mxu0 %vm303_vm2, %v1487_v58  ;;  %v1822_v58 = vld [vmem:[%s6363_s17 + $0xd0] sm:$0xf]  ;;  %v1496_v29 = vld [vmem:[%s6363_s17 + $0x97] sm:$0xff] }
 0x112   : > { %5453 = vmatprep.mubr.msk.f32.mxu0 %vm6257_vm1, %v6256_v1  ;;  %v782_v9 = vpop.f32.mrb[18].mxu1 }
 0x113   : > { %v5236_v63 = vpop.f32.mrb[19].mxu1  ;;  %5552 = vmatmul.mubr.msk.f32.gmra.mrb[124].mxu1 %vm303_vm2, %v6528_v33 }
 0x114   : > { %v499_v31 = vpop.f32.mrb[20].mxu0  ;;  %5554 = vmatprep.mubr.msk.f32.mxu1 %vm6257_vm1, %v6256_v1  ;;  %v2436_v63 = vld [vmem:[%s6363_s17 + $0x1d] sm:$0xff] }
 0x115   : > { %v6987_v11 = vadd.f32 %v767_v49, %v499_v31  ;;  %v5150_v0 = vpop.f32.mrb[21].mxu0  ;;  %5454 = vmatmul.mubr.msk.f32.gmra.mrb[126].mxu0 %vm303_vm2, %v1488_v7 }
 0x116   : > { %5456 = vmatprep.mubr.msk.f32.mxu0 %vm6257_vm1, %v6256_v1  ;;  %v787_v3 = vpop.f32.mrb[20].mxu1 }
 0x117   : > { %v5239_v5 = vpop.f32.mrb[21].mxu1  ;;  %5555 = vmatmul.mubr.msk.f32.gmra.mrb[126].mxu1 %vm303_vm2, %v6539_v35 }
 0x118   : > { %v504_v33 = vpop.f32.mrb[22].mxu0  ;;  %5557 = vmatprep.mubr.msk.f32.mxu1 %vm6257_vm1, %v6256_v1 }
 0x119   : > { %v6997_v6 = vadd.f32 %v772_v54, %v504_v33  ;;  %v5153_v8 = vpop.f32.mrb[23].mxu0  ;;  %5457 = vmatmul.mubr.msk.f32.gmra.mrb[128].mxu0 %vm303_vm2, %v1489_v2  ;;  %v1495_v54 = vld [vmem:[%s6363_s17 + $0x8f] sm:$0xff]  ;;  %v1497_v2 = vld [vmem:[%s6363_s17 + $0x9f] sm:$0xff] }
 0x11a   : > { %5459 = vmatprep.mubr.msk.f32.mxu0 %vm6257_vm1, %v6256_v1  ;;  %v792_v12 = vpop.f32.mrb[22].mxu1  ;;  %v2437_v8 = vld [vmem:[%s6363_s17 + $0x25] sm:$0xff] }
 0x11b   : > { %v5242_v14 = vpop.f32.mrb[23].mxu1  ;;  %5558 = vmatmul.mubr.msk.f32.gmra.mrb[128].mxu1 %vm303_vm2, %v6550_v37 }
 0x11c   : > { %v509_v35 = vpop.f32.mrb[24].mxu0  ;;  %5560 = vmatprep.mubr.msk.f32.mxu1 %vm6257_vm1, %v6256_v1  ;;  %v1498_v14 = vld [vmem:[%s6363_s17 + $0xa7] sm:$0xff] }
 0x11d   : > { %v7007_v16 = vadd.f32 %v777_v59, %v509_v35  ;;  %v5156_v18 = vpop.f32.mrb[25].mxu0  ;;  %5460 = vmatmul.mubr.msk.f32.gmra.mrb[130].mxu0 %vm303_vm2, %v1490_v10 }
 0x11e   : > { %5462 = vmatprep.mubr.msk.f32.mxu0 %vm6257_vm1, %v6256_v1  ;;  %v797_v22 = vpop.f32.mrb[24].mxu1 }
 0x11f   : > { %v5245_v24 = vpop.f32.mrb[25].mxu1  ;;  %5561 = vmatmul.mubr.msk.f32.gmra.mrb[130].mxu1 %vm303_vm2, %v6561_v39 }
 0x120   : > { %v514_v37 = vpop.f32.mrb[26].mxu0  ;;  %5563 = vmatprep.mubr.msk.f32.mxu1 %vm6257_vm1, %v6256_v1 }
 0x121   : > { %v7017_v26 = vadd.f32 %v782_v9, %v514_v37  ;;  %v5159_v28 = vpop.f32.mrb[27].mxu0  ;;  %5463 = vmatmul.mubr.msk.f32.gmra.mrb[132].mxu0 %vm303_vm2, %v1491_v20 }
 0x122   : > { %5465 = vmatprep.mubr.msk.f32.mxu0 %vm6257_vm1, %v6256_v1  ;;  %v802_v32 = vpop.f32.mrb[26].mxu1  ;;  %v1499_v28 = vld [vmem:[%s6363_s17 + $0xaf] sm:$0xff] }
 0x123   : > { %v5248_v34 = vpop.f32.mrb[27].mxu1  ;;  %5564 = vmatmul.mubr.msk.f32.gmra.mrb[132].mxu1 %vm303_vm2, %v6572_v41 }
 0x124   : > { %v519_v39 = vpop.f32.mrb[28].mxu0  ;;  %5566 = vmatprep.mubr.msk.f32.mxu1 %vm6257_vm1, %v6256_v1 }
 0x125   : > { %v7027_v36 = vadd.f32 %v787_v3, %v519_v39  ;;  %v5162_v21 = vpop.f32.mrb[29].mxu0  ;;  %5466 = vmatmul.mubr.msk.f32.gmra.mrb[134].mxu0 %vm303_vm2, %v1492_v30  ;;  %v2439_v39 = vld [vmem:[%s6363_s17 + $0x35] sm:$0xff] }
 0x126   : > { %5468 = vmatprep.mubr.msk.f32.mxu0 %vm6257_vm1, %v6256_v1  ;;  %v807_v42 = vpop.f32.mrb[28].mxu1 }
 0x127   : > { %v5251_v44 = vpop.f32.mrb[29].mxu1  ;;  %5567 = vmatmul.mubr.msk.f32.gmra.mrb[134].mxu1 %vm303_vm2, %v6583_v43 }
 0x128   : > { %v524_v41 = vpop.f32.mrb[30].mxu0  ;;  %5569 = vmatprep.mubr.msk.f32.mxu1 %vm6257_vm1, %v6256_v1 }
 0x129   : > { %v7038_v23 = vadd.f32 %v792_v12, %v524_v41  ;;  %v5165_v47 = vpop.f32.mrb[31].mxu0  ;;  %5469 = vmatmul.mubr.msk.f32.gmra.mrb[136].mxu0 %vm303_vm2, %v1493_v40 }
 0x12a   : > { %5471 = vmatprep.mubr.msk.f32.mxu0 %vm6257_vm1, %v6256_v1  ;;  %v812_v49 = vpop.f32.mrb[30].mxu1  ;;  %v2440_v47 = vld [vmem:[%s6363_s17 + $0x3d] sm:$0xff] }
 0x12b   : > { %v5254_v50 = vpop.f32.mrb[31].mxu1  ;;  %5570 = vmatmul.mubr.msk.f32.gmra.mrb[136].mxu1 %vm303_vm2, %v1820_v45 }
 0x12c   : > { %v529_v43 = vpop.f32.mrb[32].mxu0  ;;  %5572 = vmatprep.mubr.msk.f32.mxu1 %vm6257_vm1, %v6256_v1  ;;  %v1501_v50 = vld [vmem:[%s6363_s17 + $0xbf] sm:$0xff] }
 0x12d   : > { %v7048_v52 = vadd.f32 %v797_v22, %v529_v43  ;;  %v5168_v53 = vpop.f32.mrb[33].mxu0  ;;  %5472 = vmatmul.mubr.msk.f32.gmra.mrb[138].mxu0 %vm303_vm2, %v1494_v48  ;;  %v2438_v22 = vld [vmem:[%s6363_s17 + $0x2d] sm:$0xff] }
 0x12e   : > { %5474 = vmatprep.mubr.msk.f32.mxu0 %vm6257_vm1, %v6256_v1  ;;  %v817_v55 = vpop.f32.mrb[32].mxu1 }
 0x12f   : > { %v5257_v27 = vpop.f32.mrb[33].mxu1  ;;  %5573 = vmatmul.mubr.msk.f32.gmra.mrb[138].mxu1 %vm303_vm2, %v1821_v25 }
 0x130   : > { %v534_v57 = vpop.f32.mrb[34].mxu0  ;;  %5575 = vmatprep.mubr.msk.f32.mxu1 %vm6257_vm1, %v6256_v1 }
 0x131   : > { %v7058_v59 = vadd.f32 %v802_v32, %v534_v57  ;;  %v5171_v60 = vpop.f32.mrb[35].mxu0  ;;  %5475 = vmatmul.mubr.msk.f32.gmra.mrb[140].mxu0 %vm303_vm2, %v1495_v54  ;;  %v2441_v54 = vld [vmem:[%s6363_s17 + $0x45] sm:$0xff] }
 0x132   : > { %5477 = vmatprep.mubr.msk.f32.mxu0 %vm6257_vm1, %v6256_v1  ;;  %v822_v4 = vpop.f32.mrb[34].mxu1  ;;  %v1502_v57 = vld [vmem:[%s6363_s17 + $0xc7] sm:$0xff] }
 0x133   : > { %v5260_v7 = vpop.f32.mrb[35].mxu1  ;;  %5576 = vmatmul.mubr.msk.f32.gmra.mrb[140].mxu1 %vm303_vm2, %v1822_v58 }
 0x134   : > { %v539_v9 = vpop.f32.mrb[36].mxu0  ;;  %5657 = vmatprep.mubr.msk.f32.mxu1 %vm6257_vm1, %v6256_v1 }
 0x135   : > { %v7068_v31 = vadd.f32 %v807_v42, %v539_v9  ;;  %v5174_v0 = vpop.f32.mrb[37].mxu0  ;;  %5478 = vmatmul.mubr.msk.f32.gmra.mrb[142].mxu0 %vm303_vm2, %v1496_v29  ;;  %v1500_v42 = vld [vmem:[%s6363_s17 + $0xb7] sm:$0xff] }
 0x136   : > { %5480 = vmatprep.mubr.msk.f32.mxu0 %vm6257_vm1, %v6256_v1  ;;  %v827_v3 = vpop.f32.mrb[36].mxu1 }
 0x137   : > { %v5263_v5 = vpop.f32.mrb[37].mxu1  ;;  %5658 = vmatmul.mubr.msk.f32.vlgmr.msra.gmra.mrb[142].mxu1 %vm303_vm2, %v2436_v63  ;;  %v1503_v63 = vld [vmem:[%s6363_s17 + $0xcf] sm:$0xf] }
 0x138   : > { %v544_v33 = vpop.f32.mrb[38].mxu0  ;;  %5660 = vmatprep.mubr.msk.f32.mxu1 %vm6257_vm1, %v6256_v1  ;;  %v2443_v5 = vld [vmem:[%s6363_s17 + $0x55] sm:$0xff] }
 0x139   : > { %v7078_v10 = vadd.f32 %v812_v49, %v544_v33  ;;  %v5177_v12 = vpop.f32.mrb[39].mxu0  ;;  %5481 = vmatmul.mubr.msk.f32.gmra.mrb[144].mxu0 %vm303_vm2, %v1497_v2 }
 0x13a   : > { %5483 = vmatprep.mubr.msk.f32.mxu0 %vm6257_vm1, %v6256_v1  ;;  %v832_v35 = vpop.f32.mrb[38].mxu1  ;;  %v2117_v12 = vld [vmem:[%s6363_s17 + $0x1c] sm:$0xff] }
 0x13b   : > { %v5266_v18 = vpop.f32.mrb[39].mxu1  ;;  %5661 = vmatmul.mubr.msk.f32.gmra.mrb[144].mxu1 %vm303_vm2, %v2437_v8 }
 0x13c   : > { %v549_v20 = vpop.f32.mrb[40].mxu0  ;;  %5663 = vmatprep.mubr.msk.f32.mxu1 %vm6257_vm1, %v6256_v1 }
 0x13d   : > { %v7088_v24 = vadd.f32 %v817_v55, %v549_v20  ;;  %v5180_v37 = vpop.f32.mrb[41].mxu0  ;;  %5484 = vmatmul.mubr.msk.f32.gmra.mrb[146].mxu0 %vm303_vm2, %v1498_v14 }
 0x13e   : > { %5486 = vmatprep.mubr.msk.f32.mxu0 %vm6257_vm1, %v6256_v1  ;;  %v837_v30 = vpop.f32.mrb[40].mxu1 }
 0x13f   : > { %5664 = vmatmul.mubr.msk.f32.gmra.mrb[146].mxu1 %vm303_vm2, %v2438_v22  ;;  %v5269_v32 = vpop.f32.mrb[41].mxu1 }
 0x140   : > { %v554_v34 = vpop.f32.mrb[42].mxu0  ;;  %5666 = vmatprep.mubr.msk.f32.mxu1 %vm6257_vm1, %v6256_v1 }
 0x141   : > { %v7098_v21 = vadd.f32 %v822_v4, %v554_v34  ;;  %v5183_v40 = vpop.f32.mrb[43].mxu0  ;;  %5487 = vmatmul.mubr.msk.f32.gmra.mrb[148].mxu0 %vm303_vm2, %v1499_v28  ;;  %v2442_v4 = vld [vmem:[%s6363_s17 + $0x4d] sm:$0xff]  ;;  %v2118_v28 = vld [vmem:[%s6363_s17 + $0x24] sm:$0xff] }
 0x142   : > { %5489 = vmatprep.mubr.msk.f32.mxu0 %vm6257_vm1, %v6256_v1  ;;  %v7104_v44 = vpop.f32.mrb[42].mxu1 }
 0x143   : > { %5667 = vmatmul.mubr.msk.f32.gmra.mrb[148].mxu1 %vm303_vm2, %v2439_v39  ;;  %v5351_v41 = vpop.f32.mrb[43].mxu1 }
 0x144   : > { %v559_v45 = vpop.f32.mrb[44].mxu0  ;;  %5669 = vmatprep.mubr.msk.f32.mxu1 %vm6257_vm1, %v6256_v1 }
 0x145   : > { %v7110_v48 = vadd.f32 %v827_v3, %v559_v45  ;;  %v5186_v49 = vpop.f32.mrb[45].mxu0  ;;  %5490 = vmatmul.mubr.msk.f32.gmra.mrb[150].mxu0 %vm303_vm2, %v1500_v42  ;;  %v2119_v42 = vld [vmem:[%s6363_s17 + $0x2c] sm:$0xff] }
 0x146   : > { %5492 = vmatprep.mubr.msk.f32.mxu0 %vm6257_vm1, %v6256_v1  ;;  %v7116_v43 = vpop.f32.mrb[44].mxu1  ;;  %v2446_v49 = vld [vmem:[%s6363_s17 + $0x6d] sm:$0xff] }
 0x147   : > { %5670 = vmatmul.mubr.msk.f32.gmra.mrb[150].mxu1 %vm303_vm2, %v2440_v47  ;;  %v5354_v25 = vpop.f32.mrb[45].mxu1 }
 0x148   : > { %v564_v53 = vpop.f32.mrb[46].mxu0  ;;  %5672 = vmatprep.mubr.msk.f32.mxu1 %vm6257_vm1, %v6256_v1  ;;  %v2120_v25 = vld [vmem:[%s6363_s17 + $0x34] sm:$0xff] }
 0x149   : > { %v7122_v55 = vadd.f32 %v832_v35, %v564_v53  ;;  %v5189_v27 = vpop.f32.mrb[47].mxu0  ;;  %5493 = vmatmul.mubr.msk.f32.gmra.mrb[152].mxu0 %vm303_vm2, %v1501_v50  ;;  %v2780_v35 = vld [vmem:[%s8213_s1 + $0x20] sm:$0xf] }
 0x14a   : > { %5495 = vmatprep.mubr.msk.f32.mxu0 %vm6257_vm1, %v6256_v1  ;;  %v7128_v58 = vpop.f32.mrb[46].mxu1 }
 0x14b   : > { %5673 = vmatmul.mubr.msk.f32.gmra.mrb[152].mxu1 %vm303_vm2, %v2441_v54  ;;  %v5357_v60 = vpop.f32.mrb[47].mxu1 }
 0x14c   : > { %v569_v29 = vpop.f32.mrb[48].mxu0  ;;  %5675 = vmatprep.mubr.msk.f32.mxu1 %vm6257_vm1, %v6256_v1 }
 0x14d   : > { %v7134_v7 = vadd.f32 %v837_v30, %v569_v29  ;;  %v5192_v9 = vpop.f32.mrb[49].mxu0  ;;  %5496 = vmatmul.mubr.msk.f32.gmra.mrb[154].mxu0 %vm303_vm2, %v1502_v57  ;;  %v2447_v57 = vld [vmem:[%s6363_s17 + $0x75] sm:$0xff] }
 0x14e   : > { %5498 = vmatprep.mubr.msk.f32.mxu0 %vm6257_vm1, %v6256_v1  ;;  %v7140_v0 = vpop.f32.mrb[48].mxu1  ;;  %v2121_v29 = vld [vmem:[%s6363_s17 + $0x3c] sm:$0xff] }
 0x14f   : > { %5676 = vmatmul.mubr.msk.f32.gmra.mrb[154].mxu1 %vm303_vm2, %v2442_v4  ;;  %v5360_v2 = vpop.f32.mrb[49].mxu1 }
 0x150   : > { %v717_v3 = vpop.f32.mrb[50].mxu0  ;;  %5678 = vmatprep.mubr.msk.f32.mxu1 %vm6257_vm1, %v6256_v1 }
 0x151   : > { %v718_v33 = vadd.f32 %v717_v3, %v6880_v62  ;;  %v5197_v8 = vpop.f32.mrb[51].mxu0  ;;  %5499 = vmatmul.mubr.msk.f32.gmra.mrb[156].mxu0 %vm303_vm2, %v1503_v63  ;;  %v2444_v62 = vld [vmem:[%s6363_s17 + $0x5d] sm:$0xff] }
 0x152   : > { %5580 = vmatprep.mubr.msk.f32.mxu0 %vm6257_vm1, %v6256_v1  ;;  %v7151_v14 = vpop.f32.mrb[50].mxu1  ;;  %v2448_v3 = vld [vmem:[%s6363_s17 + $0x7d] sm:$0xff] }
 0x153   : > { %5679 = vmatmul.mubr.msk.f32.gmra.mrb[156].mxu1 %vm303_vm2, %v2443_v5  ;;  %v5363_v18 = vpop.f32.mrb[51].mxu1  ;;  %v2122_v8 = vld [vmem:[%s6363_s17 + $0x44] sm:$0xff] }
 0x154   : > { %v722_v20 = vpop.f32.mrb[52].mxu0  ;;  %5681 = vmatprep.mubr.msk.f32.mxu1 %vm6257_vm1, %v6256_v1 }
 0x155   : > { %v723_v22 = vadd.f32 %v722_v20, %v6893_v13  ;;  %v5200_v37 = vpop.f32.mrb[53].mxu0  ;;  %5581 = vmatmul.mubr.msk.f32.vlgmr.msra.gmra.mrb[158].mxu0 %vm303_vm2, %v2117_v12  ;;  %v2445_v13 = vld [vmem:[%s6363_s17 + $0x65] sm:$0xff] }
 0x156   : > { %5583 = vmatprep.mubr.msk.f32.mxu0 %vm6257_vm1, %v6256_v1  ;;  %5733 = vmatpush3.msk.msra.mxu0 %vm379_vm0, %v2780_v35  ;;  %v7166_v30 = vpop.f32.mrb[52].mxu1  ;;  %v2449_v20 = vld [vmem:[%s6363_s17 + $0x85] sm:$0xff] }
 0x157   : > { %5682 = vmatmul.mubr.msk.f32.gmra.mrb[158].mxu1 %vm303_vm2, %v2444_v62  ;;  %v5366_v32 = vpop.f32.mrb[53].mxu1  ;;  %v2123_v37 = vld [vmem:[%s6363_s17 + $0x4c] sm:$0xff] }
 0x158   : > { %v727_v34 = vpop.f32.mrb[54].mxu0  ;;  %5684 = vmatprep.mubr.msk.f32.mxu1 %vm6257_vm1, %v6256_v1 }
 0x159   : > { %v728_v39 = vadd.f32 %v727_v34, %v6905_v15  ;;  %v5203_v40 = vpop.f32.mrb[55].mxu0  ;;  %5584 = vmatmul.mubr.msk.f32.gmra.mrb[160].mxu0 %vm303_vm2, %v2118_v28 }
 0x15a   : > { %5586 = vmatprep.mubr.msk.f32.mxu0 %vm6257_vm1, %v6256_v1  ;;  %v7177_v41 = vpop.f32.mrb[54].mxu1 }
 0x15b   : > { %5685 = vmatmul.mubr.msk.f32.gmra.mrb[160].mxu1 %vm303_vm2, %v2445_v13  ;;  %v5369_v45 = vpop.f32.mrb[55].mxu1  ;;  %v2450_v13 = vld [vmem:[%s6363_s17 + $0x8d] sm:$0xff] }
 0x15c   : > { %v732_v47 = vpop.f32.mrb[56].mxu0  ;;  %5687 = vmatprep.mubr.msk.f32.mxu1 %vm6257_vm1, %v6256_v1 }
 0x15d   : > { %v733_v15 = vadd.f32 %v732_v47, %v6915_v17  ;;  %v5206_v50 = vpop.f32.mrb[57].mxu0  ;;  %5587 = vmatmul.mubr.msk.f32.gmra.mrb[162].mxu0 %vm303_vm2, %v2119_v42  ;;  %v2124_v42 = vld [vmem:[%s6363_s17 + $0x54] sm:$0xff] }
 0x15e   : > { %5589 = vmatprep.mubr.msk.f32.mxu0 %vm6257_vm1, %v6256_v1  ;;  %v7188_v53 = vpop.f32.mrb[56].mxu1 }
 0x15f   : > { %5688 = vmatmul.mubr.msk.f32.gmra.mrb[162].mxu1 %vm303_vm2, %v2446_v49  ;;  %v5372_v54 = vpop.f32.mrb[57].mxu1 }
 0x160   : > { %v1011_v27 = vpop.f32.mrb[58].mxu0  ;;  %5690 = vmatprep.mubr.msk.f32.mxu1 %vm6257_vm1, %v6256_v1 }
 0x161   : > { %v1135_v60 = vadd.f32 %v1011_v27, %v718_v33  ;;  %v5274_v17 = vpop.f32.mrb[59].mxu0  ;;  %5590 = vmatmul.mubr.msk.f32.gmra.mrb[164].mxu0 %vm303_vm2, %v2120_v25 }
 0x162   : > { %5592 = vmatprep.mubr.msk.f32.mxu0 %vm6257_vm1, %v6256_v1  ;;  %v7198_v4 = vpop.f32.mrb[58].mxu1 }
 0x163   : > { %v7201_v9 = vadd.f32 %v7104_v44, %v1135_v60  ;;  %5691 = vmatmul.mubr.msk.f32.gmra.mrb[164].mxu1 %vm303_vm2, %v2447_v57  ;;  %v5375_v63 = vpop.f32.mrb[59].mxu1 }
 0x164   : > { %v1016_v2 = vpop.f32.mrb[60].mxu0  ;;  %5693 = vmatprep.mubr.msk.f32.mxu1 %vm6257_vm1, %v6256_v1 }
 0x165   : > { %v1136_v5 = vadd.f32 %v1016_v2, %v723_v22  ;;  %v5277_v33 = vpop.f32.mrb[61].mxu0  ;;  %5593 = vmatmul.mubr.msk.f32.gmra.mrb[166].mxu0 %vm303_vm2, %v2121_v29 }
 0x166   : > { %5595 = vmatprep.mubr.msk.f32.mxu0 %vm6257_vm1, %v6256_v1  ;;  %v7211_v44 = vpop.f32.mrb[60].mxu1 }
 0x167   : > { %v7214_v12 = vadd.f32 %v7116_v43, %v1136_v5  ;;  %5694 = vmatmul.mubr.msk.f32.gmra.mrb[166].mxu1 %vm303_vm2, %v2448_v3  ;;  %v5378_v35 = vpop.f32.mrb[61].mxu1 }
 0x168   : > { %v1021_v18 = vpop.f32.mrb[62].mxu0  ;;  %5696 = vmatprep.mubr.msk.f32.mxu1 %vm6257_vm1, %v6256_v1 }
 0x169   : > { %v1137_v62 = vadd.f32 %v1021_v18, %v728_v39  ;;  %v5280_v22 = vpop.f32.mrb[63].mxu0  ;;  %5596 = vmatmul.mubr.msk.f32.gmra.mrb[168].mxu0 %vm303_vm2, %v2122_v8 }
 0x16a   : > { %5598 = vmatprep.mubr.msk.f32.mxu0 %vm6257_vm1, %v6256_v1  ;;  %v7224_v43 = vpop.f32.mrb[62].mxu1 }
 0x16b   : > { %v7227_v28 = vadd.f32 %v7128_v58, %v1137_v62  ;;  %5697 = vmatmul.mubr.msk.f32.gmra.mrb[168].mxu1 %vm303_vm2, %v2449_v20  ;;  %v5381_v32 = vpop.f32.mrb[63].mxu1 }
 0x16c   : > { %v1026_v34 = vpop.f32.mrb[64].mxu0  ;;  %5699 = vmatprep.mubr.msk.f32.mxu1 %vm6257_vm1, %v6256_v1 }
 0x16d   : > { %v1138_v39 = vadd.f32 %v1026_v34, %v733_v15  ;;  %v5283_v40 = vpop.f32.mrb[65].mxu0  ;;  %5599 = vmatmul.mubr.msk.f32.gmra.mrb[170].mxu0 %vm303_vm2, %v2123_v37  ;;  %v2451_v15 = vld [vmem:[%s6363_s17 + $0x95] sm:$0xff] }
 0x16e   : > { %5601 = vmatprep.mubr.msk.f32.mxu0 %vm6257_vm1, %v6256_v1  ;;  %v7237_v58 = vpop.f32.mrb[64].mxu1 }
 0x16f   : > { %v7240_v45 = vadd.f32 %v7140_v0, %v1138_v39  ;;  %5700 = vmatmul.mubr.msk.f32.gmra.mrb[170].mxu1 %vm303_vm2, %v2450_v13  ;;  %v5384_v47 = vpop.f32.mrb[65].mxu1  ;;  %v2125_v0 = vld [vmem:[%s6363_s17 + $0x5c] sm:$0xff] }
 0x170   : > { %v1031_v49 = vpop.f32.mrb[66].mxu0  ;;  %5702 = vmatprep.mubr.msk.f32.mxu1 %vm6257_vm1, %v6256_v1 }
 0x171   : > { %v1139_v50 = vadd.f32 %v1031_v49, %v6927_v19  ;;  %v5286_v25 = vpop.f32.mrb[67].mxu0  ;;  %5602 = vmatmul.mubr.msk.f32.gmra.mrb[172].mxu0 %vm303_vm2, %v2124_v42  ;;  %v2452_v19 = vld [vmem:[%s6363_s17 + $0x9d] sm:$0xff] }
 0x172   : > { %5604 = vmatprep.mubr.msk.f32.mxu0 %vm6257_vm1, %v6256_v1  ;;  %v7251_v54 = vpop.f32.mrb[66].mxu1 }
 0x173   : > { %v7254_v27 = vadd.f32 %v7151_v14, %v1139_v50  ;;  %5703 = vmatmul.mubr.msk.f32.gmra.mrb[172].mxu1 %vm303_vm2, %v2451_v15  ;;  %v5387_v57 = vpop.f32.mrb[67].mxu1  ;;  %v2126_v14 = vld [vmem:[%s6363_s17 + $0x64] sm:$0xff] }
 0x174   : > { %v1036_v60 = vpop.f32.mrb[68].mxu0  ;;  %5705 = vmatprep.mubr.msk.f32.mxu1 %vm6257_vm1, %v6256_v1 }
 0x175   : > { %v1140_v17 = vadd.f32 %v1036_v60, %v6937_v38  ;;  %v5289_v29 = vpop.f32.mrb[69].mxu0  ;;  %5605 = vmatmul.mubr.msk.f32.gmra.mrb[174].mxu0 %vm303_vm2, %v2125_v0  ;;  %v2453_v38 = vld [vmem:[%s6363_s17 + $0xa5] sm:$0xff] }
 0x176   : > { %5607 = vmatprep.mubr.msk.f32.mxu0 %vm6257_vm1, %v6256_v1  ;;  %v7265_v63 = vpop.f32.mrb[68].mxu1 }
 0x177   : > { %v7268_v2 = vadd.f32 %v7166_v30, %v1140_v17  ;;  %5706 = vmatmul.mubr.msk.f32.gmra.mrb[174].mxu1 %vm303_vm2, %v2452_v19  ;;  %v5390_v3 = vpop.f32.mrb[69].mxu1  ;;  %v2127_v30 = vld [vmem:[%s6363_s17 + $0x6c] sm:$0xff] }
 0x178   : > { %v1041_v5 = vpop.f32.mrb[70].mxu0  ;;  %5708 = vmatprep.mubr.msk.f32.mxu1 %vm6257_vm1, %v6256_v1 }
 0x179   : > { %v1141_v33 = vadd.f32 %v1041_v5, %v6947_v46  ;;  %v5292_v8 = vpop.f32.mrb[71].mxu0  ;;  %5608 = vmatmul.mubr.msk.f32.gmra.mrb[176].mxu0 %vm303_vm2, %v2126_v14  ;;  %v2454_v46 = vld [vmem:[%s6363_s17 + $0xad] sm:$0xff] }
 0x17a   : > { %5610 = vmatprep.mubr.msk.f32.mxu0 %vm6257_vm1, %v6256_v1  ;;  %v7279_v35 = vpop.f32.mrb[70].mxu1 }
 0x17b   : > { %v7282_v18 = vadd.f32 %v7177_v41, %v1141_v33  ;;  %5709 = vmatmul.mubr.msk.f32.gmra.mrb[176].mxu1 %vm303_vm2, %v2453_v38  ;;  %v5393_v20 = vpop.f32.mrb[71].mxu1  ;;  %v2128_v41 = vld [vmem:[%s6363_s17 + $0x74] sm:$0xff] }
 0x17c   : > { %v1046_v62 = vpop.f32.mrb[72].mxu0  ;;  %5711 = vmatprep.mubr.msk.f32.mxu1 %vm6257_vm1, %v6256_v1 }
 0x17d   : > { %v1142_v22 = vadd.f32 %v1046_v62, %v6957_v51  ;;  %v5295_v37 = vpop.f32.mrb[73].mxu0  ;;  %5611 = vmatmul.mubr.msk.f32.gmra.mrb[178].mxu0 %vm303_vm2, %v2127_v30  ;;  %v2455_v51 = vld [vmem:[%s6363_s17 + $0xb5] sm:$0xff] }
 0x17e   : > { %5613 = vmatprep.mubr.msk.f32.mxu0 %vm6257_vm1, %v6256_v1  ;;  %v7293_v32 = vpop.f32.mrb[72].mxu1 }
 0x17f   : > { %v7296_v34 = vadd.f32 %v7188_v53, %v1142_v22  ;;  %5712 = vmatmul.mubr.msk.f32.gmra.mrb[178].mxu1 %vm303_vm2, %v2454_v46  ;;  %v5396_v13 = vpop.f32.mrb[73].mxu1  ;;  %v2129_v53 = vld [vmem:[%s6363_s17 + $0x7c] sm:$0xff] }
 0x180   : > { %v1051_v39 = vpop.f32.mrb[74].mxu0  ;;  %5714 = vmatprep.mubr.msk.f32.mxu1 %vm6257_vm1, %v6256_v1 }
 0x181   : > { %v1143_v40 = vadd.f32 %v1051_v39, %v6967_v56  ;;  %v5298_v42 = vpop.f32.mrb[75].mxu0  ;;  %5614 = vmatmul.mubr.msk.f32.gmra.mrb[180].mxu0 %vm303_vm2, %v2128_v41  ;;  %v2456_v56 = vld [vmem:[%s6363_s17 + $0xbd] sm:$0xff] }
 0x182   : > { %5616 = vmatprep.mubr.msk.f32.mxu0 %vm6257_vm1, %v6256_v1  ;;  %v7307_v47 = vpop.f32.mrb[74].mxu1 }
 0x183   : > { %v7310_v49 = vadd.f32 %v7198_v4, %v1143_v40  ;;  %5715 = vmatmul.mubr.msk.f32.gmra.mrb[180].mxu1 %vm303_vm2, %v2455_v51  ;;  %v5399_v15 = vpop.f32.mrb[75].mxu1  ;;  %v2130_v4 = vld [vmem:[%s6363_s17 + $0x84] sm:$0xff] }
 0x184   : > { %v1056_v50 = vpop.f32.mrb[76].mxu0  ;;  %5717 = vmatprep.mubr.msk.f32.mxu1 %vm6257_vm1, %v6256_v1  ;;  %v2134_v15 = vld [vmem:[%s6363_s17 + $0xa4] sm:$0xff] }
 0x185   : > { %v1144_v25 = vadd.f32 %v1056_v50, %v6977_v61  ;;  %v5301_v0 = vpop.f32.mrb[77].mxu0  ;;  %5617 = vmatmul.mubr.msk.f32.gmra.mrb[182].mxu0 %vm303_vm2, %v2129_v53  ;;  %v2457_v61 = vld [vmem:[%s6363_s17 + $0xc5] sm:$0xff] }
 0x186   : > { %5619 = vmatprep.mubr.msk.f32.mxu0 %vm6257_vm1, %v6256_v1  ;;  %v7321_v57 = vpop.f32.mrb[76].mxu1 }
 0x187   : > { %v7324_v60 = vadd.f32 %v7211_v44, %v1144_v25  ;;  %5718 = vmatmul.mubr.msk.f32.gmra.mrb[182].mxu1 %vm303_vm2, %v2456_v56  ;;  %v5402_v19 = vpop.f32.mrb[77].mxu1  ;;  %v2131_v44 = vld [vmem:[%s6363_s17 + $0x8c] sm:$0xff] }
 0x188   : > { %v1061_v17 = vpop.f32.mrb[78].mxu0  ;;  %5720 = vmatprep.mubr.msk.f32.mxu1 %vm6257_vm1, %v6256_v1 }
 0x189   : > { %v1145_v29 = vadd.f32 %v1061_v17, %v6987_v11  ;;  %v5304_v14 = vpop.f32.mrb[79].mxu0  ;;  %5620 = vmatmul.mubr.msk.f32.gmra.mrb[184].mxu0 %vm303_vm2, %v2130_v4  ;;  %v2458_v11 = vld [vmem:[%s6363_s17 + $0xcd] sm:$0xff] }
 0x18a   : > { %5622 = vmatprep.mubr.msk.f32.mxu0 %vm6257_vm1, %v6256_v1  ;;  %v7335_v3 = vpop.f32.mrb[78].mxu1  ;;  %v2135_v4 = vld [vmem:[%s6363_s17 + $0xac] sm:$0xff] }
 0x18b   : > { %v7338_v5 = vadd.f32 %v7224_v43, %v1145_v29  ;;  %5721 = vmatmul.mubr.msk.f32.gmra.mrb[184].mxu1 %vm303_vm2, %v2457_v61  ;;  %v5405_v38 = vpop.f32.mrb[79].mxu1  ;;  %v2132_v43 = vld [vmem:[%s6363_s17 + $0x94] sm:$0xff] }
 0x18c   : > { %v1066_v33 = vpop.f32.mrb[80].mxu0  ;;  %5723 = vmatprep.mubr.msk.f32.mxu1 %vm6257_vm1, %v6256_v1 }
 0x18d   : > { %v1146_v8 = vadd.f32 %v1066_v33, %v6997_v6  ;;  %v5307_v30 = vpop.f32.mrb[81].mxu0  ;;  %5623 = vmatmul.mubr.msk.f32.gmra.mrb[186].mxu0 %vm303_vm2, %v2131_v44  ;;  %v2459_v6 = vld [vmem:[%s6363_s17 + $0xd5] sm:$0xff] }
 0x18e   : > { %5625 = vmatprep.mubr.msk.f32.mxu0 %vm6257_vm1, %v6256_v1  ;;  %v7349_v20 = vpop.f32.mrb[80].mxu1 }
 0x18f   : > { %v7352_v62 = vadd.f32 %v7237_v58, %v1146_v8  ;;  %5724 = vmatmul.mubr.msk.f32.gmra.mrb[186].mxu1 %vm303_vm2, %v2458_v11  ;;  %v5408_v46 = vpop.f32.mrb[81].mxu1  ;;  %v2133_v58 = vld [vmem:[%s6363_s17 + $0x9c] sm:$0xff] }
 0x190   : > { %v1071_v22 = vpop.f32.mrb[82].mxu0  ;;  %5726 = vmatprep.mubr.msk.f32.mxu1 %vm6257_vm1, %v6256_v1 }
 0x191   : > { %v1147_v37 = vadd.f32 %v1071_v22, %v7007_v16  ;;  %v5310_v41 = vpop.f32.mrb[83].mxu0  ;;  %5626 = vmatmul.mubr.msk.f32.gmra.mrb[188].mxu0 %vm303_vm2, %v2132_v43  ;;  %v2460_v16 = vld [vmem:[%s6363_s17 + $0xdd] sm:$0xf] }
 0x192   : > { %5628 = vmatprep.mubr.msk.f32.mxu0 %vm6257_vm1, %v6256_v1  ;;  %v7363_v13 = vpop.f32.mrb[82].mxu1 }
 0x193   : > { %v7366_v39 = vadd.f32 %v7251_v54, %v1147_v37  ;;  %5727 = vmatmul.mubr.msk.f32.gmra.mrb[188].mxu1 %vm303_vm2, %v2459_v6  ;;  %v5411_v51 = vpop.f32.mrb[83].mxu1 }
 0x194   : > { %v1076_v40 = vpop.f32.mrb[84].mxu0  ;;  %5729 = vmatprep.mubr.msk.f32.mxu1 %vm6257_vm1, %v6256_v1 }
 0x195   : > { %v1148_v42 = vadd.f32 %v1076_v40, %v7017_v26  ;;  %v5313_v53 = vpop.f32.mrb[85].mxu0  ;;  %5629 = vmatmul.mubr.msk.f32.gmra.mrb[190].mxu0 %vm303_vm2, %v2133_v58 }
 0x196   : > { %5631 = vmatprep.mubr.msk.f32.mxu0 %vm6257_vm1, %v6256_v1  ;;  %v7377_v54 = vpop.f32.mrb[84].mxu1 }
 0x197   : > { %v7380_v50 = vadd.f32 %v7265_v63, %v1148_v42  ;;  %5730 = vmatmul.mubr.msk.f32.gmra.mrb[190].mxu1 %vm303_vm2, %v2460_v16  ;;  %v5414_v56 = vpop.f32.mrb[85].mxu1 }
 0x198   : > { %v1081_v25 = vpop.f32.mrb[86].mxu0 }
 0x199   : > { %v1149_v0 = vadd.f32 %v1081_v25, %v7027_v36  ;;  %v5316_v26 = vpop.f32.mrb[87].mxu0  ;;  %5632 = vmatmul.mubr.msk.f32.gmra.mrb[192].mxu0 %vm303_vm2, %v2134_v15  ;;  %v2136_v36 = vld [vmem:[%s6363_s17 + $0xb4] sm:$0xff] }
 0x19a   : > { %5634 = vmatprep.mubr.msk.f32.mxu0 %vm6257_vm1, %v6256_v1  ;;  %v7388_v19 = vpop.f32.mrb[86].mxu1 }
 0x19b   : > { %v7391_v17 = vadd.f32 %v7279_v35, %v1149_v0  ;;  %v5417_v63 = vpop.f32.mrb[87].mxu1 }
 0x19c   : > { %v1086_v61 = vpop.f32.mrb[88].mxu0 }
 0x19d   : > { %v1150_v29 = vadd.f32 %v1086_v61, %v7038_v23  ;;  %v5319_v14 = vpop.f32.mrb[89].mxu0  ;;  %5635 = vmatmul.mubr.msk.f32.gmra.mrb[194].mxu0 %vm303_vm2, %v2135_v4  ;;  %v2137_v23 = vld [vmem:[%s6363_s17 + $0xbc] sm:$0xff] }
 0x19e   : > { %5637 = vmatprep.mubr.msk.f32.mxu0 %vm6257_vm1, %v6256_v1  ;;  %v7398_v44 = vpop.f32.mrb[88].mxu1 }
 0x19f   : > { %v7401_v38 = vadd.f32 %v7293_v32, %v1150_v29  ;;  %v5420_v35 = vpop.f32.mrb[89].mxu1 }
 0x1a0   : > { %v1091_v33 = vpop.f32.mrb[90].mxu0 }
 0x1a1   : > { %v1151_v11 = vadd.f32 %v1091_v33, %v7048_v52  ;;  %v5322_v8 = vpop.f32.mrb[91].mxu0  ;;  %5638 = vmatmul.mubr.msk.f32.gmra.mrb[196].mxu0 %vm303_vm2, %v2136_v36  ;;  %v2138_v52 = vld [vmem:[%s6363_s17 + $0xc4] sm:$0xff] }
 0x1a2   : > { %5640 = vmatprep.mubr.msk.f32.mxu0 %vm6257_vm1, %v6256_v1  ;;  %v7408_v30 = vpop.f32.mrb[90].mxu1 }
 0x1a3   : > { %v7411_v43 = vadd.f32 %v7307_v47, %v1151_v11  ;;  %v5423_v32 = vpop.f32.mrb[91].mxu1 }
 0x1a4   : > { %v1096_v46 = vpop.f32.mrb[92].mxu0 }
 0x1a5   : > { %v1152_v22 = vadd.f32 %v1096_v46, %v7058_v59  ;;  %v5325_v6 = vpop.f32.mrb[93].mxu0  ;;  %5641 = vmatmul.mubr.msk.f32.gmra.mrb[198].mxu0 %vm303_vm2, %v2137_v23  ;;  %v2139_v59 = vld [vmem:[%s6363_s17 + $0xcc] sm:$0xff] }
 0x1a6   : > { %5643 = vmatprep.mubr.msk.f32.mxu0 %vm6257_vm1, %v6256_v1  ;;  %v7418_v37 = vpop.f32.mrb[92].mxu1 }
 0x1a7   : > { %v7421_v41 = vadd.f32 %v7321_v57, %v1152_v22  ;;  %v5505_v47 = vpop.f32.mrb[93].mxu1 }
 0x1a8   : > { %v1101_v58 = vpop.f32.mrb[94].mxu0 }
 0x1a9   : > { %v1153_v51 = vadd.f32 %v1101_v58, %v7068_v31  ;;  %v5328_v40 = vpop.f32.mrb[95].mxu0  ;;  %5644 = vmatmul.mubr.msk.f32.gmra.mrb[200].mxu0 %vm303_vm2, %v2138_v52  ;;  %v2140_v31 = vld [vmem:[%s6363_s17 + $0xd4] sm:$0xff] }
 0x1aa   : > { %5646 = vmatprep.mubr.msk.f32.mxu0 %vm6257_vm1, %v6256_v1  ;;  %v7428_v16 = vpop.f32.mrb[94].mxu1 }
 0x1ab   : > { %v7431_v42 = vadd.f32 %v7335_v3, %v1153_v51  ;;  %v5508_v57 = vpop.f32.mrb[95].mxu1 }
 0x1ac   : > { %v1106_v53 = vpop.f32.mrb[96].mxu0 }
 0x1ad   : > { %v1154_v15 = vadd.f32 %v1106_v53, %v7078_v10  ;;  %v5331_v56 = vpop.f32.mrb[97].mxu0  ;;  %5647 = vmatmul.mubr.msk.f32.gmra.mrb[202].mxu0 %vm303_vm2, %v2139_v59  ;;  %v2141_v10 = vld [vmem:[%s6363_s17 + $0xdc] sm:$0xf] }
 0x1ae   : > { %5649 = vmatprep.mubr.msk.f32.mxu0 %vm6257_vm1, %v6256_v1  ;;  %v7438_v25 = vpop.f32.mrb[96].mxu1 }
 0x1af   : > { %v7441_v0 = vadd.f32 %v7349_v20, %v1154_v15  ;;  %v5511_v3 = vpop.f32.mrb[97].mxu1 }
 0x1b0   : > { %v1111_v26 = vpop.f32.mrb[98].mxu0 }
 0x1b1   : > { %v1155_v4 = vadd.f32 %v1111_v26, %v7088_v24  ;;  %v5334_v63 = vpop.f32.mrb[99].mxu0  ;;  %5650 = vmatmul.mubr.msk.f32.gmra.mrb[204].mxu0 %vm303_vm2, %v2140_v31  ;;  %v2755_v24 = vld [vmem:[%s6363_s17 + $0x1e] sm:$0xff] }
 0x1b2   : > { %5652 = vmatprep.mubr.msk.f32.mxu0 %vm6257_vm1, %v6256_v1  ;;  %v7448_v61 = vpop.f32.mrb[98].mxu1 }
 0x1b3   : > { %v7451_v29 = vadd.f32 %v7363_v13, %v1155_v4  ;;  %v5514_v20 = vpop.f32.mrb[99].mxu1 }
 0x1b4   : > { %v1116_v14 = vpop.f32.mrb[100].mxu0 }
 0x1b5   : > { %v1156_v36 = vadd.f32 %v1116_v14, %v7098_v21  ;;  %v5337_v35 = vpop.f32.mrb[101].mxu0  ;;  %5653 = vmatmul.mubr.msk.f32.gmra.mrb[206].mxu0 %vm303_vm2, %v2141_v10  ;;  %v2756_v21 = vld [vmem:[%s6363_s17 + $0x26] sm:$0xff] }
 0x1b6   : > { %5734 = vmatprep.mubr.msk.f32.mxu0 %vm6257_vm1, %v6256_v1  ;;  %v7458_v33 = vpop.f32.mrb[100].mxu1 }
 0x1b7   : > { %v7461_v11 = vadd.f32 %v7377_v54, %v1156_v36  ;;  %v5517_v13 = vpop.f32.mrb[101].mxu1 }
 0x1b8   : > { %v1121_v8 = vpop.f32.mrb[102].mxu0 }
 0x1b9   : > { %v1157_v23 = vadd.f32 %v1121_v8, %v7110_v48  ;;  %v5340_v32 = vpop.f32.mrb[103].mxu0  ;;  %5735 = vmatmul.mubr.msk.f32.vlgmr.msra.gmra.mrb[208].mxu0 %vm303_vm2, %v2755_v24  ;;  %v2757_v48 = vld [vmem:[%s6363_s17 + $0x2e] sm:$0xff] }
 0x1ba   : > { %5737 = vmatprep.mubr.msk.f32.mxu0 %vm6257_vm1, %v6256_v1  ;;  %v7468_v46 = vpop.f32.mrb[102].mxu1 }
 0x1bb   : > { %v7471_v22 = vadd.f32 %v7388_v19, %v1157_v23  ;;  %v5520_v54 = vpop.f32.mrb[103].mxu1 }
 0x1bc   : > { %v1126_v6 = vpop.f32.mrb[104].mxu0 }
 0x1bd   : > { %v1158_v52 = vadd.f32 %v1126_v6, %v7122_v55  ;;  %v5343_v47 = vpop.f32.mrb[105].mxu0  ;;  %5738 = vmatmul.mubr.msk.f32.gmra.mrb[210].mxu0 %vm303_vm2, %v2756_v21  ;;  %v2758_v55 = vld [vmem:[%s6363_s17 + $0x36] sm:$0xff] }
 0x1be   : > { %5740 = vmatprep.mubr.msk.f32.mxu0 %vm6257_vm1, %v6256_v1  ;;  %v7478_v58 = vpop.f32.mrb[104].mxu1 }
 0x1bf   : > { %v7481_v51 = vadd.f32 %v7398_v44, %v1158_v52  ;;  %v5523_v19 = vpop.f32.mrb[105].mxu1 }
 0x1c0   : > { %v1131_v40 = vpop.f32.mrb[106].mxu0 }
 0x1c1   : > { %v1159_v59 = vadd.f32 %v1131_v40, %v7134_v7  ;;  %v5346_v57 = vpop.f32.mrb[107].mxu0  ;;  %5741 = vmatmul.mubr.msk.f32.gmra.mrb[212].mxu0 %vm303_vm2, %v2757_v48  ;;  %v2759_v7 = vld [vmem:[%s6363_s17 + $0x3e] sm:$0xff] }
 0x1c2   : > { %5743 = vmatprep.mubr.msk.f32.mxu0 %vm6257_vm1, %v6256_v1  ;;  %v7488_v53 = vpop.f32.mrb[106].mxu1 }
 0x1c3   : > { %v7491_v15 = vadd.f32 %v7408_v30, %v1159_v59  ;;  %v5526_v44 = vpop.f32.mrb[107].mxu1 }
 0x1c4   : > { %v1649_v56 = vpop.f32.mrb[108].mxu0 }
 0x1c5   : > { %v1773_v31 = vadd.f32 %v1649_v56, %v7201_v9  ;;  %v5428_v3 = vpop.f32.mrb[109].mxu0  ;;  %5744 = vmatmul.mubr.msk.f32.gmra.mrb[214].mxu0 %vm303_vm2, %v2758_v55  ;;  %v2760_v9 = vld [vmem:[%s6363_s17 + $0x46] sm:$0xff] }
 0x1c6   : > { %5746 = vmatprep.mubr.msk.f32.mxu0 %vm6257_vm1, %v6256_v1  ;;  %v7498_v26 = vpop.f32.mrb[108].mxu1 }
 0x1c7   : > { %v7501_v4 = vadd.f32 %v7418_v37, %v1773_v31  ;;  %v5529_v30 = vpop.f32.mrb[109].mxu1 }
 0x1c8   : > { %v1654_v63 = vpop.f32.mrb[110].mxu0 }
 0x1c9   : > { %v1774_v10 = vadd.f32 %v1654_v63, %v7214_v12  ;;  %v5431_v20 = vpop.f32.mrb[111].mxu0  ;;  %5747 = vmatmul.mubr.msk.f32.gmra.mrb[216].mxu0 %vm303_vm2, %v2759_v7  ;;  %v2761_v12 = vld [vmem:[%s6363_s17 + $0x4e] sm:$0xff] }
 0x1ca   : > { %5749 = vmatprep.mubr.msk.f32.mxu0 %vm6257_vm1, %v6256_v1  ;;  %v7508_v14 = vpop.f32.mrb[110].mxu1 }
 0x1cb   : > { %v7511_v36 = vadd.f32 %v7428_v16, %v1774_v10  ;;  %v5532_v37 = vpop.f32.mrb[111].mxu1 }
 0x1cc   : > { %v1659_v35 = vpop.f32.mrb[112].mxu0 }
 0x1cd   : > { %v1775_v24 = vadd.f32 %v1659_v35, %v7227_v28  ;;  %v5434_v13 = vpop.f32.mrb[113].mxu0  ;;  %5750 = vmatmul.mubr.msk.f32.gmra.mrb[218].mxu0 %vm303_vm2, %v2760_v9  ;;  %v2762_v28 = vld [vmem:[%s6363_s17 + $0x56] sm:$0xff] }
 0x1ce   : > { %5752 = vmatprep.mubr.msk.f32.mxu0 %vm6257_vm1, %v6256_v1  ;;  %v7518_v8 = vpop.f32.mrb[112].mxu1 }
 0x1cf   : > { %v7521_v23 = vadd.f32 %v7438_v25, %v1775_v24  ;;  %v5535_v16 = vpop.f32.mrb[113].mxu1 }
 0x1d0   : > { %v1664_v32 = vpop.f32.mrb[114].mxu0 }
 0x1d1   : > { %v1776_v21 = vadd.f32 %v1664_v32, %v7240_v45  ;;  %v5437_v54 = vpop.f32.mrb[115].mxu0  ;;  %5753 = vmatmul.mubr.msk.f32.gmra.mrb[220].mxu0 %vm303_vm2, %v2761_v12  ;;  %v2763_v45 = vld [vmem:[%s6363_s17 + $0x5e] sm:$0xff] }
 0x1d2   : > { %5755 = vmatprep.mubr.msk.f32.mxu0 %vm6257_vm1, %v6256_v1  ;;  %v7528_v6 = vpop.f32.mrb[114].mxu1 }
 0x1d3   : > { %v7531_v52 = vadd.f32 %v7448_v61, %v1776_v21  ;;  %v5538_v25 = vpop.f32.mrb[115].mxu1 }
 0x1d4   : > { %v1669_v47 = vpop.f32.mrb[116].mxu0 }
 0x1d5   : > { %v1777_v48 = vadd.f32 %v1669_v47, %v7254_v27  ;;  %v5440_v19 = vpop.f32.mrb[117].mxu0  ;;  %5756 = vmatmul.mubr.msk.f32.gmra.mrb[222].mxu0 %vm303_vm2, %v2762_v28  ;;  %v2764_v27 = vld [vmem:[%s6363_s17 + $0x66] sm:$0xff] }
 0x1d6   : > { %5758 = vmatprep.mubr.msk.f32.mxu0 %vm6257_vm1, %v6256_v1  ;;  %v7538_v40 = vpop.f32.mrb[116].mxu1 }
 0x1d7   : > { %v7541_v59 = vadd.f32 %v7458_v33, %v1777_v48  ;;  %v5541_v61 = vpop.f32.mrb[117].mxu1 }
 0x1d8   : > { %v1674_v57 = vpop.f32.mrb[118].mxu0 }
 0x1d9   : > { %v1778_v55 = vadd.f32 %v1674_v57, %v7268_v2  ;;  %v5443_v44 = vpop.f32.mrb[119].mxu0  ;;  %5759 = vmatmul.mubr.msk.f32.gmra.mrb[224].mxu0 %vm303_vm2, %v2763_v45  ;;  %v2765_v2 = vld [vmem:[%s6363_s17 + $0x6e] sm:$0xff] }
 0x1da   : > { %5761 = vmatprep.mubr.msk.f32.mxu0 %vm6257_vm1, %v6256_v1  ;;  %v7548_v56 = vpop.f32.mrb[118].mxu1 }
 0x1db   : > { %v7551_v31 = vadd.f32 %v7468_v46, %v1778_v55  ;;  %v5544_v33 = vpop.f32.mrb[119].mxu1 }
 0x1dc   : > { %v1679_v3 = vpop.f32.mrb[120].mxu0 }
 0x1dd   : > { %v1779_v7 = vadd.f32 %v1679_v3, %v7282_v18  ;;  %v5446_v30 = vpop.f32.mrb[121].mxu0  ;;  %5762 = vmatmul.mubr.msk.f32.gmra.mrb[226].mxu0 %vm303_vm2, %v2764_v27  ;;  %v2766_v18 = vld [vmem:[%s6363_s17 + $0x76] sm:$0xff] }
 0x1de   : > { %5764 = vmatprep.mubr.msk.f32.mxu0 %vm6257_vm1, %v6256_v1  ;;  %v7558_v63 = vpop.f32.mrb[120].mxu1 }
 0x1df   : > { %v7561_v10 = vadd.f32 %v7478_v58, %v1779_v7  ;;  %v5547_v46 = vpop.f32.mrb[121].mxu1 }
 0x1e0   : > { %v1684_v20 = vpop.f32.mrb[122].mxu0 }
 0x1e1   : > { %v1780_v9 = vadd.f32 %v1684_v20, %v7296_v34  ;;  %v5449_v37 = vpop.f32.mrb[123].mxu0  ;;  %5765 = vmatmul.mubr.msk.f32.gmra.mrb[228].mxu0 %vm303_vm2, %v2765_v2  ;;  %v2767_v34 = vld [vmem:[%s6363_s17 + $0x7e] sm:$0xff] }
 0x1e2   : > { %5767 = vmatprep.mubr.msk.f32.mxu0 %vm6257_vm1, %v6256_v1  ;;  %v7568_v35 = vpop.f32.mrb[122].mxu1 }
 0x1e3   : > { %v7571_v24 = vadd.f32 %v7488_v53, %v1780_v9  ;;  %v5550_v58 = vpop.f32.mrb[123].mxu1 }
 0x1e4   : > { %v1689_v13 = vpop.f32.mrb[124].mxu0 }
 0x1e5   : > { %v1781_v12 = vadd.f32 %v1689_v13, %v7310_v49  ;;  %v5452_v16 = vpop.f32.mrb[125].mxu0  ;;  %5768 = vmatmul.mubr.msk.f32.gmra.mrb[230].mxu0 %vm303_vm2, %v2766_v18  ;;  %v2768_v49 = vld [vmem:[%s6363_s17 + $0x86] sm:$0xff] }
 0x1e6   : > { %5770 = vmatprep.mubr.msk.f32.mxu0 %vm6257_vm1, %v6256_v1  ;;  %v7578_v32 = vpop.f32.mrb[124].mxu1 }
 0x1e7   : > { %v7581_v21 = vadd.f32 %v7498_v26, %v1781_v12  ;;  %v5553_v53 = vpop.f32.mrb[125].mxu1 }
 0x1e8   : > { %v1694_v54 = vpop.f32.mrb[126].mxu0 }
 0x1e9   : > { %v1782_v28 = vadd.f32 %v1694_v54, %v7324_v60  ;;  %v5455_v25 = vpop.f32.mrb[127].mxu0  ;;  %5771 = vmatmul.mubr.msk.f32.gmra.mrb[232].mxu0 %vm303_vm2, %v2767_v34  ;;  %v2769_v60 = vld [vmem:[%s6363_s17 + $0x8e] sm:$0xff] }
 0x1ea   : > { %5773 = vmatprep.mubr.msk.f32.mxu0 %vm6257_vm1, %v6256_v1  ;;  %v7588_v47 = vpop.f32.mrb[126].mxu1 }
 0x1eb   : > { %v7591_v48 = vadd.f32 %v7508_v14, %v1782_v28  ;;  %v5556_v26 = vpop.f32.mrb[127].mxu1 }
 0x1ec   : > { %v1699_v19 = vpop.f32.mrb[128].mxu0 }
 0x1ed   : > { %v1783_v45 = vadd.f32 %v1699_v19, %v7338_v5  ;;  %v5458_v61 = vpop.f32.mrb[129].mxu0  ;;  %5774 = vmatmul.mubr.msk.f32.gmra.mrb[234].mxu0 %vm303_vm2, %v2768_v49  ;;  %v2770_v5 = vld [vmem:[%s6363_s17 + $0x96] sm:$0xff] }
 0x1ee   : > { %5776 = vmatprep.mubr.msk.f32.mxu0 %vm6257_vm1, %v6256_v1  ;;  %v7598_v57 = vpop.f32.mrb[128].mxu1 }
 0x1ef   : > { %v7601_v55 = vadd.f32 %v7518_v8, %v1783_v45  ;;  %v5559_v14 = vpop.f32.mrb[129].mxu1 }
 0x1f0   : > { %v1704_v44 = vpop.f32.mrb[130].mxu0 }
 0x1f1   : > { %v1784_v27 = vadd.f32 %v1704_v44, %v7352_v62  ;;  %v5461_v33 = vpop.f32.mrb[131].mxu0  ;;  %5777 = vmatmul.mubr.msk.f32.gmra.mrb[236].mxu0 %vm303_vm2, %v2769_v60  ;;  %v2771_v62 = vld [vmem:[%s6363_s17 + $0x9e] sm:$0xff] }
 0x1f2   : > { %5779 = vmatprep.mubr.msk.f32.mxu0 %vm6257_vm1, %v6256_v1  ;;  %v7608_v3 = vpop.f32.mrb[130].mxu1 }
 0x1f3   : > { %v7611_v7 = vadd.f32 %v7528_v6, %v1784_v27  ;;  %v5562_v8 = vpop.f32.mrb[131].mxu1 }
 0x1f4   : > { %v1709_v30 = vpop.f32.mrb[132].mxu0 }
 0x1f5   : > { %v1785_v2 = vadd.f32 %v1709_v30, %v7366_v39  ;;  %v5464_v46 = vpop.f32.mrb[133].mxu0  ;;  %5780 = vmatmul.mubr.msk.f32.gmra.mrb[238].mxu0 %vm303_vm2, %v2770_v5  ;;  %v2772_v39 = vld [vmem:[%s6363_s17 + $0xa6] sm:$0xff] }
 0x1f6   : > { %5782 = vmatprep.mubr.msk.f32.mxu0 %vm6257_vm1, %v6256_v1  ;;  %v7618_v20 = vpop.f32.mrb[132].mxu1 }
 0x1f7   : > { %v7621_v9 = vadd.f32 %v7538_v40, %v1785_v2  ;;  %v5565_v6 = vpop.f32.mrb[133].mxu1 }
 0x1f8   : > { %v1714_v37 = vpop.f32.mrb[134].mxu0 }
 0x1f9   : > { %v1786_v18 = vadd.f32 %v1714_v37, %v7380_v50  ;;  %v5467_v58 = vpop.f32.mrb[135].mxu0  ;;  %5783 = vmatmul.mubr.msk.f32.gmra.mrb[240].mxu0 %vm303_vm2, %v2771_v62  ;;  %v2773_v50 = vld [vmem:[%s6363_s17 + $0xae] sm:$0xff] }
 0x1fa   : > { %5785 = vmatprep.mubr.msk.f32.mxu0 %vm6257_vm1, %v6256_v1  ;;  %v7628_v13 = vpop.f32.mrb[134].mxu1 }
 0x1fb   : > { %v7631_v12 = vadd.f32 %v7548_v56, %v1786_v18  ;;  %v5568_v40 = vpop.f32.mrb[135].mxu1 }
 0x1fc   : > { %v1719_v16 = vpop.f32.mrb[136].mxu0 }
 0x1fd   : > { %v1787_v34 = vadd.f32 %v1719_v16, %v7391_v17  ;;  %v5470_v53 = vpop.f32.mrb[137].mxu0  ;;  %5786 = vmatmul.mubr.msk.f32.gmra.mrb[242].mxu0 %vm303_vm2, %v2772_v39  ;;  %v2774_v17 = vld [vmem:[%s6363_s17 + $0xb6] sm:$0xff] }
 0x1fe   : > { %5788 = vmatprep.mubr.msk.f32.mxu0 %vm6257_vm1, %v6256_v1  ;;  %v7638_v54 = vpop.f32.mrb[136].mxu1 }
 0x1ff   : > { %v7641_v28 = vadd.f32 %v7558_v63, %v1787_v34  ;;  %v5571_v56 = vpop.f32.mrb[137].mxu1 }
 0x200   : > { %v1724_v25 = vpop.f32.mrb[138].mxu0 }
 0x201   : > { %v1788_v49 = vadd.f32 %v1724_v25, %v7401_v38  ;;  %v5473_v26 = vpop.f32.mrb[139].mxu0  ;;  %5789 = vmatmul.mubr.msk.f32.gmra.mrb[244].mxu0 %vm303_vm2, %v2773_v50  ;;  %v2775_v38 = vld [vmem:[%s6363_s17 + $0xbe] sm:$0xff] }
 0x202   : > { %5791 = vmatprep.mubr.msk.f32.mxu0 %vm6257_vm1, %v6256_v1  ;;  %v7648_v19 = vpop.f32.mrb[138].mxu1 }
 0x203   : > { %v7651_v45 = vadd.f32 %v7568_v35, %v1788_v49  ;;  %v5574_v63 = vpop.f32.mrb[139].mxu1 }
 0x204   : > { %v1729_v61 = vpop.f32.mrb[140].mxu0  ;;  %v6258_v63 = vmov 0.0|0.0  }
 0x205   : > { %v1789_v60 = vadd.f32 %v1729_v61, %v7411_v43  ;;  %v5476_v14 = vpop.f32.mrb[141].mxu0  ;;  %5792 = vmatmul.mubr.msk.f32.gmra.mrb[246].mxu0 %vm303_vm2, %v2774_v17  ;;  %v2776_v43 = vld [vmem:[%s6363_s17 + $0xc6] sm:$0xff]  ;;  %5985 = vmatprep.subr.bf16.mxu1 %v6258_v63 }
 0x206   : > { %5794 = vmatprep.mubr.msk.f32.mxu0 %vm6257_vm1, %v6256_v1  ;;  %v7658_v44 = vpop.f32.mrb[140].mxu1 }
 0x207   : > { %v7661_v27 = vadd.f32 %v7578_v32, %v1789_v60  ;;  %v5577_v35 = vpop.f32.mrb[141].mxu1 }
 0x208   : > { %v1734_v33 = vpop.f32.mrb[142].mxu0 }
 0x209   : > { %v1790_v5 = vadd.f32 %v1734_v33, %v7421_v41  ;;  %v5479_v8 = vpop.f32.mrb[143].mxu0  ;;  %5795 = vmatmul.mubr.msk.f32.gmra.mrb[248].mxu0 %vm303_vm2, %v2775_v38  ;;  %v2777_v41 = vld [vmem:[%s6363_s17 + $0xce] sm:$0xff] }
 0x20a   : > { %5797 = vmatprep.mubr.msk.f32.mxu0 %vm6257_vm1, %v6256_v1  ;;  %v2606_v30 = vpop.f32.mrb[142].mxu1 }
 0x20b   : > { %v7669_v2 = vadd.f32 %v7588_v47, %v1790_v5  ;;  %v5659_v46 = vpop.f32.mrb[143].mxu1 }
 0x20c   : > { %v1739_v32 = vpop.f32.mrb[144].mxu0 }
 0x20d   : > { %v1791_v62 = vadd.f32 %v1739_v32, %v7431_v42  ;;  %v5482_v6 = vpop.f32.mrb[145].mxu0  ;;  %5798 = vmatmul.mubr.msk.f32.gmra.mrb[250].mxu0 %vm303_vm2, %v2776_v43  ;;  %v2778_v42 = vld [vmem:[%s6363_s17 + $0xd6] sm:$0xff] }
 0x20e   : > { %5800 = vmatprep.mubr.msk.f32.mxu0 %vm6257_vm1, %v6256_v1  ;;  %v2611_v37 = vpop.f32.mrb[144].mxu1 }
 0x20f   : > { %v7677_v18 = vadd.f32 %v7598_v57, %v1791_v62  ;;  %v5662_v58 = vpop.f32.mrb[145].mxu1 }
 0x210   : > { %v1744_v47 = vpop.f32.mrb[146].mxu0 }
 0x211   : > { %v1792_v39 = vadd.f32 %v1744_v47, %v7441_v0  ;;  %v5485_v40 = vpop.f32.mrb[147].mxu0  ;;  %5801 = vmatmul.mubr.msk.f32.gmra.mrb[252].mxu0 %vm303_vm2, %v2777_v41  ;;  %v2779_v0 = vld [vmem:[%s6363_s17 + $0xde] sm:$0xf]  ;;  %s6198_s17 = scalar_lea.vmem %s6197_s16, 32 }
 0x212   : > { %5803 = vmatprep.mubr.msk.f32.mxu0 %vm6257_vm1, %v6256_v1  ;;  %v2616_v16 = vpop.f32.mrb[146].mxu1  ;;  %p6200_p1 = scmp.lt.s32.totalorder %s6198_s17, %s6192_s15 }
 0x213   : > { %v7685_v34 = vadd.f32 %v7608_v3, %v1792_v39  ;;  %v5665_v53 = vpop.f32.mrb[147].mxu1 }
 0x214   : > { %v1749_v50 = vpop.f32.mrb[148].mxu0  ;;  %p6201_p2 = por %p6200_p1, %p6199_p0 }
 0x215   : > { %v1793_v57 = vadd.f32 %v1749_v50, %v7451_v29  ;;  %v5488_v56 = vpop.f32.mrb[149].mxu0  ;;  %5804 = vmatmul.mubr.msk.f32.gmra.mrb[254].mxu0 %vm303_vm2, %v2778_v42 }
 0x216   : > { %5806 = vmatprep.mubr.msk.f32.mxu0 %vm6257_vm1, %v6256_v1  ;;  %v2621_v25 = vpop.f32.mrb[148].mxu1  ;;  %p6202_p3 = pnand %p6201_p2, %p6195_p13 }
 0x217   : > { %v7693_v49 = vadd.f32 %v7618_v20, %v1793_v57  ;;  %v5668_v26 = vpop.f32.mrb[149].mxu1 }
 0x218   : > { %v1754_v17 = vpop.f32.mrb[150].mxu0 }
 0x219   : > { %v1794_v3 = vadd.f32 %v1754_v17, %v7461_v11  ;;  %v5491_v61 = vpop.f32.mrb[151].mxu0  ;;  %5807 = vmatmul.mubr.msk.f32.gmra.mrb[0].mxu0 %vm303_vm2, %v2779_v0 }
 0x21a   : > { %v2626_v29 = vpop.f32.mrb[150].mxu1 }
 0x21b   : > { %v7699_v60 = vadd.f32 %v7628_v13, %v1794_v3  ;;  %v5671_v14 = vpop.f32.mrb[151].mxu1 }
 0x21c   : > { %v1759_v38 = vpop.f32.mrb[152].mxu0 }
 0x21d   : > { %v1795_v35 = vadd.f32 %v1759_v38, %v7471_v22  ;;  %v5494_v20 = vpop.f32.mrb[153].mxu0 }
 0x21e   : > { %v2631_v33 = vpop.f32.mrb[152].mxu1 }
 0x21f   : > { %v7703_v5 = vadd.f32 %v7638_v54, %v1795_v35  ;;  %v5674_v8 = vpop.f32.mrb[153].mxu1 }
 0x220   : > { %v1764_v43 = vpop.f32.mrb[154].mxu0 }
 0x221   : > { %v1796_v11 = vadd.f32 %v1764_v43, %v7481_v51  ;;  %v5497_v46 = vpop.f32.mrb[155].mxu0 }
 0x222   : > { %v2636_v32 = vpop.f32.mrb[154].mxu1 }
 0x223   : > { %v7707_v62 = vadd.f32 %v7648_v19, %v1796_v11  ;;  %v5677_v13 = vpop.f32.mrb[155].mxu1 }
 0x224   : > { %v1769_v6 = vpop.f32.mrb[156].mxu0 }
 0x225   : > { %v1797_v41 = vadd.f32 %v1769_v6, %v7491_v15  ;;  %v5500_v58 = vpop.f32.mrb[157].mxu0 }
 0x226   : > { %v2641_v22 = vpop.f32.mrb[156].mxu1 }
 0x227   : > { %v7711_v47 = vadd.f32 %v7658_v44, %v1797_v41  ;;  %v5680_v54 = vpop.f32.mrb[157].mxu1 }
 0x228   : > { %v2287_v39 = vpop.f32.mrb[158].mxu0 }
 0x229   : > { %v2411_v40 = vadd.f32 %v2287_v39, %v7501_v4  ;;  %v5582_v42 = vpop.f32.mrb[159].mxu0 }
 0x22a   : > { %v2646_v51 = vpop.f32.mrb[158].mxu1 }
 0x22b   : > { %v7714_v53 = vadd.f32 %v2606_v30, %v2411_v40  ;;  %v5683_v50 = vpop.f32.mrb[159].mxu1 }
 0x22c   : > { %v2292_v19 = vpop.f32.mrb[160].mxu0 }
 0x22d   : > { %v2412_v57 = vadd.f32 %v2292_v19, %v7511_v36  ;;  %v5585_v56 = vpop.f32.mrb[161].mxu0 }
 0x22e   : > { %v2651_v0 = vpop.f32.mrb[160].mxu1 }
 0x22f   : > { %v7717_v15 = vadd.f32 %v2611_v37, %v2412_v57  ;;  %v5686_v26 = vpop.f32.mrb[161].mxu1 }
 0x230   : > { %v2297_v17 = vpop.f32.mrb[162].mxu0 }
 0x231   : > { %v2413_v44 = vadd.f32 %v2297_v17, %v7521_v23  ;;  %v5588_v3 = vpop.f32.mrb[163].mxu0 }
 0x232   : > { %v2656_v61 = vpop.f32.mrb[162].mxu1 }
 0x233   : > { %v7720_v14 = vadd.f32 %v2616_v16, %v2413_v44  ;;  %v5689_v4 = vpop.f32.mrb[163].mxu1 }
 0x234   : > { %v2302_v38 = vpop.f32.mrb[164].mxu0 }
 0x235   : > { %v2414_v30 = vadd.f32 %v2302_v38, %v7531_v52  ;;  %v5591_v35 = vpop.f32.mrb[165].mxu0 }
 0x236   : > { %v2661_v20 = vpop.f32.mrb[164].mxu1 }
 0x237   : > { %v7723_v8 = vadd.f32 %v2621_v25, %v2414_v30  ;;  %v5692_v36 = vpop.f32.mrb[165].mxu1 }
 0x238   : > { %v2307_v43 = vpop.f32.mrb[166].mxu0 }
 0x239   : > { %v2415_v37 = vadd.f32 %v2307_v43, %v7541_v59  ;;  %v5594_v11 = vpop.f32.mrb[167].mxu0 }
 0x23a   : > { %v2666_v46 = vpop.f32.mrb[166].mxu1 }
 0x23b   : > { %v7726_v13 = vadd.f32 %v2626_v29, %v2415_v37  ;;  %v5695_v23 = vpop.f32.mrb[167].mxu1 }
 0x23c   : > { %v2312_v6 = vpop.f32.mrb[168].mxu0 }
 0x23d   : > { %v2416_v16 = vadd.f32 %v2312_v6, %v7551_v31  ;;  %v5597_v41 = vpop.f32.mrb[169].mxu0 }
 0x23e   : > { %v2671_v58 = vpop.f32.mrb[168].mxu1 }
 0x23f   : > { %v7729_v54 = vadd.f32 %v2631_v33, %v2416_v16  ;;  %v5698_v52 = vpop.f32.mrb[169].mxu1 }
 0x240   : > { %v2317_v39 = vpop.f32.mrb[170].mxu0 }
 0x241   : > { %v2417_v25 = vadd.f32 %v2317_v39, %v7561_v10  ;;  %v5600_v40 = vpop.f32.mrb[171].mxu0 }
 0x242   : > { %v2676_v42 = vpop.f32.mrb[170].mxu1 }
 0x243   : > { %v7732_v50 = vadd.f32 %v2636_v32, %v2417_v25  ;;  %v5701_v59 = vpop.f32.mrb[171].mxu1 }
 0x244   : > { %v2322_v19 = vpop.f32.mrb[172].mxu0 }
 0x245   : > { %v2418_v29 = vadd.f32 %v2322_v19, %v7571_v24  ;;  %v5603_v57 = vpop.f32.mrb[173].mxu0 }
 0x246   : > { %v2681_v56 = vpop.f32.mrb[172].mxu1 }
 0x247   : > { %v7735_v26 = vadd.f32 %v2641_v22, %v2418_v29  ;;  %v5704_v31 = vpop.f32.mrb[173].mxu1 }
 0x248   : > { %v2327_v17 = vpop.f32.mrb[174].mxu0 }
 0x249   : > { %v2419_v33 = vadd.f32 %v2327_v17, %v7581_v21  ;;  %v5606_v44 = vpop.f32.mrb[175].mxu0 }
 0x24a   : > { %v2686_v3 = vpop.f32.mrb[174].mxu1 }
 0x24b   : > { %v7738_v4 = vadd.f32 %v2646_v51, %v2419_v33  ;;  %v5707_v10 = vpop.f32.mrb[175].mxu1 }
 0x24c   : > { %v2332_v38 = vpop.f32.mrb[176].mxu0 }
 0x24d   : > { %v2420_v32 = vadd.f32 %v2332_v38, %v7591_v48  ;;  %v5609_v30 = vpop.f32.mrb[177].mxu0 }
 0x24e   : > { %v2691_v35 = vpop.f32.mrb[176].mxu1 }
 0x24f   : > { %v7741_v36 = vadd.f32 %v2651_v0, %v2420_v32  ;;  %v5710_v24 = vpop.f32.mrb[177].mxu1 }
 0x250   : > { %v2337_v43 = vpop.f32.mrb[178].mxu0 }
 0x251   : > { %v2421_v22 = vadd.f32 %v2337_v43, %v7601_v55  ;;  %v5612_v37 = vpop.f32.mrb[179].mxu0 }
 0x252   : > { %v2696_v11 = vpop.f32.mrb[178].mxu1 }
 0x253   : > { %v7744_v23 = vadd.f32 %v2656_v61, %v2421_v22  ;;  %v5713_v21 = vpop.f32.mrb[179].mxu1 }
 0x254   : > { %v2342_v6 = vpop.f32.mrb[180].mxu0 }
 0x255   : > { %v2422_v51 = vadd.f32 %v2342_v6, %v7611_v7  ;;  %v5615_v16 = vpop.f32.mrb[181].mxu0 }
 0x256   : > { %v2701_v41 = vpop.f32.mrb[180].mxu1 }
 0x257   : > { %v7747_v52 = vadd.f32 %v2661_v20, %v2422_v51  ;;  %v5716_v48 = vpop.f32.mrb[181].mxu1 }
 0x258   : > { %v2347_v39 = vpop.f32.mrb[182].mxu0 }
 0x259   : > { %v2423_v0 = vadd.f32 %v2347_v39, %v7621_v9  ;;  %v5618_v25 = vpop.f32.mrb[183].mxu0 }
 0x25a   : > { %v2706_v40 = vpop.f32.mrb[182].mxu1 }
 0x25b   : > { %v7750_v59 = vadd.f32 %v2666_v46, %v2423_v0  ;;  %v5719_v55 = vpop.f32.mrb[183].mxu1 }
 0x25c   : > { %v2352_v19 = vpop.f32.mrb[184].mxu0 }
 0x25d   : > { %v2424_v61 = vadd.f32 %v2352_v19, %v7631_v12  ;;  %v5621_v29 = vpop.f32.mrb[185].mxu0 }
 0x25e   : > { %v2711_v57 = vpop.f32.mrb[184].mxu1 }
 0x25f   : > { %v7753_v31 = vadd.f32 %v2671_v58, %v2424_v61  ;;  %v5722_v7 = vpop.f32.mrb[185].mxu1 }
 0x260   : > { %v2357_v17 = vpop.f32.mrb[186].mxu0 }
 0x261   : > { %v2425_v20 = vadd.f32 %v2357_v17, %v7641_v28  ;;  %v5624_v33 = vpop.f32.mrb[187].mxu0 }
 0x262   : > { %v2716_v44 = vpop.f32.mrb[186].mxu1 }
 0x263   : > { %v7756_v10 = vadd.f32 %v2676_v42, %v2425_v20  ;;  %v5725_v9 = vpop.f32.mrb[187].mxu1 }
 0x264   : > { %v2362_v38 = vpop.f32.mrb[188].mxu0 }
 0x265   : > { %v2426_v46 = vadd.f32 %v2362_v38, %v7651_v45  ;;  %v5627_v32 = vpop.f32.mrb[189].mxu0 }
 0x266   : > { %v2721_v30 = vpop.f32.mrb[188].mxu1 }
 0x267   : > { %v7759_v24 = vadd.f32 %v2681_v56, %v2426_v46  ;;  %v5728_v12 = vpop.f32.mrb[189].mxu1 }
 0x268   : > { %v2367_v43 = vpop.f32.mrb[190].mxu0 }
 0x269   : > { %v2427_v58 = vadd.f32 %v2367_v43, %v7661_v27  ;;  %v5630_v22 = vpop.f32.mrb[191].mxu0  ;;  %v3132_v27 = vld [vmem:[%s8215_s3 + $0x8] sm:$0xff] }
 0x26a   : > { %v2726_v37 = vpop.f32.mrb[190].mxu1  ;;  %4781 = vmatprep.mubr.msk.f32.mxu1 %vm3135_vm3, %v3132_v27 }
 0x26b   : > { %v7762_v21 = vadd.f32 %v2686_v3, %v2427_v58  ;;  %v5731_v28 = vpop.f32.mrb[191].mxu1 }
 0x26c   : > { %v2372_v6 = vpop.f32.mrb[192].mxu0 }
 0x26d   : > { %v2428_v42 = vadd.f32 %v2372_v6, %v7669_v2  ;;  %v5633_v51 = vpop.f32.mrb[193].mxu0 }
 0x26f   : > { %v7765_v16 = vadd.f32 %v2691_v35, %v2428_v42 }
 0x270   : > { %v2377_v45 = vpop.f32.mrb[194].mxu0 }
 0x271   : > { %v2429_v48 = vadd.f32 %v2377_v45, %v7677_v18  ;;  %v5636_v56 = vpop.f32.mrb[195].mxu0 }
 0x273   : > { %v7768_v39 = vadd.f32 %v2696_v11, %v2429_v48 }
 0x274   : > { %v2382_v0 = vpop.f32.mrb[196].mxu0 }
 0x275   : > { %v2430_v3 = vadd.f32 %v2382_v0, %v7685_v34  ;;  %v5639_v25 = vpop.f32.mrb[197].mxu0 }
 0x277   : > { %v7775_v2 = vadd.f32 %v2701_v41, %v2430_v3 }
 0x278   : > { %v2387_v35 = vpop.f32.mrb[198].mxu0 }
 0x279   : > { %v2431_v55 = vadd.f32 %v2387_v35, %v7693_v49  ;;  %v5642_v18 = vpop.f32.mrb[199].mxu0 }
 0x27b   : > { %v7778_v19 = vadd.f32 %v2706_v40, %v2431_v55 }
 0x27c   : > { %v2392_v11 = vpop.f32.mrb[200].mxu0 }
 0x27d   : > { %v2432_v61 = vadd.f32 %v2392_v11, %v7699_v60  ;;  %v5645_v29 = vpop.f32.mrb[201].mxu0 }
 0x27f   : > { %v7781_v7 = vadd.f32 %v2711_v57, %v2432_v61 }
 0x280   : > { %v2397_v17 = vpop.f32.mrb[202].mxu0 }
 0x281   : > { %v2433_v34 = vadd.f32 %v2397_v17, %v7703_v5  ;;  %v5648_v20 = vpop.f32.mrb[203].mxu0  ;;  %v7796_v5 = vld [vmem:[%s8214_s2] ss:$0 sm:$0xff] }
 0x283   : > { %v7784_v33 = vadd.f32 %v2716_v44, %v2433_v34 }
 0x284   : > { %v2402_v41 = vpop.f32.mrb[204].mxu0 }
 0x285   : > { %v2434_v9 = vadd.f32 %v2402_v41, %v7707_v62  ;;  %v5651_v38 = vpop.f32.mrb[205].mxu0 }
 0x287   : > { %v7787_v49 = vadd.f32 %v2721_v30, %v2434_v9 }
 0x288   : > { %v2407_v40 = vpop.f32.mrb[206].mxu0 }
 0x289   : > { %v2435_v46 = vadd.f32 %v2407_v40, %v7711_v47  ;;  %v5654_v32 = vpop.f32.mrb[207].mxu0 }
 0x28b   : > { %v7790_v60 = vadd.f32 %v2726_v37, %v2435_v46 }
 0x28c   : > { %v2925_v57 = vpop.f32.mrb[208].mxu0 }
 0x28d   : > { %v3049_v12 = vadd.f32 %v2925_v57, %v7714_v53  ;;  %v5736_v43 = vpop.f32.mrb[209].mxu0 }
 0x28f   : > { %v3081_v62 = vadd.f32 %v7796_v5, %v3049_v12 }
 0x290   : > { %v2930_v44 = vpop.f32.mrb[210].mxu0 }
 0x291   : > { %v3050_v30 = vadd.f32 %v2930_v44, %v7717_v15  ;;  %v5739_v58 = vpop.f32.mrb[211].mxu0  ;;  %v3106_v37 = vmax.f32 %v3081_v62, 0.0 }
 0x293   : > { %v3082_v47 = vadd.f32 %v7796_v5, %v3050_v30 }
 0x294   : > { %v2935_v22 = vpop.f32.mrb[212].mxu0 }
 0x295   : > { %v3107_v28 = vmax.f32 %v3082_v47, 0.0  ;;  %v3051_v6 = vadd.f32 %v2935_v22, %v7720_v14  ;;  %v5742_v53 = vpop.f32.mrb[213].mxu0 }
 0x297   : > { %v5986_v42 = vpack.c.bf16 %v3107_v28, %v3106_v37  ;;  %v3083_v45 = vadd.f32 %v7796_v5, %v3051_v6 }
 0x298   : > { %v2940_v51 = vpop.f32.mrb[214].mxu0 }
 0x299   : > { %v3052_v48 = vadd.f32 %v2940_v51, %v7723_v8  ;;  %v5745_v56 = vpop.f32.mrb[215].mxu0  ;;  %5987 = vmatpush1.bf16.msra.mxu1 %v5986_v42  ;;  %v3108_v27 = vmax.f32 %v3083_v45, 0.0 }
 0x29a   : > { %5988 = vmatprep.subr.bf16.mxu1 %v6258_v63 }
 0x29b   : > { %v3084_v15 = vadd.f32 %v7796_v5, %v3052_v48 }
 0x29c   : > { %v2945_v0 = vpop.f32.mrb[216].mxu0 }
 0x29d   : > { %v3109_v3 = vmax.f32 %v3084_v15, 0.0  ;;  %v3053_v25 = vadd.f32 %v2945_v0, %v7726_v13  ;;  %v5748_v35 = vpop.f32.mrb[217].mxu0 }
 0x29f   : > { %v5989_v14 = vpack.c.bf16 %v3109_v3, %v3108_v27  ;;  %v3085_v18 = vadd.f32 %v7796_v5, %v3053_v25 }
 0x2a0   : > { %v2950_v55 = vpop.f32.mrb[218].mxu0 }
 0x2a1   : > { %v3054_v11 = vadd.f32 %v2950_v55, %v7729_v54  ;;  %v5751_v61 = vpop.f32.mrb[219].mxu0  ;;  %5990 = vmatpush1.bf16.msra.mxu1 %v5989_v14  ;;  %v3110_v17 = vmax.f32 %v3085_v18, 0.0 }
 0x2a2   : > { %5991 = vmatprep.subr.bf16.mxu1 %v6258_v63 }
 0x2a3   : > { %v3086_v8 = vadd.f32 %v7796_v5, %v3054_v11 }
 0x2a4   : > { %v2955_v29 = vpop.f32.mrb[220].mxu0 }
 0x2a5   : > { %v3111_v34 = vmax.f32 %v3086_v8, 0.0  ;;  %v3055_v20 = vadd.f32 %v2955_v29, %v7732_v50  ;;  %v5754_v41 = vpop.f32.mrb[221].mxu0 }
 0x2a7   : > { %v5992_v13 = vpack.c.bf16 %v3111_v34, %v3110_v17  ;;  %v3087_v38 = vadd.f32 %v7796_v5, %v3055_v20 }
 0x2a8   : > { %v2960_v9 = vpop.f32.mrb[222].mxu0 }
 0x2a9   : > { %v3056_v40 = vadd.f32 %v2960_v9, %v7735_v26  ;;  %v5757_v46 = vpop.f32.mrb[223].mxu0  ;;  %5993 = vmatpush1.bf16.msra.mxu1 %v5992_v13  ;;  %v3112_v57 = vmax.f32 %v3087_v38, 0.0 }
 0x2aa   : > { %5994 = vmatprep.subr.bf16.mxu1 %v6258_v63 }
 0x2ab   : > { %v3088_v54 = vadd.f32 %v7796_v5, %v3056_v40 }
 0x2ac   : > { %v2965_v32 = vpop.f32.mrb[224].mxu0 }
 0x2ad   : > { %v3113_v12 = vmax.f32 %v3088_v54, 0.0  ;;  %v3057_v43 = vadd.f32 %v2965_v32, %v7738_v4  ;;  %v5760_v44 = vpop.f32.mrb[225].mxu0 }
 0x2af   : > { %v5995_v50 = vpack.c.bf16 %v3113_v12, %v3112_v57  ;;  %v3089_v30 = vadd.f32 %v7796_v5, %v3057_v43 }
 0x2b0   : > { %v2970_v62 = vpop.f32.mrb[226].mxu0 }
 0x2b1   : > { %v3058_v58 = vadd.f32 %v2970_v62, %v7741_v36  ;;  %v5763_v47 = vpop.f32.mrb[227].mxu0  ;;  %5996 = vmatpush1.bf16.msra.mxu1 %v5995_v50  ;;  %v3114_v37 = vmax.f32 %v3089_v30, 0.0 }
 0x2b2   : > { %5997 = vmatprep.subr.bf16.mxu1 %v6258_v63 }
 0x2b3   : > { %v3090_v26 = vadd.f32 %v7796_v5, %v3058_v58 }
 0x2b4   : > { %v2975_v22 = vpop.f32.mrb[228].mxu0 }
 0x2b5   : > { %v3115_v28 = vmax.f32 %v3090_v26, 0.0  ;;  %v3059_v6 = vadd.f32 %v2975_v22, %v7744_v23  ;;  %v5766_v53 = vpop.f32.mrb[229].mxu0 }
 0x2b7   : > { %v5998_v4 = vpack.c.bf16 %v3115_v28, %v3114_v37  ;;  %v3091_v51 = vadd.f32 %v7796_v5, %v3059_v6 }
 0x2b8   : > { %v2980_v42 = vpop.f32.mrb[230].mxu0 }
 0x2b9   : > { %v3060_v45 = vadd.f32 %v2980_v42, %v7747_v52  ;;  %v5769_v48 = vpop.f32.mrb[231].mxu0  ;;  %5999 = vmatpush1.bf16.msra.mxu1 %v5998_v4  ;;  %v3116_v15 = vmax.f32 %v3091_v51, 0.0 }
 0x2ba   : > { %6000 = vmatprep.subr.bf16.mxu1 %v6258_v63 }
 0x2bb   : > { %v3092_v36 = vadd.f32 %v7796_v5, %v3060_v45 }
 0x2bc   : > { %v2985_v56 = vpop.f32.mrb[232].mxu0 }
 0x2bd   : > { %v3117_v0 = vmax.f32 %v3092_v36, 0.0  ;;  %v3061_v27 = vadd.f32 %v2985_v56, %v7750_v59  ;;  %v5772_v3 = vpop.f32.mrb[233].mxu0 }
 0x2bf   : > { %v6001_v23 = vpack.c.bf16 %v3117_v0, %v3116_v15  ;;  %v3093_v35 = vadd.f32 %v7796_v5, %v3061_v27 }
 0x2c0   : > { %v2990_v25 = vpop.f32.mrb[234].mxu0 }
 0x2c1   : > { %v3062_v14 = vadd.f32 %v2990_v25, %v7753_v31  ;;  %v5775_v55 = vpop.f32.mrb[235].mxu0  ;;  %6002 = vmatpush1.bf16.msra.mxu1 %v6001_v23  ;;  %v3118_v11 = vmax.f32 %v3093_v35, 0.0 }
 0x2c2   : > { %6003 = vmatprep.subr.bf16.mxu1 %v6258_v63 }
 0x2c3   : > { %v3094_v52 = vadd.f32 %v7796_v5, %v3062_v14 }
 0x2c4   : > { %v2995_v18 = vpop.f32.mrb[236].mxu0 }
 0x2c5   : > { %v3119_v61 = vmax.f32 %v3094_v52, 0.0  ;;  %v3063_v8 = vadd.f32 %v2995_v18, %v7756_v10  ;;  %v5778_v29 = vpop.f32.mrb[237].mxu0 }
 0x2c7   : > { %v6004_v59 = vpack.c.bf16 %v3119_v61, %v3118_v11  ;;  %v3095_v34 = vadd.f32 %v7796_v5, %v3063_v8  ;;  %v3221_v8 = vld [vmem:[%s8216_s4] sm:$0xff] }
 0x2c8   : > { %v3000_v17 = vpop.f32.mrb[238].mxu0 }
 0x2c9   : > { %v3064_v20 = vadd.f32 %v3000_v17, %v7759_v24  ;;  %v5781_v41 = vpop.f32.mrb[239].mxu0  ;;  %6005 = vmatpush1.bf16.msra.mxu1 %v6004_v59  ;;  %v3120_v9 = vmax.f32 %v3095_v34, 0.0  ;;  %v3223_v17 = vld [vmem:[%s8216_s4 + $0x10] sm:$0xff]  ;;  %v3224_v34 = vld [vmem:[%s8216_s4 + $0x18] sm:$0xff] }
 0x2ca   : > { %6006 = vmatprep.subr.bf16.mxu1 %v6258_v63  ;;  %v6025_v41 = vpack.c.bf16 %v3224_v34, %v3223_v17  ;;  %v3924_v34 = vld [vmem:[%s8216_s4 + $0x120] sm:$0xff] }
 0x2cb   : > { %v3096_v31 = vadd.f32 %v7796_v5, %v3064_v20  ;;  %v3133_v20 = vld [vmem:[%s8215_s3 + $0x10] sm:$0xff] }
 0x2cc   : > { %v3005_v13 = vpop.f32.mrb[240].mxu0 }
 0x2cd   : > { %v3121_v38 = vmax.f32 %v3096_v31, 0.0  ;;  %v3065_v40 = vadd.f32 %v3005_v13, %v7762_v21  ;;  %v5784_v46 = vpop.f32.mrb[241].mxu0  ;;  %v3300_v31 = vld [vmem:[%s8216_s4 + $0x20] sm:$0xff]  ;;  %v3301_v13 = vld [vmem:[%s8216_s4 + $0x28] sm:$0xff] }
 0x2cf   : > { %v6007_v10 = vpack.c.bf16 %v3121_v38, %v3120_v9  ;;  %v3097_v32 = vadd.f32 %v7796_v5, %v3065_v40  ;;  %v6028_v9 = vpack.c.bf16 %v3301_v13, %v3300_v31  ;;  %v3302_v38 = vld [vmem:[%s8216_s4 + $0x30] sm:$0xff]  ;;  %v3303_v40 = vld [vmem:[%s8216_s4 + $0x38] sm:$0xff] }
 0x2d0   : > { %v3010_v54 = vpop.f32.mrb[242].mxu0  ;;  %v3926_v31 = vld [vmem:[%s8216_s4 + $0x130] sm:$0xff]  ;;  %v3927_v13 = vld [vmem:[%s8216_s4 + $0x138] sm:$0xff] }
 0x2d1   : > { %v3066_v57 = vadd.f32 %v3010_v54, %v7765_v16  ;;  %v5787_v12 = vpop.f32.mrb[243].mxu0  ;;  %6008 = vmatpush1.bf16.msra.mxu1 %v6007_v10  ;;  %v3122_v44 = vmax.f32 %v3097_v32, 0.0  ;;  %v6031_v54 = vpack.c.bf16 %v3303_v40, %v3302_v38  ;;  %v3378_v32 = vld [vmem:[%s8216_s4 + $0x40] sm:$0xff]  ;;  %v4003_v40 = vld [vmem:[%s8216_s4 + $0x148] sm:$0xff] }
 0x2d2   : > { %6009 = vmatprep.subr.bf16.mxu1 %v6258_v63  ;;  %v4002_v38 = vld [vmem:[%s8216_s4 + $0x140] sm:$0xff] }
 0x2d3   : > { %v3098_v24 = vadd.f32 %v7796_v5, %v3066_v57  ;;  %v3379_v57 = vld [vmem:[%s8216_s4 + $0x48] sm:$0xff] }
 0x2d4   : > { %v3015_v43 = vpop.f32.mrb[244].mxu0 }
 0x2d5   : > { %v3123_v50 = vmax.f32 %v3098_v24, 0.0  ;;  %v3067_v62 = vadd.f32 %v3015_v43, %v7768_v39  ;;  %v5790_v30 = vpop.f32.mrb[245].mxu0  ;;  %v6034_v43 = vpack.c.bf16 %v3379_v57, %v3378_v32  ;;  %v4005_v32 = vld [vmem:[%s8216_s4 + $0x158] sm:$0xff] }
 0x2d7   : > { %v6010_v21 = vpack.c.bf16 %v3123_v50, %v3122_v44  ;;  %v3099_v47 = vadd.f32 %v7796_v5, %v3067_v62  ;;  %v3380_v50 = vld [vmem:[%s8216_s4 + $0x50] sm:$0xff]  ;;  %v3381_v62 = vld [vmem:[%s8216_s4 + $0x58] sm:$0xff] }
 0x2d8   : > { %v3020_v58 = vpop.f32.mrb[246].mxu0  ;;  %v6037_v30 = vpack.c.bf16 %v3381_v62, %v3380_v50  ;;  %v4082_v62 = vld [vmem:[%s8216_s4 + $0x170] sm:$0xff] }
 0x2d9   : > { %v3068_v26 = vadd.f32 %v3020_v58, %v7775_v2  ;;  %v5793_v22 = vpop.f32.mrb[247].mxu0  ;;  %6011 = vmatpush1.bf16.msra.mxu1 %v6010_v21  ;;  %v3124_v28 = vmax.f32 %v3099_v47, 0.0  ;;  %v3456_v21 = vld [vmem:[%s8216_s4 + $0x60] sm:$0xff]  ;;  %v3457_v58 = vld [vmem:[%s8216_s4 + $0x68] sm:$0xff] }
 0x2da   : > { %6012 = vmatprep.subr.bf16.mxu1 %v6258_v63  ;;  %v6040_v47 = vpack.c.bf16 %v3457_v58, %v3456_v21  ;;  %v3458_v22 = vld [vmem:[%s8216_s4 + $0x70] sm:$0xff]  ;;  %v4158_v58 = vld [vmem:[%s8216_s4 + $0x180] sm:$0xff] }
 0x2db   : > { %v3100_v16 = vadd.f32 %v7796_v5, %v3068_v26 }
 0x2dc   : > { %v3025_v37 = vpop.f32.mrb[248].mxu0 }
 0x2dd   : > { %v3125_v6 = vmax.f32 %v3100_v16, 0.0  ;;  %v3069_v53 = vadd.f32 %v3025_v37, %v7778_v19  ;;  %v5796_v4 = vpop.f32.mrb[249].mxu0  ;;  %v3459_v16 = vld [vmem:[%s8216_s4 + $0x78] sm:$0xff] }
 0x2de   : > { %v6043_v37 = vpack.c.bf16 %v3459_v16, %v3458_v22  ;;  %v4160_v16 = vld [vmem:[%s8216_s4 + $0x190] sm:$0xff] }
 0x2df   : > { %v6013_v39 = vpack.c.bf16 %v3125_v6, %v3124_v28  ;;  %v3101_v51 = vadd.f32 %v7796_v5, %v3069_v53  ;;  %v3534_v28 = vld [vmem:[%s8216_s4 + $0x80] sm:$0xff]  ;;  %v3535_v6 = vld [vmem:[%s8216_s4 + $0x88] sm:$0xff] }
 0x2e0   : > { %v3030_v42 = vpop.f32.mrb[250].mxu0  ;;  %v6046_v53 = vpack.c.bf16 %v3535_v6, %v3534_v28  ;;  %v4236_v6 = vld [vmem:[%s8216_s4 + $0x1a0] sm:$0xff] }
 0x2e1   : > { %v3070_v45 = vadd.f32 %v3030_v42, %v7781_v7  ;;  %v5799_v48 = vpop.f32.mrb[251].mxu0  ;;  %6014 = vmatpush1.bf16.msra.mxu1 %v6013_v39  ;;  %v3126_v56 = vmax.f32 %v3101_v51, 0.0  ;;  %v3536_v39 = vld [vmem:[%s8216_s4 + $0x90] sm:$0xff]  ;;  %v3537_v42 = vld [vmem:[%s8216_s4 + $0x98] sm:$0xff] }
 0x2e2   : > { %6015 = vmatprep.subr.bf16.mxu1 %v6258_v63  ;;  %v6049_v51 = vpack.c.bf16 %v3537_v42, %v3536_v39  ;;  %v3613_v48 = vld [vmem:[%s8216_s4 + $0xa8] sm:$0xff]  ;;  %v4238_v42 = vld [vmem:[%s8216_s4 + $0x1b0] sm:$0xff] }
 0x2e3   : > { %v3102_v2 = vadd.f32 %v7796_v5, %v3070_v45  ;;  %v3612_v45 = vld [vmem:[%s8216_s4 + $0xa0] sm:$0xff] }
 0x2e4   : > { %v3035_v36 = vpop.f32.mrb[252].mxu0 }
 0x2e5   : > { %v3127_v15 = vmax.f32 %v3102_v2, 0.0  ;;  %v3071_v0 = vadd.f32 %v3035_v36, %v7784_v33  ;;  %v5802_v27 = vpop.f32.mrb[253].mxu0  ;;  %v6052_v2 = vpack.c.bf16 %v3613_v48, %v3612_v45  ;;  %v4314_v48 = vld [vmem:[%s8216_s4 + $0x1c0] sm:$0xff] }
 0x2e6   : > { %v3690_v27 = vld [vmem:[%s8216_s4 + $0xc0] sm:$0xff] }
 0x2e7   : > { %v6016_v19 = vpack.c.bf16 %v3127_v15, %v3126_v56  ;;  %v3103_v23 = vadd.f32 %v7796_v5, %v3071_v0  ;;  %v3614_v56 = vld [vmem:[%s8216_s4 + $0xb0] sm:$0xff]  ;;  %v3615_v15 = vld [vmem:[%s8216_s4 + $0xb8] sm:$0xff] }
 0x2e8   : > { %v3040_v3 = vpop.f32.mrb[254].mxu0  ;;  %v6055_v0 = vpack.c.bf16 %v3615_v15, %v3614_v56  ;;  %v4316_v15 = vld [vmem:[%s8216_s4 + $0x1d0] sm:$0xff] }
 0x2e9   : > { %v3072_v25 = vadd.f32 %v3040_v3, %v7787_v49  ;;  %v5805_v35 = vpop.f32.mrb[255].mxu0  ;;  %6017 = vmatpush1.bf16.msra.mxu1 %v6016_v19  ;;  %v3128_v55 = vmax.f32 %v3103_v23, 0.0  ;;  %v3222_v49 = vld [vmem:[%s8216_s4 + $0x8] sm:$0xff] }
 0x2ea   : > { %6018 = vmatprep.subr.bf16.mxu1 %v6258_v63  ;;  %v6022_v59 = vpack.c.bf16 %v3222_v49, %v3221_v8  ;;  %v3691_v19 = vld [vmem:[%s8216_s4 + $0xc8] sm:$0xff]  ;;  %v3693_v35 = vld [vmem:[%s8216_s4 + $0xd8] sm:$0xff]  ;;  %v3846_v8 = vld [vmem:[%s8216_s4 + $0x100] sm:$0xff] }
 0x2eb   : > { %v3104_v7 = vadd.f32 %v7796_v5, %v3072_v25  ;;  %v6058_v3 = vpack.c.bf16 %v3691_v19, %v3690_v27  ;;  %v3692_v25 = vld [vmem:[%s8216_s4 + $0xd0] sm:$0xff]  ;;  %v3847_v49 = vld [vmem:[%s8216_s4 + $0x108] sm:$0xff]  ;;  %v4392_v19 = vld [vmem:[%s8216_s4 + $0x1e0] sm:$0xff] }
 0x2ec   : > { %v3045_v14 = vpop.f32.mrb[0].mxu0 }
 0x2ed   : > { %v3129_v52 = vmax.f32 %v3104_v7, 0.0  ;;  %v3073_v18 = vadd.f32 %v3045_v14, %v7790_v60  ;;  %v5808_v11 = vpop.f32.mrb[1].mxu0  ;;  %v3131_v60 = vld [vmem:[%s8215_s3] sm:$0xff]  ;;  %v6061_v7 = vpack.c.bf16 %v3693_v35, %v3692_v25  ;;  %v4394_v35 = vld [vmem:[%s8216_s4 + $0x1f0] sm:$0xff] }
 0x2ee   : > { %v3768_v14 = vld [vmem:[%s8216_s4 + $0xe0] sm:$0xff]  ;;  %v3770_v11 = vld [vmem:[%s8216_s4 + $0xf0] sm:$0xff] }
 0x2ef   : > { %v6019_v33 = vpack.c.bf16 %v3129_v52, %v3128_v55  ;;  %v3105_v61 = vadd.f32 %v7796_v5, %v3073_v18  ;;  %v3134_v5 = vld [vmem:[%s8215_s3 + $0x18] sm:$0xff]  ;;  %v3769_v55 = vld [vmem:[%s8216_s4 + $0xe8] sm:$0xff] }
 0x2f0   : > { %v6064_v52 = vpack.c.bf16 %v3769_v55, %v3768_v14 }
 0x2f1   : > { %6020 = vmatpush1.bf16.msra.mxu1 %v6019_v33  ;;  %v3130_v29 = vmax.f32 %v3105_v61, 0.0  ;;  %v3771_v33 = vld [vmem:[%s8216_s4 + $0xf8] sm:$0xff] }
 0x2f2   : > { %3193 = vmatprep.subr.mxu1 %v6256_v1  ;;  %v6067_v61 = vpack.c.bf16 %v3771_v33, %v3770_v11 }
 0x2f5   : > { %4780 = vmatpush1.msk.msra.mxu1 %vm379_vm0, %v3130_v29  ;;  %v6070_v29 = vpack.c.bf16 %v3847_v49, %v3846_v8 }
 0x2f6   : > { %3210 = vmatmul.mubr.f32.vlgmr.msra.gmra.mrb[192].mxu1 %v3131_v60  ;;  %6021 = vmatprep.subr.bf16.mxu1 %v6258_v63 }
 0x2f7   : > { %4782 = vmatprep.mubr.msk.f32.mxu1 %vm3135_vm3, %v3134_v5  ;;  %6023 = vmatpush3.bf16.msra.mxu1 %v6022_v59  ;;  %v3848_v59 = vld [vmem:[%s8216_s4 + $0x110] sm:$0xff]  ;;  %v3849_v5 = vld [vmem:[%s8216_s4 + $0x118] sm:$0xff] }
 0x2f8   : > { %6024 = vmatprep.subr.bf16.mxu1 %v6258_v63  ;;  %v6073_v17 = vpack.c.bf16 %v3849_v5, %v3848_v59 }
 0x2fa   : > { %3215 = vmatmul.mubr.f32.gmra.mrb[194].mxu1 %v3133_v20  ;;  %v3925_v20 = vld [vmem:[%s8216_s4 + $0x128] sm:$0xff] }
 0x2fb   : > { %6026 = vmatpush3.bf16.msra.mxu1 %v6025_v41  ;;  %5817 = vmatprep.mubr.msk.f32.mxu1 %vm6257_vm1, %v6256_v1  ;;  %v6076_v41 = vpack.c.bf16 %v3925_v20, %v3924_v34 }
 0x2fc   : > { %6027 = vmatprep.subr.bf16.mxu1 %v6258_v63 }
 0x3c9   : > { %v7899_v46 = vpop.f32.mrb[192].mxu1 }
 0x3ca   : > { %5818 = vmatmul.mubr.msk.f32.vlgmr.msra.gmra.mrb[196].mxu1 %vm3225_vm4, %v7899_v46  ;;  %v3213_v10 = vpop.f32.mrb[193].mxu1  ;;  %v3304_v44 = vrot.slane %v7899_v46, 1  ;;  %v3382_v26 = vrot.slane %v7899_v46, 2  ;;  %v3460_v4 = vrot.slane %v7899_v46, 3  ;;  %v3538_v36 = vrot.slane %v7899_v46, 4 }
 0x3cb   : > { %6029 = vmatpush3.bf16.msra.mxu1 %v6028_v9  ;;  %5828 = vmatprep.mubr.msk.f32.mxu1 %vm6257_vm1, %v6256_v1  ;;  %v3616_v23 = vrot.slane %v7899_v46, 5  ;;  %v3694_v18 = vrot.slane %v7899_v46, 6  ;;  %v3772_v60 = vrot.slane %v7899_v46, 7  ;;  %v6079_v9 = vpack.c.bf16 %v3927_v13, %v3926_v31 }
 0x3cc   : > { %6030 = vmatprep.subr.bf16.mxu1 %v6258_v63  ;;  %v6082_v46 = vpack.c.bf16 %v4003_v40, %v4002_v38 }
 0x3cd   : > { %v7912_v12 = vpop.f32.mrb[194].mxu1 }
 0x3ce   : > { %v3218_v24 = vpop.f32.mrb[195].mxu1  ;;  %v3928_v10 = vrot.slane %v7912_v12, 1  ;;  %v4006_v50 = vrot.slane %v7912_v12, 2  ;;  %v4084_v22 = vrot.slane %v7912_v12, 3  ;;  %v4162_v39 = vrot.slane %v7912_v12, 4 }
 0x3cf   : > { %6032 = vmatpush3.bf16.msra.mxu1 %v6031_v54  ;;  %v4004_v54 = vld [vmem:[%s8216_s4 + $0x150] sm:$0xff]  ;;  %v4080_v24 = vld [vmem:[%s8216_s4 + $0x160] sm:$0xff]  ;;  %v4240_v56 = vrot.slane %v7912_v12, 5  ;;  %v4318_v25 = vrot.slane %v7912_v12, 6  ;;  %v4396_v55 = vrot.slane %v7912_v12, 7 }
 0x3d0   : > { %6033 = vmatprep.subr.bf16.mxu1 %v6258_v63  ;;  %v6085_v57 = vpack.c.bf16 %v4005_v32, %v4004_v54 }
 0x3d2   : > { %5829 = vmatmul.mubr.msk.f32.vlgmr.msra.gmra.mrb[196].mxu1 %vm3225_vm4, %v3304_v44 }
 0x3d3   : > { %6035 = vmatpush3.bf16.msra.mxu1 %v6034_v43  ;;  %5839 = vmatprep.mubr.msk.f32.mxu1 %vm6257_vm1, %v6256_v1  ;;  %v4081_v43 = vld [vmem:[%s8216_s4 + $0x168] sm:$0xff] }
 0x3d4   : > { %6036 = vmatprep.subr.bf16.mxu1 %v6258_v63  ;;  %v6088_v44 = vpack.c.bf16 %v4081_v43, %v4080_v24 }
 0x3d7   : > { %6038 = vmatpush3.bf16.msra.mxu1 %v6037_v30  ;;  %v4083_v30 = vld [vmem:[%s8216_s4 + $0x178] sm:$0xff] }
 0x3d8   : > { %6039 = vmatprep.subr.bf16.mxu1 %v6258_v63  ;;  %v6091_v21 = vpack.c.bf16 %v4083_v30, %v4082_v62 }
 0x3da   : > { %5840 = vmatmul.mubr.msk.f32.vlgmr.msra.gmra.mrb[196].mxu1 %vm3225_vm4, %v3382_v26 }
 0x3db   : > { %6041 = vmatpush3.bf16.msra.mxu1 %v6040_v47  ;;  %5850 = vmatprep.mubr.msk.f32.mxu1 %vm6257_vm1, %v6256_v1  ;;  %v4159_v47 = vld [vmem:[%s8216_s4 + $0x188] sm:$0xff] }
 0x3dc   : > { %6042 = vmatprep.subr.bf16.mxu1 %v6258_v63  ;;  %v6094_v26 = vpack.c.bf16 %v4159_v47, %v4158_v58 }
 0x3df   : > { %6044 = vmatpush3.bf16.msra.mxu1 %v6043_v37  ;;  %v4161_v37 = vld [vmem:[%s8216_s4 + $0x198] sm:$0xff] }
 0x3e0   : > { %6045 = vmatprep.subr.bf16.mxu1 %v6258_v63  ;;  %v6097_v28 = vpack.c.bf16 %v4161_v37, %v4160_v16 }
 0x3e2   : > { %5851 = vmatmul.mubr.msk.f32.vlgmr.msra.gmra.mrb[196].mxu1 %vm3225_vm4, %v3460_v4 }
 0x3e3   : > { %6047 = vmatpush3.bf16.msra.mxu1 %v6046_v53  ;;  %5861 = vmatprep.mubr.msk.f32.mxu1 %vm6257_vm1, %v6256_v1  ;;  %v4237_v53 = vld [vmem:[%s8216_s4 + $0x1a8] sm:$0xff] }
 0x3e4   : > { %6048 = vmatprep.subr.bf16.mxu1 %v6258_v63  ;;  %v6100_v4 = vpack.c.bf16 %v4237_v53, %v4236_v6 }
 0x3e7   : > { %6050 = vmatpush3.bf16.msra.mxu1 %v6049_v51  ;;  %v4239_v51 = vld [vmem:[%s8216_s4 + $0x1b8] sm:$0xff] }
 0x3e8   : > { %6051 = vmatprep.subr.bf16.mxu1 %v6258_v63  ;;  %v6103_v45 = vpack.c.bf16 %v4239_v51, %v4238_v42 }
 0x3ea   : > { %5862 = vmatmul.mubr.msk.f32.vlgmr.msra.gmra.mrb[196].mxu1 %vm3225_vm4, %v3538_v36 }
 0x3eb   : > { %6053 = vmatpush3.bf16.msra.mxu1 %v6052_v2  ;;  %5872 = vmatprep.mubr.msk.f32.mxu1 %vm6257_vm1, %v6256_v1  ;;  %v4315_v2 = vld [vmem:[%s8216_s4 + $0x1c8] sm:$0xff] }
 0x3ec   : > { %6054 = vmatprep.subr.bf16.mxu1 %v6258_v63  ;;  %v6106_v36 = vpack.c.bf16 %v4315_v2, %v4314_v48 }
 0x3ef   : > { %6056 = vmatpush3.bf16.msra.mxu1 %v6055_v0  ;;  %v4317_v0 = vld [vmem:[%s8216_s4 + $0x1d8] sm:$0xff] }
 0x3f0   : > { %6057 = vmatprep.subr.bf16.mxu1 %v6258_v63  ;;  %v6109_v27 = vpack.c.bf16 %v4317_v0, %v4316_v15 }
 0x3f2   : > { %5873 = vmatmul.mubr.msk.f32.vlgmr.msra.gmra.mrb[196].mxu1 %vm3225_vm4, %v3616_v23 }
 0x3f3   : > { %6059 = vmatpush3.bf16.msra.mxu1 %v6058_v3  ;;  %5883 = vmatprep.mubr.msk.f32.mxu1 %vm6257_vm1, %v6256_v1  ;;  %v4393_v3 = vld [vmem:[%s8216_s4 + $0x1e8] sm:$0xff] }
 0x3f4   : > { %6060 = vmatprep.subr.bf16.mxu1 %v6258_v63  ;;  %v6112_v23 = vpack.c.bf16 %v4393_v3, %v4392_v19 }
 0x3f7   : > { %6062 = vmatpush3.bf16.msra.mxu1 %v6061_v7  ;;  %v4395_v7 = vld [vmem:[%s8216_s4 + $0x1f8] sm:$0xff] }
 0x3f8   : > { %6063 = vmatprep.subr.bf16.mxu1 %v6258_v63  ;;  %v6115_v14 = vpack.c.bf16 %v4395_v7, %v4394_v35 }
 0x3fa   : > { %5884 = vmatmul.mubr.msk.f32.vlgmr.msra.gmra.mrb[196].mxu1 %vm3225_vm4, %v3694_v18 }
 0x3fb   : > { %6065 = vmatpush3.bf16.msra.mxu1 %v6064_v52  ;;  %5894 = vmatprep.mubr.msk.f32.mxu1 %vm6257_vm1, %v6256_v1  ;;  %v3220_v52 = vld [vmem:[%s8217_s5] sm:$0x1] }
 0x3fc   : > { %6066 = vmatprep.subr.bf16.mxu1 %v6258_v63 }
 0x3ff   : > { %6068 = vmatpush3.bf16.msra.mxu1 %v6067_v61 }
 0x400   : > { %6069 = vmatprep.subr.bf16.mxu1 %v6258_v63 }
 0x402   : > { %5895 = vmatmul.mubr.msk.f32.vlgmr.msra.gmra.mrb[196].mxu1 %vm3225_vm4, %v3772_v60 }
 0x403   : > { %6071 = vmatpush3.bf16.msra.mxu1 %v6070_v29  ;;  %5905 = vmatprep.mubr.msk.f32.mxu1 %vm6257_vm1, %v6256_v1 }
 0x404   : > { %6072 = vmatprep.subr.bf16.mxu1 %v6258_v63 }
 0x407   : > { %6074 = vmatpush3.bf16.msra.mxu1 %v6073_v17 }
 0x408   : > { %6075 = vmatprep.subr.bf16.mxu1 %v6258_v63 }
 0x40a   : > { %5906 = vmatmul.mubr.msk.f32.vlgmr.msra.gmra.mrb[196].mxu1 %vm3225_vm4, %v7912_v12 }
 0x40b   : > { %6077 = vmatpush3.bf16.msra.mxu1 %v6076_v41  ;;  %5916 = vmatprep.mubr.msk.f32.mxu1 %vm6257_vm1, %v6256_v1 }
 0x40c   : > { %6078 = vmatprep.subr.bf16.mxu1 %v6258_v63 }
 0x40f   : > { %6080 = vmatpush3.bf16.msra.mxu1 %v6079_v9 }
 0x410   : > { %6081 = vmatprep.subr.bf16.mxu1 %v6258_v63 }
 0x412   : > { %5917 = vmatmul.mubr.msk.f32.vlgmr.msra.gmra.mrb[196].mxu1 %vm3225_vm4, %v3928_v10 }
 0x413   : > { %6083 = vmatpush3.bf16.msra.mxu1 %v6082_v46  ;;  %5927 = vmatprep.mubr.msk.f32.mxu1 %vm6257_vm1, %v6256_v1 }
 0x414   : > { %6084 = vmatprep.subr.bf16.mxu1 %v6258_v63 }
 0x417   : > { %6086 = vmatpush3.bf16.msra.mxu1 %v6085_v57 }
 0x418   : > { %6087 = vmatprep.subr.bf16.mxu1 %v6258_v63 }
 0x41a   : > { %5928 = vmatmul.mubr.msk.f32.vlgmr.msra.gmra.mrb[196].mxu1 %vm3225_vm4, %v4006_v50 }
 0x41b   : > { %6089 = vmatpush3.bf16.msra.mxu1 %v6088_v44  ;;  %5938 = vmatprep.mubr.msk.f32.mxu1 %vm6257_vm1, %v6256_v1 }
 0x41c   : > { %6090 = vmatprep.subr.bf16.mxu1 %v6258_v63 }
 0x41f   : > { %6092 = vmatpush3.bf16.msra.mxu1 %v6091_v21 }
 0x420   : > { %6093 = vmatprep.subr.bf16.mxu1 %v6258_v63 }
 0x422   : > { %5939 = vmatmul.mubr.msk.f32.vlgmr.msra.gmra.mrb[196].mxu1 %vm3225_vm4, %v4084_v22 }
 0x423   : > { %6095 = vmatpush3.bf16.msra.mxu1 %v6094_v26  ;;  %5949 = vmatprep.mubr.msk.f32.mxu1 %vm6257_vm1, %v6256_v1 }
 0x424   : > { %6096 = vmatprep.subr.bf16.mxu1 %v6258_v63 }
 0x427   : > { %6098 = vmatpush3.bf16.msra.mxu1 %v6097_v28 }
 0x428   : > { %6099 = vmatprep.subr.bf16.mxu1 %v6258_v63 }
 0x42a   : > { %5950 = vmatmul.mubr.msk.f32.vlgmr.msra.gmra.mrb[196].mxu1 %vm3225_vm4, %v4162_v39 }
 0x42b   : > { %6101 = vmatpush3.bf16.msra.mxu1 %v6100_v4  ;;  %5960 = vmatprep.mubr.msk.f32.mxu1 %vm6257_vm1, %v6256_v1 }
 0x42c   : > { %6102 = vmatprep.subr.bf16.mxu1 %v6258_v63 }
 0x42f   : > { %6104 = vmatpush3.bf16.msra.mxu1 %v6103_v45 }
 0x430   : > { %6105 = vmatprep.subr.bf16.mxu1 %v6258_v63 }
 0x432   : > { %5961 = vmatmul.mubr.msk.f32.vlgmr.msra.gmra.mrb[196].mxu1 %vm3225_vm4, %v4240_v56 }
 0x433   : > { %6107 = vmatpush3.bf16.msra.mxu1 %v6106_v36  ;;  %5971 = vmatprep.mubr.msk.f32.mxu1 %vm6257_vm1, %v6256_v1 }
 0x434   : > { %6108 = vmatprep.subr.bf16.mxu1 %v6258_v63 }
 0x437   : > { %6110 = vmatpush3.bf16.msra.mxu1 %v6109_v27 }
 0x438   : > { %6111 = vmatprep.subr.bf16.mxu1 %v6258_v63 }
 0x43a   : > { %5972 = vmatmul.mubr.msk.f32.vlgmr.msra.gmra.mrb[196].mxu1 %vm3225_vm4, %v4318_v25 }
 0x43b   : > { %6113 = vmatpush3.bf16.msra.mxu1 %v6112_v23  ;;  %5982 = vmatprep.mubr.msk.f32.mxu1 %vm6257_vm1, %v6256_v1 }
 0x43c   : > { %6114 = vmatprep.subr.bf16.mxu1 %v6258_v63 }
 0x43f   : > { %6116 = vmatpush3.bf16.msra.mxu1 %v6115_v14 }
 0x442   : > { %5983 = vmatmul.mubr.msk.f32.vlgmr.msra.gmra.mrb[196].mxu1 %vm3225_vm4, %v4396_v55 }
 0x515   : > { %v4465_v18 = vpop.f32.mrb[196].mxu1 }
 0x516   : > { %v6119_v11 = vadd.f32 %v4465_v18, %v3220_v52  ;;  %v5984_v1 = vpop.f32.mrb[197].mxu1 }
 0x518   : > { %4471 = vst.msk [vmem:[%s244_s9] sm:$0x1] %vm4470_vm5, %v6119_v11 }
 0x519   : > { %6205 = shalt.err (!%p6202_p3)
}
 0x51a   : > { %s6206_s18 = scalar_lea.hbm %s8170_s13, 16  ;;  %s6210_s26 = scalar_lea.hbm %s8218_s6, 32 }
 0x51b   : > { %p6207_p4 = scmp.ne.s32.totalorder %s8170_s13, %s6206_s18  ;;  %p6211_p9 = scmp.lt.u32.totalorder %s8170_s13, %s8218_s6 }
 0x51c   : > { %p6212_p10 = scmp.lt.u32.totalorder %s6210_s26, %s6206_s18  ;;  %p6214_p12 = scmp.lt.u32.totalorder %s6206_s18, %s8170_s13 }
 0x51d   : > { %p6208_p7 = pnand %p6207_p4, %p6333_p5 }
 0x51e   : > { %p6213_p11 = por %p6212_p10, %p6211_p9 }
 0x51f   : > { %p6209_p8 = pneg %p6208_p7 }
 0x520   : > { %p6215_p13 = por %p6214_p12, %p6213_p11 }
 0x522   : > { %p6216_p0 = pnand %p6215_p13, %p6209_p8 }
 0x524   : > { %6219 = shalt.err (!%p6216_p0)
}
 0x525   : > { %6150 = dma.vmem_to_hbm [thread:$0]  (%p6333_p5), %s8172_s10, 16, %s8170_s13, %s4473_s14  }
 0x526 PF: > { %p6156_p1 = scmp.ge.s32.totalorder %s6254_s24, 2  ;;  %s4497_s9 = sand.u32 1, %s6242_s21  }
 0x527   : > { %s4498_s11 = scalar_lea.sflag [#allocation3], %s4497_s9 }
 0x528   : > { %p6153_p2 = pnand %p6156_p1, %p6337_p6 }
 0x52a   : > { %6237 = dma.done.wait (!%p6153_p2), %s4498_s11, 16  }
 0x52b   : > { %6239 = vsyncadd (!%p6153_p2), %s4498_s11, 4294967280  ;;  %p16_p3 = scmp.ge.s32.totalorder %s6320_s27, 4   ;;  %s8221_s21 = smov %s6246_s22 }
 0x52c   : > { %s8222_s22 = smov %s6250_s23  ;;  %s8223_s23 = smov %s6331_s30 }
 0x52d   : > { %s8224_s24 = smov %s6320_s27  ;;  %18 = sbr.rel (!%p16_p3) target bundleno = 3 (0x3), region = 79 }
 0x534   :  { %4502 = vsyncpa [#allocation3], 1 }
 0x535   :  { %4504 = vsyncpa [#allocation3 + $0x1], 1 }

</bundles_post_ra>
